<compile_context>
chip_gen: v7x
topology: tpu7x:2x2x1
jax: 0.10.0
libtpu: 0.0.40
codegen_flags: <defaults>
</compile_context>

<pallas_src>
import functools

import jax
import jax.numpy as jnp
from jax.experimental import pallas as pl
from jax.experimental.pallas import tpu as pltpu


# ----------------------------- small helpers --------------------------------

def _round_up(x, m):
    return (x + m - 1) // m * m


# --------------------- conv kernel (pad + conv + act) ------------------------

def _conv_tap_kernel(x0, x1, x2, x3, w_ref, b_ref, o_ref, *, stride, leaky, slope):
    """One output row of ReflectionPad(1)+Conv2d(k=4,stride)+optional LeakyReLU.

    x{i}  : (1, 1, stride, Wq, Cp)  input row s*ho+i, split into column phases
    w_ref : (16, Cp, Np)            tap-major weight, K/N zero-padded, bf16
    b_ref : (1, Np)                 fp32 bias
    o_ref : (1, 1, Wo_p, Np)        one output row (sublane/lane aligned)
    """
    Wo_p = o_ref.shape[2]
    Np = o_ref.shape[3]
    acc = jnp.zeros((Wo_p, Np), jnp.float32)
    x_rows = (x0, x1, x2, x3)
    for i in range(4):                       # kernel-height taps (rows)
        for j in range(4):                   # kernel-width taps (cols)
            p, o = j % stride, j // stride
            xa = x_rows[i][0, 0, p, o:o + Wo_p, :]          # (Wo_p, Cp) bf16
            acc = acc + jnp.dot(xa, w_ref[i * 4 + j],
                                preferred_element_type=jnp.float32)
    acc = acc + b_ref[...]
    if leaky:
        acc = jnp.where(acc >= 0, acc, slope * acc)
    o_ref[0, 0] = acc.astype(o_ref.dtype)


def conv_forward(x_nhwc, layer, stride, cout, *, leaky, out_dtype=jnp.bfloat16):
    """ReflectionPad2d(1) + Conv2d(k=4, stride) (+ LeakyReLU(0.2)) in NHWC."""
    B, H, W, Cin = x_nhwc.shape
    wmat, bias = layer["wmat"], layer["b"]          # (16, Cp, Np), (1, Np)
    Cp, Np = wmat.shape[1], wmat.shape[2]

    Hp, Wp = H + 2, W + 2
    Ho = (Hp - 4) // stride + 1
    Wo = (Wp - 4) // stride + 1
    Wo_p = _round_up(Wo, 8)                         # sublane-full output rows
    max_o = (4 - 1) // stride                       # max in-phase column offset
    Wq = max(Wo_p + max_o, -(-Wp // stride))        # phase-plane width

    xp = jnp.pad(x_nhwc.astype(jnp.bfloat16),
                 ((0, 0), (1, 1), (1, 1), (0, 0)), mode="reflect")
    # Zero-pad columns to Wq*stride and channels to Cp (padded weight rows are 0,
    # padded output columns are sliced off below).
    xp = jnp.pad(xp, ((0, 0), (0, 0), (0, Wq * stride - Wp), (0, Cp - Cin)))
    # Column-phase split: xph[b, h, p, q, c] = xp[b, h, q*stride + p, c]
    xph = xp.reshape(B, Hp, Wq, stride, Cp).transpose(0, 1, 3, 2, 4)

    x_specs = [
        pl.BlockSpec((1, 1, stride, Wq, Cp),
                     (lambda b, ho, i=i: (b, stride * ho + i, 0, 0, 0)))
        for i in range(4)
    ]
    kernel = functools.partial(_conv_tap_kernel, stride=stride,
                               leaky=leaky, slope=0.2)
    y = pl.pallas_call(
        kernel,
        out_shape=jax.ShapeDtypeStruct((B, Ho, Wo_p, Np), out_dtype),
        grid_spec=pltpu.PrefetchScalarGridSpec(
            num_scalar_prefetch=0,
            grid=(B, Ho),
            in_specs=x_specs + [
                pl.BlockSpec((16, Cp, Np), lambda b, ho: (0, 0, 0)),  # resident
                pl.BlockSpec((1, Np), lambda b, ho: (0, 0)),
            ],
            out_specs=pl.BlockSpec((1, 1, Wo_p, Np), lambda b, ho: (b, ho, 0, 0)),
        ),
        compiler_params=pltpu.CompilerParams(
            dimension_semantics=("parallel", "parallel"),
            vmem_limit_bytes=32 * 1024 * 1024,
        ),
    )(xph, xph, xph, xph, wmat, bias)
    return y[:, :, :Wo, :cout]


# ------------------------------ CAM kernel ------------------------------------

def _cam_kernel(x_ref, gw_ref, mw_ref, wg_ref, wm_ref, b_ref,
                cam_ref, y_ref, *, slope):
    """Fused CAM: channel re-weighting, 1x1 conv, bias, LeakyReLU(0.2).

    cam_ref gets cam_logit = concat([x*gap_w, x*gmp_w]) as one (tm, 2C) store.
    """
    x = x_ref[...]                                  # (tm, C) bf16
    xg = x * gw_ref[...]
    xm = x * mw_ref[...]
    cam_ref[...] = jnp.concatenate([xg, xm], axis=-1).astype(cam_ref.dtype)
    acc = jnp.dot(xg, wg_ref[...], preferred_element_type=jnp.float32)
    acc = acc + jnp.dot(xm, wm_ref[...], preferred_element_type=jnp.float32)
    acc = acc + b_ref[...]
    acc = jnp.where(acc >= 0, acc, slope * acc)
    y_ref[...] = acc.astype(y_ref.dtype)


def cam_forward(x_nhwc, cam_params, C):
    """x_nhwc: (B,H,W,C) bf16 -> (cam_logit (B,H,W,2C) bf16, y (B,H,W,C) bf16)."""
    B, H, Wsp, Cx = x_nhwc.shape
    assert Cx == C
    M = B * H * Wsp
    tm = min(512, _round_up(max(M // 2, 8), 16))    # 16-aligned, >=2 blocks if possible
    Mp = _round_up(M, tm)
    xf = x_nhwc.reshape(M, C)
    if Mp != M:
        xf = jnp.pad(xf, ((0, Mp - M), (0, 0)))
    Np = cam_params["wg"].shape[1]

    cam, y = pl.pallas_call(
        functools.partial(_cam_kernel, slope=0.2),
        out_shape=(
            jax.ShapeDtypeStruct((Mp, 2 * C), jnp.bfloat16),
            jax.ShapeDtypeStruct((Mp, Np), jnp.bfloat16),
        ),
        grid_spec=pltpu.PrefetchScalarGridSpec(
            num_scalar_prefetch=0,
            grid=(Mp // tm,),
            in_specs=[
                pl.BlockSpec((tm, C), lambda i: (i, 0)),
                pl.BlockSpec((1, C), lambda i: (0, 0)),
                pl.BlockSpec((1, C), lambda i: (0, 0)),
                pl.BlockSpec((C, Np), lambda i: (0, 0)),
                pl.BlockSpec((C, Np), lambda i: (0, 0)),
                pl.BlockSpec((1, Np), lambda i: (0, 0)),
            ],
            out_specs=(
                pl.BlockSpec((tm, 2 * C), lambda i: (i, 0)),
                pl.BlockSpec((tm, Np), lambda i: (i, 0)),
            ),
        ),
        compiler_params=pltpu.CompilerParams(
            dimension_semantics=("parallel",),
            vmem_limit_bytes=32 * 1024 * 1024,
        ),
    )(xf, cam_params["gap_w"], cam_params["gmp_w"],
      cam_params["wg"], cam_params["wm"], cam_params["b"])

    cam = cam[:M].reshape(B, H, Wsp, 2 * C)
    y = y[:M, :C].reshape(B, H, Wsp, C)
    return cam, y


# ----------------------------- Parameters ------------------------------------

def spectral_norm(w, u):
    """One power iteration (same math as torch.nn.utils.spectral_norm)."""
    cout = w.shape[0]
    wm = w.reshape(cout, -1)
    v = wm.T @ u
    v = v / (jnp.linalg.norm(v) + 1e-12)
    u2 = wm @ v
    u2 = u2 / (jnp.linalg.norm(u2) + 1e-12)
    sigma = jnp.dot(u2, wm @ v)
    return w / sigma


def make_config(channels=8, n_layers=3):
    cfg = [(3, channels, 2)]
    times = 1
    for _ in range(1, n_layers - 1):
        cfg.append((channels * times, channels * times * 2, 2))
        times *= 2
    cfg.append((channels * times, channels * times * 2, 1))
    C = channels * times * 2
    return tuple(cfg), C


def _prep_conv(w, b):
    """(Cout,Cin,KH,KW) torch weight -> tap-major padded bf16 weight + fp32 bias."""
    cout, cin, kh, kw = w.shape
    Np = _round_up(cout, 128)                       # lane-dense N
    Cp = _round_up(cin, 16)                         # bf16 sublane pack for K
    wmat = jnp.transpose(w, (2, 3, 1, 0)).reshape(kh * kw, cin, cout)
    wmat = jnp.pad(wmat, ((0, 0), (0, Cp - cin), (0, Np - cout))).astype(jnp.bfloat16)
    bp = jnp.pad(b, (0, Np - cout)).reshape(1, Np).astype(jnp.float32)
    return {"wmat": wmat, "b": bp}


def init_discriminator_params(key, channels=8, n_layers=3):
    head_cfg, C = make_config(channels, n_layers)
    keys = iter(jax.random.split(key, 64))

    def nk():
        return next(keys)

    def make_sn_conv(cin, cout, k):
        w = jax.random.normal(nk(), (cout, cin, k, k), jnp.float32)   # normal_(0,1)
        u = jax.random.normal(nk(), (cout,), jnp.float32)
        u = u / (jnp.linalg.norm(u) + 1e-12)
        w = spectral_norm(w, u)
        bound = 1.0 / jnp.sqrt(jnp.float32(cin * k * k))              # torch bias init
        b = jax.random.uniform(nk(), (cout,), jnp.float32, -bound, bound)
        return _prep_conv(w, b)

    params = {"head": [], "cam": {}, "tale": {}}
    for cin, cout, _stride in head_cfg:
        params["head"].append(make_sn_conv(cin, cout, 4))

    # CAM: gap/gmp FC weights (raw normal init, no spectral norm per the spec)
    # and the 1x1 conv (weight normal, bias filled 0.0).
    gap_w = jax.random.normal(nk(), (1, C), jnp.float32)
    gmp_w = jax.random.normal(nk(), (1, C), jnp.float32)
    conv_w = jax.random.normal(nk(), (C, 2 * C, 1, 1), jnp.float32)
    conv_b = jnp.zeros((C,), jnp.float32)
    Np = _round_up(C, 128)
    wmat_cam = jnp.transpose(conv_w, (2, 3, 1, 0)).reshape(2 * C, C)
    wmat_cam = jnp.pad(wmat_cam, ((0, 0), (0, Np - C)))
    params["cam"] = {
        "gap_w": gap_w.astype(jnp.bfloat16),
        "gmp_w": gmp_w.astype(jnp.bfloat16),
        "wg": wmat_cam[:C].astype(jnp.bfloat16),    # rows multiplying the gap half
        "wm": wmat_cam[C:].astype(jnp.bfloat16),    # rows multiplying the gmp half
        "b": jnp.pad(conv_b, (0, Np - C)).reshape(1, Np).astype(jnp.float32),
    }

    params["tale"] = make_sn_conv(C, 1, 4)
    return params


# ------------------------------- Forward --------------------------------------

def discriminator_forward(params, x_nchw, head_cfg, C):
    # NCHW in -> NHWC (bf16) internal -> NCHW out (matches PyTorch shapes).
    x = jnp.transpose(x_nchw, (0, 2, 3, 1)).astype(jnp.bfloat16)

    # head: [ReflectionPad2d(1) + SNConv2d(k=4) + LeakyReLU(0.2)] * n_layers
    for layer, (_cin, cout, stride) in zip(params["head"], head_cfg):
        x = conv_forward(x, layer, stride, cout, leaky=True)

    # CAM (fused re-weight + 1x1 conv + Discriminator-level LeakyReLU(0.2)).
    cam_logit, y = cam_forward(x, params["cam"], C)

    # tale: ReflectionPad2d(1) + SNConv2d(C, 1, 4), no activation.
    out = conv_forward(y, params["tale"], 1, 1, leaky=False, out_dtype=jnp.float32)

    out = jnp.transpose(out, (0, 3, 1, 2))                            # (B, 1, Ho, Wo)
    cam_logit_out = jnp.transpose(cam_logit, (0, 3, 1, 2)).astype(jnp.float32)
    return out, cam_logit_out


# --------------------------------- main ----------------------------------------

if __name__ == "__main__":
    key = jax.random.PRNGKey(0)
    pkey, xkey = jax.random.split(key)

    channels, n_layers = 8, 3                     # small synthetic config
    head_cfg, C = make_config(channels, n_layers)
    params = init_discriminator_params(pkey, channels=channels, n_layers=n_layers)

    x = jax.random.normal(xkey, (2, 3, 16, 16), jnp.float32)          # NCHW input

    fwd = jax.jit(lambda p, xx: discriminator_forward(p, xx, head_cfg, C))
    out, cam_logit = fwd(params, x)
    jax.block_until_ready(out)
    jax.block_until_ready(cam_logit)

    # 16 -> 8 (s2) -> 4 (s2) -> 3 (s1);  tale: 3 -> 2
    assert out.shape == (2, 1, 2, 2), out.shape
    assert cam_logit.shape == (2, 2 * C, 3, 3), cam_logit.shape
    assert bool(jnp.all(jnp.isfinite(out))) and bool(jnp.all(jnp.isfinite(cam_logit)))
    print("KERNEL_OK")
</pallas_src>

<mosaic_0001>
module attributes {stable_mosaic.version = 11 : i64} {
  func.func @_conv_tap_kernel(%arg0: i32, %arg1: i32, %arg2: memref<1x1x2x9x16xbf16, #tpu.memory_space<vmem>>, %arg3: memref<1x1x2x9x16xbf16, #tpu.memory_space<vmem>>, %arg4: memref<1x1x2x9x16xbf16, #tpu.memory_space<vmem>>, %arg5: memref<1x1x2x9x16xbf16, #tpu.memory_space<vmem>>, %arg6: memref<16x16x128xbf16, #tpu.memory_space<vmem>>, %arg7: memref<1x128xf32, #tpu.memory_space<vmem>>, %arg8: memref<1x1x8x128xbf16, #tpu.memory_space<vmem>>) attributes {dimension_semantics = [#tpu.dimension_semantics<parallel>, #tpu.dimension_semantics<parallel>], iteration_bounds = array<i64: 2, 8>, scalar_prefetch = 0 : i64, scratch_operands = 0 : i64, tpu.core_type = #tpu.core_type<tc>, window_params = [{transform_indices = @transform_0, window_bounds = array<i64: 1, 1, 2, 9, 16>}, {transform_indices = @transform_1, window_bounds = array<i64: 1, 1, 2, 9, 16>}, {transform_indices = @transform_2, window_bounds = array<i64: 1, 1, 2, 9, 16>}, {transform_indices = @transform_3, window_bounds = array<i64: 1, 1, 2, 9, 16>}, {pipeline_mode = #tpu.pipeline_mode<synchronous>, transform_indices = @transform_4, window_bounds = array<i64: 16, 16, 128>}, {pipeline_mode = #tpu.pipeline_mode<synchronous>, transform_indices = @transform_5, window_bounds = array<i64: 1, 128>}, {transform_indices = @transform_6, window_bounds = array<i64: 1, 1, 8, 128>}]} {
    %cst = arith.constant 0.000000e+00 : f32
    %0 = vector.broadcast %cst : f32 to vector<8x128xf32>
    %c0 = arith.constant 0 : index
    %c0_0 = arith.constant 0 : index
    %c0_1 = arith.constant 0 : index
    %c0_2 = arith.constant 0 : index
    %c0_3 = arith.constant 0 : index
    %1 = vector.load %arg2[%c0, %c0_0, %c0_1, %c0_2, %c0_3] : memref<1x1x2x9x16xbf16, #tpu.memory_space<vmem>>, vector<1x1x1x8x16xbf16>
    %2 = vector.shape_cast %1 : vector<1x1x1x8x16xbf16> to vector<8x16xbf16>
    %c0_4 = arith.constant 0 : index
    %c0_5 = arith.constant 0 : index
    %c0_6 = arith.constant 0 : index
    %3 = vector.load %arg6[%c0_4, %c0_5, %c0_6] : memref<16x16x128xbf16, #tpu.memory_space<vmem>>, vector<1x16x128xbf16>
    %4 = vector.shape_cast %3 : vector<1x16x128xbf16> to vector<16x128xbf16>
    %cst_7 = arith.constant dense<0.000000e+00> : vector<8x128xf32>
    %5 = tpu.matmul %2, %4, %cst_7 {dimension_numbers = #tpu.dot_dimension_numbers<[1], [0], [0], [1], [0, 0, 1, 1], [], []>} : vector<8x16xbf16>, vector<16x128xbf16>, vector<8x128xf32> -> vector<8x128xf32>
    %6 = arith.addf %0, %5 : vector<8x128xf32>
    %c0_8 = arith.constant 0 : index
    %c0_9 = arith.constant 0 : index
    %c1 = arith.constant 1 : index
    %c0_10 = arith.constant 0 : index
    %c0_11 = arith.constant 0 : index
    %7 = vector.load %arg2[%c0_8, %c0_9, %c1, %c0_10, %c0_11] : memref<1x1x2x9x16xbf16, #tpu.memory_space<vmem>>, vector<1x1x1x8x16xbf16>
    %8 = vector.shape_cast %7 : vector<1x1x1x8x16xbf16> to vector<8x16xbf16>
    %c1_12 = arith.constant 1 : index
    %c0_13 = arith.constant 0 : index
    %c0_14 = arith.constant 0 : index
    %9 = vector.load %arg6[%c1_12, %c0_13, %c0_14] : memref<16x16x128xbf16, #tpu.memory_space<vmem>>, vector<1x16x128xbf16>
    %10 = vector.shape_cast %9 : vector<1x16x128xbf16> to vector<16x128xbf16>
    %cst_15 = arith.constant dense<0.000000e+00> : vector<8x128xf32>
    %11 = tpu.matmul %8, %10, %cst_15 {dimension_numbers = #tpu.dot_dimension_numbers<[1], [0], [0], [1], [0, 0, 1, 1], [], []>} : vector<8x16xbf16>, vector<16x128xbf16>, vector<8x128xf32> -> vector<8x128xf32>
    %12 = arith.addf %6, %11 : vector<8x128xf32>
    %c0_16 = arith.constant 0 : index
    %c0_17 = arith.constant 0 : index
    %c0_18 = arith.constant 0 : index
    %c1_19 = arith.constant 1 : index
    %c0_20 = arith.constant 0 : index
    %13 = vector.load %arg2[%c0_16, %c0_17, %c0_18, %c1_19, %c0_20] : memref<1x1x2x9x16xbf16, #tpu.memory_space<vmem>>, vector<1x1x1x8x16xbf16>
    %14 = vector.shape_cast %13 : vector<1x1x1x8x16xbf16> to vector<8x16xbf16>
    %c2 = arith.constant 2 : index
    %c0_21 = arith.constant 0 : index
    %c0_22 = arith.constant 0 : index
    %15 = vector.load %arg6[%c2, %c0_21, %c0_22] : memref<16x16x128xbf16, #tpu.memory_space<vmem>>, vector<1x16x128xbf16>
    %16 = vector.shape_cast %15 : vector<1x16x128xbf16> to vector<16x128xbf16>
    %cst_23 = arith.constant dense<0.000000e+00> : vector<8x128xf32>
    %17 = tpu.matmul %14, %16, %cst_23 {dimension_numbers = #tpu.dot_dimension_numbers<[1], [0], [0], [1], [0, 0, 1, 1], [], []>} : vector<8x16xbf16>, vector<16x128xbf16>, vector<8x128xf32> -> vector<8x128xf32>
    %18 = arith.addf %12, %17 : vector<8x128xf32>
    %c0_24 = arith.constant 0 : index
    %c0_25 = arith.constant 0 : index
    %c1_26 = arith.constant 1 : index
    %c1_27 = arith.constant 1 : index
    %c0_28 = arith.constant 0 : index
    %19 = vector.load %arg2[%c0_24, %c0_25, %c1_26, %c1_27, %c0_28] : memref<1x1x2x9x16xbf16, #tpu.memory_space<vmem>>, vector<1x1x1x8x16xbf16>
    %20 = vector.shape_cast %19 : vector<1x1x1x8x16xbf16> to vector<8x16xbf16>
    %c3 = arith.constant 3 : index
    %c0_29 = arith.constant 0 : index
    %c0_30 = arith.constant 0 : index
    %21 = vector.load %arg6[%c3, %c0_29, %c0_30] : memref<16x16x128xbf16, #tpu.memory_space<vmem>>, vector<1x16x128xbf16>
    %22 = vector.shape_cast %21 : vector<1x16x128xbf16> to vector<16x128xbf16>
    %cst_31 = arith.constant dense<0.000000e+00> : vector<8x128xf32>
    %23 = tpu.matmul %20, %22, %cst_31 {dimension_numbers = #tpu.dot_dimension_numbers<[1], [0], [0], [1], [0, 0, 1, 1], [], []>} : vector<8x16xbf16>, vector<16x128xbf16>, vector<8x128xf32> -> vector<8x128xf32>
    %24 = arith.addf %18, %23 : vector<8x128xf32>
    %c0_32 = arith.constant 0 : index
    %c0_33 = arith.constant 0 : index
    %c0_34 = arith.constant 0 : index
    %c0_35 = arith.constant 0 : index
    %c0_36 = arith.constant 0 : index
    %25 = vector.load %arg3[%c0_32, %c0_33, %c0_34, %c0_35, %c0_36] : memref<1x1x2x9x16xbf16, #tpu.memory_space<vmem>>, vector<1x1x1x8x16xbf16>
    %26 = vector.shape_cast %25 : vector<1x1x1x8x16xbf16> to vector<8x16xbf16>
    %c4 = arith.constant 4 : index
    %c0_37 = arith.constant 0 : index
    %c0_38 = arith.constant 0 : index
    %27 = vector.load %arg6[%c4, %c0_37, %c0_38] : memref<16x16x128xbf16, #tpu.memory_space<vmem>>, vector<1x16x128xbf16>
    %28 = vector.shape_cast %27 : vector<1x16x128xbf16> to vector<16x128xbf16>
    %cst_39 = arith.constant dense<0.000000e+00> : vector<8x128xf32>
    %29 = tpu.matmul %26, %28, %cst_39 {dimension_numbers = #tpu.dot_dimension_numbers<[1], [0], [0], [1], [0, 0, 1, 1], [], []>} : vector<8x16xbf16>, vector<16x128xbf16>, vector<8x128xf32> -> vector<8x128xf32>
    %30 = arith.addf %24, %29 : vector<8x128xf32>
    %c0_40 = arith.constant 0 : index
    %c0_41 = arith.constant 0 : index
    %c1_42 = arith.constant 1 : index
    %c0_43 = arith.constant 0 : index
    %c0_44 = arith.constant 0 : index
    %31 = vector.load %arg3[%c0_40, %c0_41, %c1_42, %c0_43, %c0_44] : memref<1x1x2x9x16xbf16, #tpu.memory_space<vmem>>, vector<1x1x1x8x16xbf16>
    %32 = vector.shape_cast %31 : vector<1x1x1x8x16xbf16> to vector<8x16xbf16>
    %c5 = arith.constant 5 : index
    %c0_45 = arith.constant 0 : index
    %c0_46 = arith.constant 0 : index
    %33 = vector.load %arg6[%c5, %c0_45, %c0_46] : memref<16x16x128xbf16, #tpu.memory_space<vmem>>, vector<1x16x128xbf16>
    %34 = vector.shape_cast %33 : vector<1x16x128xbf16> to vector<16x128xbf16>
    %cst_47 = arith.constant dense<0.000000e+00> : vector<8x128xf32>
    %35 = tpu.matmul %32, %34, %cst_47 {dimension_numbers = #tpu.dot_dimension_numbers<[1], [0], [0], [1], [0, 0, 1, 1], [], []>} : vector<8x16xbf16>, vector<16x128xbf16>, vector<8x128xf32> -> vector<8x128xf32>
    %36 = arith.addf %30, %35 : vector<8x128xf32>
    %c0_48 = arith.constant 0 : index
    %c0_49 = arith.constant 0 : index
    %c0_50 = arith.constant 0 : index
    %c1_51 = arith.constant 1 : index
    %c0_52 = arith.constant 0 : index
    %37 = vector.load %arg3[%c0_48, %c0_49, %c0_50, %c1_51, %c0_52] : memref<1x1x2x9x16xbf16, #tpu.memory_space<vmem>>, vector<1x1x1x8x16xbf16>
    %38 = vector.shape_cast %37 : vector<1x1x1x8x16xbf16> to vector<8x16xbf16>
    %c6 = arith.constant 6 : index
    %c0_53 = arith.constant 0 : index
    %c0_54 = arith.constant 0 : index
    %39 = vector.load %arg6[%c6, %c0_53, %c0_54] : memref<16x16x128xbf16, #tpu.memory_space<vmem>>, vector<1x16x128xbf16>
    %40 = vector.shape_cast %39 : vector<1x16x128xbf16> to vector<16x128xbf16>
    %cst_55 = arith.constant dense<0.000000e+00> : vector<8x128xf32>
    %41 = tpu.matmul %38, %40, %cst_55 {dimension_numbers = #tpu.dot_dimension_numbers<[1], [0], [0], [1], [0, 0, 1, 1], [], []>} : vector<8x16xbf16>, vector<16x128xbf16>, vector<8x128xf32> -> vector<8x128xf32>
    %42 = arith.addf %36, %41 : vector<8x128xf32>
    %c0_56 = arith.constant 0 : index
    %c0_57 = arith.constant 0 : index
    %c1_58 = arith.constant 1 : index
    %c1_59 = arith.constant 1 : index
    %c0_60 = arith.constant 0 : index
    %43 = vector.load %arg3[%c0_56, %c0_57, %c1_58, %c1_59, %c0_60] : memref<1x1x2x9x16xbf16, #tpu.memory_space<vmem>>, vector<1x1x1x8x16xbf16>
    %44 = vector.shape_cast %43 : vector<1x1x1x8x16xbf16> to vector<8x16xbf16>
    %c7 = arith.constant 7 : index
    %c0_61 = arith.constant 0 : index
    %c0_62 = arith.constant 0 : index
    %45 = vector.load %arg6[%c7, %c0_61, %c0_62] : memref<16x16x128xbf16, #tpu.memory_space<vmem>>, vector<1x16x128xbf16>
    %46 = vector.shape_cast %45 : vector<1x16x128xbf16> to vector<16x128xbf16>
    %cst_63 = arith.constant dense<0.000000e+00> : vector<8x128xf32>
    %47 = tpu.matmul %44, %46, %cst_63 {dimension_numbers = #tpu.dot_dimension_numbers<[1], [0], [0], [1], [0, 0, 1, 1], [], []>} : vector<8x16xbf16>, vector<16x128xbf16>, vector<8x128xf32> -> vector<8x128xf32>
    %48 = arith.addf %42, %47 : vector<8x128xf32>
    %c0_64 = arith.constant 0 : index
    %c0_65 = arith.constant 0 : index
    %c0_66 = arith.constant 0 : index
    %c0_67 = arith.constant 0 : index
    %c0_68 = arith.constant 0 : index
    %49 = vector.load %arg4[%c0_64, %c0_65, %c0_66, %c0_67, %c0_68] : memref<1x1x2x9x16xbf16, #tpu.memory_space<vmem>>, vector<1x1x1x8x16xbf16>
    %50 = vector.shape_cast %49 : vector<1x1x1x8x16xbf16> to vector<8x16xbf16>
    %c8 = arith.constant 8 : index
    %c0_69 = arith.constant 0 : index
    %c0_70 = arith.constant 0 : index
    %51 = vector.load %arg6[%c8, %c0_69, %c0_70] : memref<16x16x128xbf16, #tpu.memory_space<vmem>>, vector<1x16x128xbf16>
    %52 = vector.shape_cast %51 : vector<1x16x128xbf16> to vector<16x128xbf16>
    %cst_71 = arith.constant dense<0.000000e+00> : vector<8x128xf32>
    %53 = tpu.matmul %50, %52, %cst_71 {dimension_numbers = #tpu.dot_dimension_numbers<[1], [0], [0], [1], [0, 0, 1, 1], [], []>} : vector<8x16xbf16>, vector<16x128xbf16>, vector<8x128xf32> -> vector<8x128xf32>
    %54 = arith.addf %48, %53 : vector<8x128xf32>
    %c0_72 = arith.constant 0 : index
    %c0_73 = arith.constant 0 : index
    %c1_74 = arith.constant 1 : index
    %c0_75 = arith.constant 0 : index
    %c0_76 = arith.constant 0 : index
    %55 = vector.load %arg4[%c0_72, %c0_73, %c1_74, %c0_75, %c0_76] : memref<1x1x2x9x16xbf16, #tpu.memory_space<vmem>>, vector<1x1x1x8x16xbf16>
    %56 = vector.shape_cast %55 : vector<1x1x1x8x16xbf16> to vector<8x16xbf16>
    %c9 = arith.constant 9 : index
    %c0_77 = arith.constant 0 : index
    %c0_78 = arith.constant 0 : index
    %57 = vector.load %arg6[%c9, %c0_77, %c0_78] : memref<16x16x128xbf16, #tpu.memory_space<vmem>>, vector<1x16x128xbf16>
    %58 = vector.shape_cast %57 : vector<1x16x128xbf16> to vector<16x128xbf16>
    %cst_79 = arith.constant dense<0.000000e+00> : vector<8x128xf32>
    %59 = tpu.matmul %56, %58, %cst_79 {dimension_numbers = #tpu.dot_dimension_numbers<[1], [0], [0], [1], [0, 0, 1, 1], [], []>} : vector<8x16xbf16>, vector<16x128xbf16>, vector<8x128xf32> -> vector<8x128xf32>
    %60 = arith.addf %54, %59 : vector<8x128xf32>
    %c0_80 = arith.constant 0 : index
    %c0_81 = arith.constant 0 : index
    %c0_82 = arith.constant 0 : index
    %c1_83 = arith.constant 1 : index
    %c0_84 = arith.constant 0 : index
    %61 = vector.load %arg4[%c0_80, %c0_81, %c0_82, %c1_83, %c0_84] : memref<1x1x2x9x16xbf16, #tpu.memory_space<vmem>>, vector<1x1x1x8x16xbf16>
    %62 = vector.shape_cast %61 : vector<1x1x1x8x16xbf16> to vector<8x16xbf16>
    %c10 = arith.constant 10 : index
    %c0_85 = arith.constant 0 : index
    %c0_86 = arith.constant 0 : index
    %63 = vector.load %arg6[%c10, %c0_85, %c0_86] : memref<16x16x128xbf16, #tpu.memory_space<vmem>>, vector<1x16x128xbf16>
    %64 = vector.shape_cast %63 : vector<1x16x128xbf16> to vector<16x128xbf16>
    %cst_87 = arith.constant dense<0.000000e+00> : vector<8x128xf32>
    %65 = tpu.matmul %62, %64, %cst_87 {dimension_numbers = #tpu.dot_dimension_numbers<[1], [0], [0], [1], [0, 0, 1, 1], [], []>} : vector<8x16xbf16>, vector<16x128xbf16>, vector<8x128xf32> -> vector<8x128xf32>
    %66 = arith.addf %60, %65 : vector<8x128xf32>
    %c0_88 = arith.constant 0 : index
    %c0_89 = arith.constant 0 : index
    %c1_90 = arith.constant 1 : index
    %c1_91 = arith.constant 1 : index
    %c0_92 = arith.constant 0 : index
    %67 = vector.load %arg4[%c0_88, %c0_89, %c1_90, %c1_91, %c0_92] : memref<1x1x2x9x16xbf16, #tpu.memory_space<vmem>>, vector<1x1x1x8x16xbf16>
    %68 = vector.shape_cast %67 : vector<1x1x1x8x16xbf16> to vector<8x16xbf16>
    %c11 = arith.constant 11 : index
    %c0_93 = arith.constant 0 : index
    %c0_94 = arith.constant 0 : index
    %69 = vector.load %arg6[%c11, %c0_93, %c0_94] : memref<16x16x128xbf16, #tpu.memory_space<vmem>>, vector<1x16x128xbf16>
    %70 = vector.shape_cast %69 : vector<1x16x128xbf16> to vector<16x128xbf16>
    %cst_95 = arith.constant dense<0.000000e+00> : vector<8x128xf32>
    %71 = tpu.matmul %68, %70, %cst_95 {dimension_numbers = #tpu.dot_dimension_numbers<[1], [0], [0], [1], [0, 0, 1, 1], [], []>} : vector<8x16xbf16>, vector<16x128xbf16>, vector<8x128xf32> -> vector<8x128xf32>
    %72 = arith.addf %66, %71 : vector<8x128xf32>
    %c0_96 = arith.constant 0 : index
    %c0_97 = arith.constant 0 : index
    %c0_98 = arith.constant 0 : index
    %c0_99 = arith.constant 0 : index
    %c0_100 = arith.constant 0 : index
    %73 = vector.load %arg5[%c0_96, %c0_97, %c0_98, %c0_99, %c0_100] : memref<1x1x2x9x16xbf16, #tpu.memory_space<vmem>>, vector<1x1x1x8x16xbf16>
    %74 = vector.shape_cast %73 : vector<1x1x1x8x16xbf16> to vector<8x16xbf16>
    %c12 = arith.constant 12 : index
    %c0_101 = arith.constant 0 : index
    %c0_102 = arith.constant 0 : index
    %75 = vector.load %arg6[%c12, %c0_101, %c0_102] : memref<16x16x128xbf16, #tpu.memory_space<vmem>>, vector<1x16x128xbf16>
    %76 = vector.shape_cast %75 : vector<1x16x128xbf16> to vector<16x128xbf16>
    %cst_103 = arith.constant dense<0.000000e+00> : vector<8x128xf32>
    %77 = tpu.matmul %74, %76, %cst_103 {dimension_numbers = #tpu.dot_dimension_numbers<[1], [0], [0], [1], [0, 0, 1, 1], [], []>} : vector<8x16xbf16>, vector<16x128xbf16>, vector<8x128xf32> -> vector<8x128xf32>
    %78 = arith.addf %72, %77 : vector<8x128xf32>
    %c0_104 = arith.constant 0 : index
    %c0_105 = arith.constant 0 : index
    %c1_106 = arith.constant 1 : index
    %c0_107 = arith.constant 0 : index
    %c0_108 = arith.constant 0 : index
    %79 = vector.load %arg5[%c0_104, %c0_105, %c1_106, %c0_107, %c0_108] : memref<1x1x2x9x16xbf16, #tpu.memory_space<vmem>>, vector<1x1x1x8x16xbf16>
    %80 = vector.shape_cast %79 : vector<1x1x1x8x16xbf16> to vector<8x16xbf16>
    %c13 = arith.constant 13 : index
    %c0_109 = arith.constant 0 : index
    %c0_110 = arith.constant 0 : index
    %81 = vector.load %arg6[%c13, %c0_109, %c0_110] : memref<16x16x128xbf16, #tpu.memory_space<vmem>>, vector<1x16x128xbf16>
    %82 = vector.shape_cast %81 : vector<1x16x128xbf16> to vector<16x128xbf16>
    %cst_111 = arith.constant dense<0.000000e+00> : vector<8x128xf32>
    %83 = tpu.matmul %80, %82, %cst_111 {dimension_numbers = #tpu.dot_dimension_numbers<[1], [0], [0], [1], [0, 0, 1, 1], [], []>} : vector<8x16xbf16>, vector<16x128xbf16>, vector<8x128xf32> -> vector<8x128xf32>
    %84 = arith.addf %78, %83 : vector<8x128xf32>
    %c0_112 = arith.constant 0 : index
    %c0_113 = arith.constant 0 : index
    %c0_114 = arith.constant 0 : index
    %c1_115 = arith.constant 1 : index
    %c0_116 = arith.constant 0 : index
    %85 = vector.load %arg5[%c0_112, %c0_113, %c0_114, %c1_115, %c0_116] : memref<1x1x2x9x16xbf16, #tpu.memory_space<vmem>>, vector<1x1x1x8x16xbf16>
    %86 = vector.shape_cast %85 : vector<1x1x1x8x16xbf16> to vector<8x16xbf16>
    %c14 = arith.constant 14 : index
    %c0_117 = arith.constant 0 : index
    %c0_118 = arith.constant 0 : index
    %87 = vector.load %arg6[%c14, %c0_117, %c0_118] : memref<16x16x128xbf16, #tpu.memory_space<vmem>>, vector<1x16x128xbf16>
    %88 = vector.shape_cast %87 : vector<1x16x128xbf16> to vector<16x128xbf16>
    %cst_119 = arith.constant dense<0.000000e+00> : vector<8x128xf32>
    %89 = tpu.matmul %86, %88, %cst_119 {dimension_numbers = #tpu.dot_dimension_numbers<[1], [0], [0], [1], [0, 0, 1, 1], [], []>} : vector<8x16xbf16>, vector<16x128xbf16>, vector<8x128xf32> -> vector<8x128xf32>
    %90 = arith.addf %84, %89 : vector<8x128xf32>
    %c0_120 = arith.constant 0 : index
    %c0_121 = arith.constant 0 : index
    %c1_122 = arith.constant 1 : index
    %c1_123 = arith.constant 1 : index
    %c0_124 = arith.constant 0 : index
    %91 = vector.load %arg5[%c0_120, %c0_121, %c1_122, %c1_123, %c0_124] : memref<1x1x2x9x16xbf16, #tpu.memory_space<vmem>>, vector<1x1x1x8x16xbf16>
    %92 = vector.shape_cast %91 : vector<1x1x1x8x16xbf16> to vector<8x16xbf16>
    %c15 = arith.constant 15 : index
    %c0_125 = arith.constant 0 : index
    %c0_126 = arith.constant 0 : index
    %93 = vector.load %arg6[%c15, %c0_125, %c0_126] : memref<16x16x128xbf16, #tpu.memory_space<vmem>>, vector<1x16x128xbf16>
    %94 = vector.shape_cast %93 : vector<1x16x128xbf16> to vector<16x128xbf16>
    %cst_127 = arith.constant dense<0.000000e+00> : vector<8x128xf32>
    %95 = tpu.matmul %92, %94, %cst_127 {dimension_numbers = #tpu.dot_dimension_numbers<[1], [0], [0], [1], [0, 0, 1, 1], [], []>} : vector<8x16xbf16>, vector<16x128xbf16>, vector<8x128xf32> -> vector<8x128xf32>
    %96 = arith.addf %90, %95 : vector<8x128xf32>
    %c0_128 = arith.constant 0 : index
    %c0_129 = arith.constant 0 : index
    %97 = vector.load %arg7[%c0_128, %c0_129] : memref<1x128xf32, #tpu.memory_space<vmem>>, vector<1x128xf32>
    %98 = vector.broadcast %97 : vector<1x128xf32> to vector<8x128xf32>
    %99 = arith.addf %96, %98 : vector<8x128xf32>
    %cst_130 = arith.constant 0.000000e+00 : f32
    %100 = vector.broadcast %cst_130 : f32 to vector<8x128xf32>
    %101 = arith.cmpf oge, %99, %100 : vector<8x128xf32>
    %cst_131 = arith.constant 2.000000e-01 : f32
    %102 = vector.broadcast %cst_131 : f32 to vector<8x128xf32>
    %103 = arith.mulf %102, %99 : vector<8x128xf32>
    %104 = arith.select %101, %99, %103 : vector<8x128xi1>, vector<8x128xf32>
    %105 = arith.truncf %104 : vector<8x128xf32> to vector<8x128xbf16>
    %c0_132 = arith.constant 0 : index
    %c0_133 = arith.constant 0 : index
    %c0_134 = arith.constant 0 : index
    %c0_135 = arith.constant 0 : index
    %106 = vector.load %arg8[%c0_132, %c0_133, %c0_134, %c0_135] : memref<1x1x8x128xbf16, #tpu.memory_space<vmem>>, vector<1x1x8x128xbf16>
    %107 = vector.shape_cast %106 : vector<1x1x8x128xbf16> to vector<8x128xbf16>
    %108 = vector.shape_cast %105 : vector<8x128xbf16> to vector<1x1x8x128xbf16>
    tpu.vector_store %arg8[%c0_132, %c0_133, %c0_134, %c0_135], %108 {strides = array<i32>} : memref<1x1x8x128xbf16, #tpu.memory_space<vmem>>, vector<1x1x8x128xbf16>,
    return
  }
  func.func @transform_0(%arg0: i32, %arg1: i32) -> (i32, i32, i32, i32, i32) {
    %c2_i32 = arith.constant 2 : i32
    %0 = arith.muli %c2_i32, %arg1 : i32
    %c0_i32 = arith.constant 0 : i32
    %1 = arith.addi %0, %c0_i32 : i32
    %c0_i32_0 = arith.constant 0 : i32
    %c0_i32_1 = arith.constant 0 : i32
    %c0_i32_2 = arith.constant 0 : i32
    %c0_i32_3 = arith.constant 0 : i32
    return %arg0, %1, %c0_i32_0, %c0_i32_1, %c0_i32_2 : i32, i32, i32, i32, i32
  }
  func.func @transform_1(%arg0: i32, %arg1: i32) -> (i32, i32, i32, i32, i32) {
    %c2_i32 = arith.constant 2 : i32
    %0 = arith.muli %c2_i32, %arg1 : i32
    %c1_i32 = arith.constant 1 : i32
    %1 = arith.addi %0, %c1_i32 : i32
    %c0_i32 = arith.constant 0 : i32
    %c0_i32_0 = arith.constant 0 : i32
    %c0_i32_1 = arith.constant 0 : i32
    %c0_i32_2 = arith.constant 0 : i32
    return %arg0, %1, %c0_i32, %c0_i32_0, %c0_i32_1 : i32, i32, i32, i32, i32
  }
  func.func @transform_2(%arg0: i32, %arg1: i32) -> (i32, i32, i32, i32, i32) {
    %c2_i32 = arith.constant 2 : i32
    %0 = arith.muli %c2_i32, %arg1 : i32
    %c2_i32_0 = arith.constant 2 : i32
    %1 = arith.addi %0, %c2_i32_0 : i32
    %c0_i32 = arith.constant 0 : i32
    %c0_i32_1 = arith.constant 0 : i32
    %c0_i32_2 = arith.constant 0 : i32
    %c0_i32_3 = arith.constant 0 : i32
    return %arg0, %1, %c0_i32, %c0_i32_1, %c0_i32_2 : i32, i32, i32, i32, i32
  }
  func.func @transform_3(%arg0: i32, %arg1: i32) -> (i32, i32, i32, i32, i32) {
    %c2_i32 = arith.constant 2 : i32
    %0 = arith.muli %c2_i32, %arg1 : i32
    %c3_i32 = arith.constant 3 : i32
    %1 = arith.addi %0, %c3_i32 : i32
    %c0_i32 = arith.constant 0 : i32
    %c0_i32_0 = arith.constant 0 : i32
    %c0_i32_1 = arith.constant 0 : i32
    %c0_i32_2 = arith.constant 0 : i32
    return %arg0, %1, %c0_i32, %c0_i32_0, %c0_i32_1 : i32, i32, i32, i32, i32
  }
  func.func @transform_4(%arg0: i32, %arg1: i32) -> (i32, i32, i32) {
    %c0_i32 = arith.constant 0 : i32
    %c0_i32_0 = arith.constant 0 : i32
    %c0_i32_1 = arith.constant 0 : i32
    %c0_i32_2 = arith.constant 0 : i32
    return %c0_i32, %c0_i32_0, %c0_i32_1 : i32, i32, i32
  }
  func.func @transform_5(%arg0: i32, %arg1: i32) -> (i32, i32) {
    %c0_i32 = arith.constant 0 : i32
    %c0_i32_0 = arith.constant 0 : i32
    %c0_i32_1 = arith.constant 0 : i32
    return %c0_i32, %c0_i32_0 : i32, i32
  }
  func.func @transform_6(%arg0: i32, %arg1: i32) -> (i32, i32, i32, i32) {
    %c0_i32 = arith.constant 0 : i32
    %c0_i32_0 = arith.constant 0 : i32
    %c0_i32_1 = arith.constant 0 : i32
    return %arg0, %arg1, %c0_i32, %c0_i32_0 : i32, i32, i32, i32
  }
}

module attributes {stable_mosaic.version = 11 : i64} {
  func.func @_conv_tap_kernel(%arg0: i32, %arg1: i32, %arg2: memref<1x1x2x9x16xbf16, #tpu.memory_space<vmem>>, %arg3: memref<1x1x2x9x16xbf16, #tpu.memory_space<vmem>>, %arg4: memref<1x1x2x9x16xbf16, #tpu.memory_space<vmem>>, %arg5: memref<1x1x2x9x16xbf16, #tpu.memory_space<vmem>>, %arg6: memref<16x16x128xbf16, #tpu.memory_space<vmem>>, %arg7: memref<1x128xf32, #tpu.memory_space<vmem>>, %arg8: memref<1x1x8x128xbf16, #tpu.memory_space<vmem>>) attributes {dimension_semantics = [#tpu.dimension_semantics<parallel>, #tpu.dimension_semantics<parallel>], iteration_bounds = array<i64: 2, 4>, scalar_prefetch = 0 : i64, scratch_operands = 0 : i64, tpu.core_type = #tpu.core_type<tc>, window_params = [{transform_indices = @transform_0, window_bounds = array<i64: 1, 1, 2, 9, 16>}, {transform_indices = @transform_1, window_bounds = array<i64: 1, 1, 2, 9, 16>}, {transform_indices = @transform_2, window_bounds = array<i64: 1, 1, 2, 9, 16>}, {transform_indices = @transform_3, window_bounds = array<i64: 1, 1, 2, 9, 16>}, {pipeline_mode = #tpu.pipeline_mode<synchronous>, transform_indices = @transform_4, window_bounds = array<i64: 16, 16, 128>}, {pipeline_mode = #tpu.pipeline_mode<synchronous>, transform_indices = @transform_5, window_bounds = array<i64: 1, 128>}, {transform_indices = @transform_6, window_bounds = array<i64: 1, 1, 8, 128>}]} {
    %cst = arith.constant 0.000000e+00 : f32
    %0 = vector.broadcast %cst : f32 to vector<8x128xf32>
    %c0 = arith.constant 0 : index
    %c0_0 = arith.constant 0 : index
    %c0_1 = arith.constant 0 : index
    %c0_2 = arith.constant 0 : index
    %c0_3 = arith.constant 0 : index
    %1 = vector.load %arg2[%c0, %c0_0, %c0_1, %c0_2, %c0_3] : memref<1x1x2x9x16xbf16, #tpu.memory_space<vmem>>, vector<1x1x1x8x16xbf16>
    %2 = vector.shape_cast %1 : vector<1x1x1x8x16xbf16> to vector<8x16xbf16>
    %c0_4 = arith.constant 0 : index
    %c0_5 = arith.constant 0 : index
    %c0_6 = arith.constant 0 : index
    %3 = vector.load %arg6[%c0_4, %c0_5, %c0_6] : memref<16x16x128xbf16, #tpu.memory_space<vmem>>, vector<1x16x128xbf16>
    %4 = vector.shape_cast %3 : vector<1x16x128xbf16> to vector<16x128xbf16>
    %cst_7 = arith.constant dense<0.000000e+00> : vector<8x128xf32>
    %5 = tpu.matmul %2, %4, %cst_7 {dimension_numbers = #tpu.dot_dimension_numbers<[1], [0], [0], [1], [0, 0, 1, 1], [], []>} : vector<8x16xbf16>, vector<16x128xbf16>, vector<8x128xf32> -> vector<8x128xf32>
    %6 = arith.addf %0, %5 : vector<8x128xf32>
    %c0_8 = arith.constant 0 : index
    %c0_9 = arith.constant 0 : index
    %c1 = arith.constant 1 : index
    %c0_10 = arith.constant 0 : index
    %c0_11 = arith.constant 0 : index
    %7 = vector.load %arg2[%c0_8, %c0_9, %c1, %c0_10, %c0_11] : memref<1x1x2x9x16xbf16, #tpu.memory_space<vmem>>, vector<1x1x1x8x16xbf16>
    %8 = vector.shape_cast %7 : vector<1x1x1x8x16xbf16> to vector<8x16xbf16>
    %c1_12 = arith.constant 1 : index
    %c0_13 = arith.constant 0 : index
    %c0_14 = arith.constant 0 : index
    %9 = vector.load %arg6[%c1_12, %c0_13, %c0_14] : memref<16x16x128xbf16, #tpu.memory_space<vmem>>, vector<1x16x128xbf16>
    %10 = vector.shape_cast %9 : vector<1x16x128xbf16> to vector<16x128xbf16>
    %cst_15 = arith.constant dense<0.000000e+00> : vector<8x128xf32>
    %11 = tpu.matmul %8, %10, %cst_15 {dimension_numbers = #tpu.dot_dimension_numbers<[1], [0], [0], [1], [0, 0, 1, 1], [], []>} : vector<8x16xbf16>, vector<16x128xbf16>, vector<8x128xf32> -> vector<8x128xf32>
    %12 = arith.addf %6, %11 : vector<8x128xf32>
    %c0_16 = arith.constant 0 : index
    %c0_17 = arith.constant 0 : index
    %c0_18 = arith.constant 0 : index
    %c1_19 = arith.constant 1 : index
    %c0_20 = arith.constant 0 : index
    %13 = vector.load %arg2[%c0_16, %c0_17, %c0_18, %c1_19, %c0_20] : memref<1x1x2x9x16xbf16, #tpu.memory_space<vmem>>, vector<1x1x1x8x16xbf16>
    %14 = vector.shape_cast %13 : vector<1x1x1x8x16xbf16> to vector<8x16xbf16>
    %c2 = arith.constant 2 : index
    %c0_21 = arith.constant 0 : index
    %c0_22 = arith.constant 0 : index
    %15 = vector.load %arg6[%c2, %c0_21, %c0_22] : memref<16x16x128xbf16, #tpu.memory_space<vmem>>, vector<1x16x128xbf16>
    %16 = vector.shape_cast %15 : vector<1x16x128xbf16> to vector<16x128xbf16>
    %cst_23 = arith.constant dense<0.000000e+00> : vector<8x128xf32>
    %17 = tpu.matmul %14, %16, %cst_23 {dimension_numbers = #tpu.dot_dimension_numbers<[1], [0], [0], [1], [0, 0, 1, 1], [], []>} : vector<8x16xbf16>, vector<16x128xbf16>, vector<8x128xf32> -> vector<8x128xf32>
    %18 = arith.addf %12, %17 : vector<8x128xf32>
    %c0_24 = arith.constant 0 : index
    %c0_25 = arith.constant 0 : index
    %c1_26 = arith.constant 1 : index
    %c1_27 = arith.constant 1 : index
    %c0_28 = arith.constant 0 : index
    %19 = vector.load %arg2[%c0_24, %c0_25, %c1_26, %c1_27, %c0_28] : memref<1x1x2x9x16xbf16, #tpu.memory_space<vmem>>, vector<1x1x1x8x16xbf16>
    %20 = vector.shape_cast %19 : vector<1x1x1x8x16xbf16> to vector<8x16xbf16>
    %c3 = arith.constant 3 : index
    %c0_29 = arith.constant 0 : index
    %c0_30 = arith.constant 0 : index
    %21 = vector.load %arg6[%c3, %c0_29, %c0_30] : memref<16x16x128xbf16, #tpu.memory_space<vmem>>, vector<1x16x128xbf16>
    %22 = vector.shape_cast %21 : vector<1x16x128xbf16> to vector<16x128xbf16>
    %cst_31 = arith.constant dense<0.000000e+00> : vector<8x128xf32>
    %23 = tpu.matmul %20, %22, %cst_31 {dimension_numbers = #tpu.dot_dimension_numbers<[1], [0], [0], [1], [0, 0, 1, 1], [], []>} : vector<8x16xbf16>, vector<16x128xbf16>, vector<8x128xf32> -> vector<8x128xf32>
    %24 = arith.addf %18, %23 : vector<8x128xf32>
    %c0_32 = arith.constant 0 : index
    %c0_33 = arith.constant 0 : index
    %c0_34 = arith.constant 0 : index
    %c0_35 = arith.constant 0 : index
    %c0_36 = arith.constant 0 : index
    %25 = vector.load %arg3[%c0_32, %c0_33, %c0_34, %c0_35, %c0_36] : memref<1x1x2x9x16xbf16, #tpu.memory_space<vmem>>, vector<1x1x1x8x16xbf16>
    %26 = vector.shape_cast %25 : vector<1x1x1x8x16xbf16> to vector<8x16xbf16>
    %c4 = arith.constant 4 : index
    %c0_37 = arith.constant 0 : index
    %c0_38 = arith.constant 0 : index
    %27 = vector.load %arg6[%c4, %c0_37, %c0_38] : memref<16x16x128xbf16, #tpu.memory_space<vmem>>, vector<1x16x128xbf16>
    %28 = vector.shape_cast %27 : vector<1x16x128xbf16> to vector<16x128xbf16>
    %cst_39 = arith.constant dense<0.000000e+00> : vector<8x128xf32>
    %29 = tpu.matmul %26, %28, %cst_39 {dimension_numbers = #tpu.dot_dimension_numbers<[1], [0], [0], [1], [0, 0, 1, 1], [], []>} : vector<8x16xbf16>, vector<16x128xbf16>, vector<8x128xf32> -> vector<8x128xf32>
    %30 = arith.addf %24, %29 : vector<8x128xf32>
    %c0_40 = arith.constant 0 : index
    %c0_41 = arith.constant 0 : index
    %c1_42 = arith.constant 1 : index
    %c0_43 = arith.constant 0 : index
    %c0_44 = arith.constant 0 : index
    %31 = vector.load %arg3[%c0_40, %c0_41, %c1_42, %c0_43, %c0_44] : memref<1x1x2x9x16xbf16, #tpu.memory_space<vmem>>, vector<1x1x1x8x16xbf16>
    %32 = vector.shape_cast %31 : vector<1x1x1x8x16xbf16> to vector<8x16xbf16>
    %c5 = arith.constant 5 : index
    %c0_45 = arith.constant 0 : index
    %c0_46 = arith.constant 0 : index
    %33 = vector.load %arg6[%c5, %c0_45, %c0_46] : memref<16x16x128xbf16, #tpu.memory_space<vmem>>, vector<1x16x128xbf16>
    %34 = vector.shape_cast %33 : vector<1x16x128xbf16> to vector<16x128xbf16>
    %cst_47 = arith.constant dense<0.000000e+00> : vector<8x128xf32>
    %35 = tpu.matmul %32, %34, %cst_47 {dimension_numbers = #tpu.dot_dimension_numbers<[1], [0], [0], [1], [0, 0, 1, 1], [], []>} : vector<8x16xbf16>, vector<16x128xbf16>, vector<8x128xf32> -> vector<8x128xf32>
    %36 = arith.addf %30, %35 : vector<8x128xf32>
    %c0_48 = arith.constant 0 : index
    %c0_49 = arith.constant 0 : index
    %c0_50 = arith.constant 0 : index
    %c1_51 = arith.constant 1 : index
    %c0_52 = arith.constant 0 : index
    %37 = vector.load %arg3[%c0_48, %c0_49, %c0_50, %c1_51, %c0_52] : memref<1x1x2x9x16xbf16, #tpu.memory_space<vmem>>, vector<1x1x1x8x16xbf16>
    %38 = vector.shape_cast %37 : vector<1x1x1x8x16xbf16> to vector<8x16xbf16>
    %c6 = arith.constant 6 : index
    %c0_53 = arith.constant 0 : index
    %c0_54 = arith.constant 0 : index
    %39 = vector.load %arg6[%c6, %c0_53, %c0_54] : memref<16x16x128xbf16, #tpu.memory_space<vmem>>, vector<1x16x128xbf16>
    %40 = vector.shape_cast %39 : vector<1x16x128xbf16> to vector<16x128xbf16>
    %cst_55 = arith.constant dense<0.000000e+00> : vector<8x128xf32>
    %41 = tpu.matmul %38, %40, %cst_55 {dimension_numbers = #tpu.dot_dimension_numbers<[1], [0], [0], [1], [0, 0, 1, 1], [], []>} : vector<8x16xbf16>, vector<16x128xbf16>, vector<8x128xf32> -> vector<8x128xf32>
    %42 = arith.addf %36, %41 : vector<8x128xf32>
    %c0_56 = arith.constant 0 : index
    %c0_57 = arith.constant 0 : index
    %c1_58 = arith.constant 1 : index
    %c1_59 = arith.constant 1 : index
    %c0_60 = arith.constant 0 : index
    %43 = vector.load %arg3[%c0_56, %c0_57, %c1_58, %c1_59, %c0_60] : memref<1x1x2x9x16xbf16, #tpu.memory_space<vmem>>, vector<1x1x1x8x16xbf16>
    %44 = vector.shape_cast %43 : vector<1x1x1x8x16xbf16> to vector<8x16xbf16>
    %c7 = arith.constant 7 : index
    %c0_61 = arith.constant 0 : index
    %c0_62 = arith.constant 0 : index
    %45 = vector.load %arg6[%c7, %c0_61, %c0_62] : memref<16x16x128xbf16, #tpu.memory_space<vmem>>, vector<1x16x128xbf16>
    %46 = vector.shape_cast %45 : vector<1x16x128xbf16> to vector<16x128xbf16>
    %cst_63 = arith.constant dense<0.000000e+00> : vector<8x128xf32>
    %47 = tpu.matmul %44, %46, %cst_63 {dimension_numbers = #tpu.dot_dimension_numbers<[1], [0], [0], [1], [0, 0, 1, 1], [], []>} : vector<8x16xbf16>, vector<16x128xbf16>, vector<8x128xf32> -> vector<8x128xf32>
    %48 = arith.addf %42, %47 : vector<8x128xf32>
    %c0_64 = arith.constant 0 : index
    %c0_65 = arith.constant 0 : index
    %c0_66 = arith.constant 0 : index
    %c0_67 = arith.constant 0 : index
    %c0_68 = arith.constant 0 : index
    %49 = vector.load %arg4[%c0_64, %c0_65, %c0_66, %c0_67, %c0_68] : memref<1x1x2x9x16xbf16, #tpu.memory_space<vmem>>, vector<1x1x1x8x16xbf16>
    %50 = vector.shape_cast %49 : vector<1x1x1x8x16xbf16> to vector<8x16xbf16>
    %c8 = arith.constant 8 : index
    %c0_69 = arith.constant 0 : index
    %c0_70 = arith.constant 0 : index
    %51 = vector.load %arg6[%c8, %c0_69, %c0_70] : memref<16x16x128xbf16, #tpu.memory_space<vmem>>, vector<1x16x128xbf16>
    %52 = vector.shape_cast %51 : vector<1x16x128xbf16> to vector<16x128xbf16>
    %cst_71 = arith.constant dense<0.000000e+00> : vector<8x128xf32>
    %53 = tpu.matmul %50, %52, %cst_71 {dimension_numbers = #tpu.dot_dimension_numbers<[1], [0], [0], [1], [0, 0, 1, 1], [], []>} : vector<8x16xbf16>, vector<16x128xbf16>, vector<8x128xf32> -> vector<8x128xf32>
    %54 = arith.addf %48, %53 : vector<8x128xf32>
    %c0_72 = arith.constant 0 : index
    %c0_73 = arith.constant 0 : index
    %c1_74 = arith.constant 1 : index
    %c0_75 = arith.constant 0 : index
    %c0_76 = arith.constant 0 : index
    %55 = vector.load %arg4[%c0_72, %c0_73, %c1_74, %c0_75, %c0_76] : memref<1x1x2x9x16xbf16, #tpu.memory_space<vmem>>, vector<1x1x1x8x16xbf16>
    %56 = vector.shape_cast %55 : vector<1x1x1x8x16xbf16> to vector<8x16xbf16>
    %c9 = arith.constant 9 : index
    %c0_77 = arith.constant 0 : index
    %c0_78 = arith.constant 0 : index
    %57 = vector.load %arg6[%c9, %c0_77, %c0_78] : memref<16x16x128xbf16, #tpu.memory_space<vmem>>, vector<1x16x128xbf16>
    %58 = vector.shape_cast %57 : vector<1x16x128xbf16> to vector<16x128xbf16>
    %cst_79 = arith.constant dense<0.000000e+00> : vector<8x128xf32>
    %59 = tpu.matmul %56, %58, %cst_79 {dimension_numbers = #tpu.dot_dimension_numbers<[1], [0], [0], [1], [0, 0, 1, 1], [], []>} : vector<8x16xbf16>, vector<16x128xbf16>, vector<8x128xf32> -> vector<8x128xf32>
    %60 = arith.addf %54, %59 : vector<8x128xf32>
    %c0_80 = arith.constant 0 : index
    %c0_81 = arith.constant 0 : index
    %c0_82 = arith.constant 0 : index
    %c1_83 = arith.constant 1 : index
    %c0_84 = arith.constant 0 : index
    %61 = vector.load %arg4[%c0_80, %c0_81, %c0_82, %c1_83, %c0_84] : memref<1x1x2x9x16xbf16, #tpu.memory_space<vmem>>, vector<1x1x1x8x16xbf16>
    %62 = vector.shape_cast %61 : vector<1x1x1x8x16xbf16> to vector<8x16xbf16>
    %c10 = arith.constant 10 : index
    %c0_85 = arith.constant 0 : index
    %c0_86 = arith.constant 0 : index
    %63 = vector.load %arg6[%c10, %c0_85, %c0_86] : memref<16x16x128xbf16, #tpu.memory_space<vmem>>, vector<1x16x128xbf16>
    %64 = vector.shape_cast %63 : vector<1x16x128xbf16> to vector<16x128xbf16>
    %cst_87 = arith.constant dense<0.000000e+00> : vector<8x128xf32>
    %65 = tpu.matmul %62, %64, %cst_87 {dimension_numbers = #tpu.dot_dimension_numbers<[1], [0], [0], [1], [0, 0, 1, 1], [], []>} : vector<8x16xbf16>, vector<16x128xbf16>, vector<8x128xf32> -> vector<8x128xf32>
    %66 = arith.addf %60, %65 : vector<8x128xf32>
    %c0_88 = arith.constant 0 : index
    %c0_89 = arith.constant 0 : index
    %c1_90 = arith.constant 1 : index
    %c1_91 = arith.constant 1 : index
    %c0_92 = arith.constant 0 : index
    %67 = vector.load %arg4[%c0_88, %c0_89, %c1_90, %c1_91, %c0_92] : memref<1x1x2x9x16xbf16, #tpu.memory_space<vmem>>, vector<1x1x1x8x16xbf16>
    %68 = vector.shape_cast %67 : vector<1x1x1x8x16xbf16> to vector<8x16xbf16>
    %c11 = arith.constant 11 : index
    %c0_93 = arith.constant 0 : index
    %c0_94 = arith.constant 0 : index
    %69 = vector.load %arg6[%c11, %c0_93, %c0_94] : memref<16x16x128xbf16, #tpu.memory_space<vmem>>, vector<1x16x128xbf16>
    %70 = vector.shape_cast %69 : vector<1x16x128xbf16> to vector<16x128xbf16>
    %cst_95 = arith.constant dense<0.000000e+00> : vector<8x128xf32>
    %71 = tpu.matmul %68, %70, %cst_95 {dimension_numbers = #tpu.dot_dimension_numbers<[1], [0], [0], [1], [0, 0, 1, 1], [], []>} : vector<8x16xbf16>, vector<16x128xbf16>, vector<8x128xf32> -> vector<8x128xf32>
    %72 = arith.addf %66, %71 : vector<8x128xf32>
    %c0_96 = arith.constant 0 : index
    %c0_97 = arith.constant 0 : index
    %c0_98 = arith.constant 0 : index
    %c0_99 = arith.constant 0 : index
    %c0_100 = arith.constant 0 : index
    %73 = vector.load %arg5[%c0_96, %c0_97, %c0_98, %c0_99, %c0_100] : memref<1x1x2x9x16xbf16, #tpu.memory_space<vmem>>, vector<1x1x1x8x16xbf16>
    %74 = vector.shape_cast %73 : vector<1x1x1x8x16xbf16> to vector<8x16xbf16>
    %c12 = arith.constant 12 : index
    %c0_101 = arith.constant 0 : index
    %c0_102 = arith.constant 0 : index
    %75 = vector.load %arg6[%c12, %c0_101, %c0_102] : memref<16x16x128xbf16, #tpu.memory_space<vmem>>, vector<1x16x128xbf16>
    %76 = vector.shape_cast %75 : vector<1x16x128xbf16> to vector<16x128xbf16>
    %cst_103 = arith.constant dense<0.000000e+00> : vector<8x128xf32>
    %77 = tpu.matmul %74, %76, %cst_103 {dimension_numbers = #tpu.dot_dimension_numbers<[1], [0], [0], [1], [0, 0, 1, 1], [], []>} : vector<8x16xbf16>, vector<16x128xbf16>, vector<8x128xf32> -> vector<8x128xf32>
    %78 = arith.addf %72, %77 : vector<8x128xf32>
    %c0_104 = arith.constant 0 : index
    %c0_105 = arith.constant 0 : index
    %c1_106 = arith.constant 1 : index
    %c0_107 = arith.constant 0 : index
    %c0_108 = arith.constant 0 : index
    %79 = vector.load %arg5[%c0_104, %c0_105, %c1_106, %c0_107, %c0_108] : memref<1x1x2x9x16xbf16, #tpu.memory_space<vmem>>, vector<1x1x1x8x16xbf16>
    %80 = vector.shape_cast %79 : vector<1x1x1x8x16xbf16> to vector<8x16xbf16>
    %c13 = arith.constant 13 : index
    %c0_109 = arith.constant 0 : index
    %c0_110 = arith.constant 0 : index
    %81 = vector.load %arg6[%c13, %c0_109, %c0_110] : memref<16x16x128xbf16, #tpu.memory_space<vmem>>, vector<1x16x128xbf16>
    %82 = vector.shape_cast %81 : vector<1x16x128xbf16> to vector<16x128xbf16>
    %cst_111 = arith.constant dense<0.000000e+00> : vector<8x128xf32>
    %83 = tpu.matmul %80, %82, %cst_111 {dimension_numbers = #tpu.dot_dimension_numbers<[1], [0], [0], [1], [0, 0, 1, 1], [], []>} : vector<8x16xbf16>, vector<16x128xbf16>, vector<8x128xf32> -> vector<8x128xf32>
    %84 = arith.addf %78, %83 : vector<8x128xf32>
    %c0_112 = arith.constant 0 : index
    %c0_113 = arith.constant 0 : index
    %c0_114 = arith.constant 0 : index
    %c1_115 = arith.constant 1 : index
    %c0_116 = arith.constant 0 : index
    %85 = vector.load %arg5[%c0_112, %c0_113, %c0_114, %c1_115, %c0_116] : memref<1x1x2x9x16xbf16, #tpu.memory_space<vmem>>, vector<1x1x1x8x16xbf16>
    %86 = vector.shape_cast %85 : vector<1x1x1x8x16xbf16> to vector<8x16xbf16>
    %c14 = arith.constant 14 : index
    %c0_117 = arith.constant 0 : index
    %c0_118 = arith.constant 0 : index
    %87 = vector.load %arg6[%c14, %c0_117, %c0_118] : memref<16x16x128xbf16, #tpu.memory_space<vmem>>, vector<1x16x128xbf16>
    %88 = vector.shape_cast %87 : vector<1x16x128xbf16> to vector<16x128xbf16>
    %cst_119 = arith.constant dense<0.000000e+00> : vector<8x128xf32>
    %89 = tpu.matmul %86, %88, %cst_119 {dimension_numbers = #tpu.dot_dimension_numbers<[1], [0], [0], [1], [0, 0, 1, 1], [], []>} : vector<8x16xbf16>, vector<16x128xbf16>, vector<8x128xf32> -> vector<8x128xf32>
    %90 = arith.addf %84, %89 : vector<8x128xf32>
    %c0_120 = arith.constant 0 : index
    %c0_121 = arith.constant 0 : index
    %c1_122 = arith.constant 1 : index
    %c1_123 = arith.constant 1 : index
    %c0_124 = arith.constant 0 : index
    %91 = vector.load %arg5[%c0_120, %c0_121, %c1_122, %c1_123, %c0_124] : memref<1x1x2x9x16xbf16, #tpu.memory_space<vmem>>, vector<1x1x1x8x16xbf16>
    %92 = vector.shape_cast %91 : vector<1x1x1x8x16xbf16> to vector<8x16xbf16>
    %c15 = arith.constant 15 : index
    %c0_125 = arith.constant 0 : index
    %c0_126 = arith.constant 0 : index
    %93 = vector.load %arg6[%c15, %c0_125, %c0_126] : memref<16x16x128xbf16, #tpu.memory_space<vmem>>, vector<1x16x128xbf16>
    %94 = vector.shape_cast %93 : vector<1x16x128xbf16> to vector<16x128xbf16>
    %cst_127 = arith.constant dense<0.000000e+00> : vector<8x128xf32>
    %95 = tpu.matmul %92, %94, %cst_127 {dimension_numbers = #tpu.dot_dimension_numbers<[1], [0], [0], [1], [0, 0, 1, 1], [], []>} : vector<8x16xbf16>, vector<16x128xbf16>, vector<8x128xf32> -> vector<8x128xf32>
    %96 = arith.addf %90, %95 : vector<8x128xf32>
    %c0_128 = arith.constant 0 : index
    %c0_129 = arith.constant 0 : index
    %97 = vector.load %arg7[%c0_128, %c0_129] : memref<1x128xf32, #tpu.memory_space<vmem>>, vector<1x128xf32>
    %98 = vector.broadcast %97 : vector<1x128xf32> to vector<8x128xf32>
    %99 = arith.addf %96, %98 : vector<8x128xf32>
    %cst_130 = arith.constant 0.000000e+00 : f32
    %100 = vector.broadcast %cst_130 : f32 to vector<8x128xf32>
    %101 = arith.cmpf oge, %99, %100 : vector<8x128xf32>
    %cst_131 = arith.constant 2.000000e-01 : f32
    %102 = vector.broadcast %cst_131 : f32 to vector<8x128xf32>
    %103 = arith.mulf %102, %99 : vector<8x128xf32>
    %104 = arith.select %101, %99, %103 : vector<8x128xi1>, vector<8x128xf32>
    %105 = arith.truncf %104 : vector<8x128xf32> to vector<8x128xbf16>
    %c0_132 = arith.constant 0 : index
    %c0_133 = arith.constant 0 : index
    %c0_134 = arith.constant 0 : index
    %c0_135 = arith.constant 0 : index
    %106 = vector.load %arg8[%c0_132, %c0_133, %c0_134, %c0_135] : memref<1x1x8x128xbf16, #tpu.memory_space<vmem>>, vector<1x1x8x128xbf16>
    %107 = vector.shape_cast %106 : vector<1x1x8x128xbf16> to vector<8x128xbf16>
    %108 = vector.shape_cast %105 : vector<8x128xbf16> to vector<1x1x8x128xbf16>
    tpu.vector_store %arg8[%c0_132, %c0_133, %c0_134, %c0_135], %108 {strides = array<i32>} : memref<1x1x8x128xbf16, #tpu.memory_space<vmem>>, vector<1x1x8x128xbf16>,
    return
  }
  func.func @transform_0(%arg0: i32, %arg1: i32) -> (i32, i32, i32, i32, i32) {
    %c2_i32 = arith.constant 2 : i32
    %0 = arith.muli %c2_i32, %arg1 : i32
    %c0_i32 = arith.constant 0 : i32
    %1 = arith.addi %0, %c0_i32 : i32
    %c0_i32_0 = arith.constant 0 : i32
    %c0_i32_1 = arith.constant 0 : i32
    %c0_i32_2 = arith.constant 0 : i32
    %c0_i32_3 = arith.constant 0 : i32
    return %arg0, %1, %c0_i32_0, %c0_i32_1, %c0_i32_2 : i32, i32, i32, i32, i32
  }
  func.func @transform_1(%arg0: i32, %arg1: i32) -> (i32, i32, i32, i32, i32) {
    %c2_i32 = arith.constant 2 : i32
    %0 = arith.muli %c2_i32, %arg1 : i32
    %c1_i32 = arith.constant 1 : i32
    %1 = arith.addi %0, %c1_i32 : i32
    %c0_i32 = arith.constant 0 : i32
    %c0_i32_0 = arith.constant 0 : i32
    %c0_i32_1 = arith.constant 0 : i32
    %c0_i32_2 = arith.constant 0 : i32
    return %arg0, %1, %c0_i32, %c0_i32_0, %c0_i32_1 : i32, i32, i32, i32, i32
  }
  func.func @transform_2(%arg0: i32, %arg1: i32) -> (i32, i32, i32, i32, i32) {
    %c2_i32 = arith.constant 2 : i32
    %0 = arith.muli %c2_i32, %arg1 : i32
    %c2_i32_0 = arith.constant 2 : i32
    %1 = arith.addi %0, %c2_i32_0 : i32
    %c0_i32 = arith.constant 0 : i32
    %c0_i32_1 = arith.constant 0 : i32
    %c0_i32_2 = arith.constant 0 : i32
    %c0_i32_3 = arith.constant 0 : i32
    return %arg0, %1, %c0_i32, %c0_i32_1, %c0_i32_2 : i32, i32, i32, i32, i32
  }
  func.func @transform_3(%arg0: i32, %arg1: i32) -> (i32, i32, i32, i32, i32) {
    %c2_i32 = arith.constant 2 : i32
    %0 = arith.muli %c2_i32, %arg1 : i32
    %c3_i32 = arith.constant 3 : i32
    %1 = arith.addi %0, %c3_i32 : i32
    %c0_i32 = arith.constant 0 : i32
    %c0_i32_0 = arith.constant 0 : i32
    %c0_i32_1 = arith.constant 0 : i32
    %c0_i32_2 = arith.constant 0 : i32
    return %arg0, %1, %c0_i32, %c0_i32_0, %c0_i32_1 : i32, i32, i32, i32, i32
  }
  func.func @transform_4(%arg0: i32, %arg1: i32) -> (i32, i32, i32) {
    %c0_i32 = arith.constant 0 : i32
    %c0_i32_0 = arith.constant 0 : i32
    %c0_i32_1 = arith.constant 0 : i32
    %c0_i32_2 = arith.constant 0 : i32
    return %c0_i32, %c0_i32_0, %c0_i32_1 : i32, i32, i32
  }
  func.func @transform_5(%arg0: i32, %arg1: i32) -> (i32, i32) {
    %c0_i32 = arith.constant 0 : i32
    %c0_i32_0 = arith.constant 0 : i32
    %c0_i32_1 = arith.constant 0 : i32
    return %c0_i32, %c0_i32_0 : i32, i32
  }
  func.func @transform_6(%arg0: i32, %arg1: i32) -> (i32, i32, i32, i32) {
    %c0_i32 = arith.constant 0 : i32
    %c0_i32_0 = arith.constant 0 : i32
    %c0_i32_1 = arith.constant 0 : i32
    return %arg0, %arg1, %c0_i32, %c0_i32_0 : i32, i32, i32, i32
  }
}

module attributes {stable_mosaic.version = 11 : i64} {
  func.func @_conv_tap_kernel(%arg0: i32, %arg1: i32, %arg2: memref<1x1x1x11x16xbf16, #tpu.memory_space<vmem>>, %arg3: memref<1x1x1x11x16xbf16, #tpu.memory_space<vmem>>, %arg4: memref<1x1x1x11x16xbf16, #tpu.memory_space<vmem>>, %arg5: memref<1x1x1x11x16xbf16, #tpu.memory_space<vmem>>, %arg6: memref<16x16x128xbf16, #tpu.memory_space<vmem>>, %arg7: memref<1x128xf32, #tpu.memory_space<vmem>>, %arg8: memref<1x1x8x128xbf16, #tpu.memory_space<vmem>>) attributes {dimension_semantics = [#tpu.dimension_semantics<parallel>, #tpu.dimension_semantics<parallel>], iteration_bounds = array<i64: 2, 3>, scalar_prefetch = 0 : i64, scratch_operands = 0 : i64, tpu.core_type = #tpu.core_type<tc>, window_params = [{transform_indices = @transform_0, window_bounds = array<i64: 1, 1, 1, 11, 16>}, {transform_indices = @transform_1, window_bounds = array<i64: 1, 1, 1, 11, 16>}, {transform_indices = @transform_2, window_bounds = array<i64: 1, 1, 1, 11, 16>}, {transform_indices = @transform_3, window_bounds = array<i64: 1, 1, 1, 11, 16>}, {pipeline_mode = #tpu.pipeline_mode<synchronous>, transform_indices = @transform_4, window_bounds = array<i64: 16, 16, 128>}, {pipeline_mode = #tpu.pipeline_mode<synchronous>, transform_indices = @transform_5, window_bounds = array<i64: 1, 128>}, {transform_indices = @transform_6, window_bounds = array<i64: 1, 1, 8, 128>}]} {
    %cst = arith.constant 0.000000e+00 : f32
    %0 = vector.broadcast %cst : f32 to vector<8x128xf32>
    %c0 = arith.constant 0 : index
    %c0_0 = arith.constant 0 : index
    %c0_1 = arith.constant 0 : index
    %c0_2 = arith.constant 0 : index
    %c0_3 = arith.constant 0 : index
    %1 = vector.load %arg2[%c0, %c0_0, %c0_1, %c0_2, %c0_3] : memref<1x1x1x11x16xbf16, #tpu.memory_space<vmem>>, vector<1x1x1x8x16xbf16>
    %2 = vector.shape_cast %1 : vector<1x1x1x8x16xbf16> to vector<8x16xbf16>
    %c0_4 = arith.constant 0 : index
    %c0_5 = arith.constant 0 : index
    %c0_6 = arith.constant 0 : index
    %3 = vector.load %arg6[%c0_4, %c0_5, %c0_6] : memref<16x16x128xbf16, #tpu.memory_space<vmem>>, vector<1x16x128xbf16>
    %4 = vector.shape_cast %3 : vector<1x16x128xbf16> to vector<16x128xbf16>
    %cst_7 = arith.constant dense<0.000000e+00> : vector<8x128xf32>
    %5 = tpu.matmul %2, %4, %cst_7 {dimension_numbers = #tpu.dot_dimension_numbers<[1], [0], [0], [1], [0, 0, 1, 1], [], []>} : vector<8x16xbf16>, vector<16x128xbf16>, vector<8x128xf32> -> vector<8x128xf32>
    %6 = arith.addf %0, %5 : vector<8x128xf32>
    %c0_8 = arith.constant 0 : index
    %c0_9 = arith.constant 0 : index
    %c0_10 = arith.constant 0 : index
    %c1 = arith.constant 1 : index
    %c0_11 = arith.constant 0 : index
    %7 = vector.load %arg2[%c0_8, %c0_9, %c0_10, %c1, %c0_11] : memref<1x1x1x11x16xbf16, #tpu.memory_space<vmem>>, vector<1x1x1x8x16xbf16>
    %8 = vector.shape_cast %7 : vector<1x1x1x8x16xbf16> to vector<8x16xbf16>
    %c1_12 = arith.constant 1 : index
    %c0_13 = arith.constant 0 : index
    %c0_14 = arith.constant 0 : index
    %9 = vector.load %arg6[%c1_12, %c0_13, %c0_14] : memref<16x16x128xbf16, #tpu.memory_space<vmem>>, vector<1x16x128xbf16>
    %10 = vector.shape_cast %9 : vector<1x16x128xbf16> to vector<16x128xbf16>
    %cst_15 = arith.constant dense<0.000000e+00> : vector<8x128xf32>
    %11 = tpu.matmul %8, %10, %cst_15 {dimension_numbers = #tpu.dot_dimension_numbers<[1], [0], [0], [1], [0, 0, 1, 1], [], []>} : vector<8x16xbf16>, vector<16x128xbf16>, vector<8x128xf32> -> vector<8x128xf32>
    %12 = arith.addf %6, %11 : vector<8x128xf32>
    %c0_16 = arith.constant 0 : index
    %c0_17 = arith.constant 0 : index
    %c0_18 = arith.constant 0 : index
    %c2 = arith.constant 2 : index
    %c0_19 = arith.constant 0 : index
    %13 = vector.load %arg2[%c0_16, %c0_17, %c0_18, %c2, %c0_19] : memref<1x1x1x11x16xbf16, #tpu.memory_space<vmem>>, vector<1x1x1x8x16xbf16>
    %14 = vector.shape_cast %13 : vector<1x1x1x8x16xbf16> to vector<8x16xbf16>
    %c2_20 = arith.constant 2 : index
    %c0_21 = arith.constant 0 : index
    %c0_22 = arith.constant 0 : index
    %15 = vector.load %arg6[%c2_20, %c0_21, %c0_22] : memref<16x16x128xbf16, #tpu.memory_space<vmem>>, vector<1x16x128xbf16>
    %16 = vector.shape_cast %15 : vector<1x16x128xbf16> to vector<16x128xbf16>
    %cst_23 = arith.constant dense<0.000000e+00> : vector<8x128xf32>
    %17 = tpu.matmul %14, %16, %cst_23 {dimension_numbers = #tpu.dot_dimension_numbers<[1], [0], [0], [1], [0, 0, 1, 1], [], []>} : vector<8x16xbf16>, vector<16x128xbf16>, vector<8x128xf32> -> vector<8x128xf32>
    %18 = arith.addf %12, %17 : vector<8x128xf32>
    %c0_24 = arith.constant 0 : index
    %c0_25 = arith.constant 0 : index
    %c0_26 = arith.constant 0 : index
    %c3 = arith.constant 3 : index
    %c0_27 = arith.constant 0 : index
    %19 = vector.load %arg2[%c0_24, %c0_25, %c0_26, %c3, %c0_27] : memref<1x1x1x11x16xbf16, #tpu.memory_space<vmem>>, vector<1x1x1x8x16xbf16>
    %20 = vector.shape_cast %19 : vector<1x1x1x8x16xbf16> to vector<8x16xbf16>
    %c3_28 = arith.constant 3 : index
    %c0_29 = arith.constant 0 : index
    %c0_30 = arith.constant 0 : index
    %21 = vector.load %arg6[%c3_28, %c0_29, %c0_30] : memref<16x16x128xbf16, #tpu.memory_space<vmem>>, vector<1x16x128xbf16>
    %22 = vector.shape_cast %21 : vector<1x16x128xbf16> to vector<16x128xbf16>
    %cst_31 = arith.constant dense<0.000000e+00> : vector<8x128xf32>
    %23 = tpu.matmul %20, %22, %cst_31 {dimension_numbers = #tpu.dot_dimension_numbers<[1], [0], [0], [1], [0, 0, 1, 1], [], []>} : vector<8x16xbf16>, vector<16x128xbf16>, vector<8x128xf32> -> vector<8x128xf32>
    %24 = arith.addf %18, %23 : vector<8x128xf32>
    %c0_32 = arith.constant 0 : index
    %c0_33 = arith.constant 0 : index
    %c0_34 = arith.constant 0 : index
    %c0_35 = arith.constant 0 : index
    %c0_36 = arith.constant 0 : index
    %25 = vector.load %arg3[%c0_32, %c0_33, %c0_34, %c0_35, %c0_36] : memref<1x1x1x11x16xbf16, #tpu.memory_space<vmem>>, vector<1x1x1x8x16xbf16>
    %26 = vector.shape_cast %25 : vector<1x1x1x8x16xbf16> to vector<8x16xbf16>
    %c4 = arith.constant 4 : index
    %c0_37 = arith.constant 0 : index
    %c0_38 = arith.constant 0 : index
    %27 = vector.load %arg6[%c4, %c0_37, %c0_38] : memref<16x16x128xbf16, #tpu.memory_space<vmem>>, vector<1x16x128xbf16>
    %28 = vector.shape_cast %27 : vector<1x16x128xbf16> to vector<16x128xbf16>
    %cst_39 = arith.constant dense<0.000000e+00> : vector<8x128xf32>
    %29 = tpu.matmul %26, %28, %cst_39 {dimension_numbers = #tpu.dot_dimension_numbers<[1], [0], [0], [1], [0, 0, 1, 1], [], []>} : vector<8x16xbf16>, vector<16x128xbf16>, vector<8x128xf32> -> vector<8x128xf32>
    %30 = arith.addf %24, %29 : vector<8x128xf32>
    %c0_40 = arith.constant 0 : index
    %c0_41 = arith.constant 0 : index
    %c0_42 = arith.constant 0 : index
    %c1_43 = arith.constant 1 : index
    %c0_44 = arith.constant 0 : index
    %31 = vector.load %arg3[%c0_40, %c0_41, %c0_42, %c1_43, %c0_44] : memref<1x1x1x11x16xbf16, #tpu.memory_space<vmem>>, vector<1x1x1x8x16xbf16>
    %32 = vector.shape_cast %31 : vector<1x1x1x8x16xbf16> to vector<8x16xbf16>
    %c5 = arith.constant 5 : index
    %c0_45 = arith.constant 0 : index
    %c0_46 = arith.constant 0 : index
    %33 = vector.load %arg6[%c5, %c0_45, %c0_46] : memref<16x16x128xbf16, #tpu.memory_space<vmem>>, vector<1x16x128xbf16>
    %34 = vector.shape_cast %33 : vector<1x16x128xbf16> to vector<16x128xbf16>
    %cst_47 = arith.constant dense<0.000000e+00> : vector<8x128xf32>
    %35 = tpu.matmul %32, %34, %cst_47 {dimension_numbers = #tpu.dot_dimension_numbers<[1], [0], [0], [1], [0, 0, 1, 1], [], []>} : vector<8x16xbf16>, vector<16x128xbf16>, vector<8x128xf32> -> vector<8x128xf32>
    %36 = arith.addf %30, %35 : vector<8x128xf32>
    %c0_48 = arith.constant 0 : index
    %c0_49 = arith.constant 0 : index
    %c0_50 = arith.constant 0 : index
    %c2_51 = arith.constant 2 : index
    %c0_52 = arith.constant 0 : index
    %37 = vector.load %arg3[%c0_48, %c0_49, %c0_50, %c2_51, %c0_52] : memref<1x1x1x11x16xbf16, #tpu.memory_space<vmem>>, vector<1x1x1x8x16xbf16>
    %38 = vector.shape_cast %37 : vector<1x1x1x8x16xbf16> to vector<8x16xbf16>
    %c6 = arith.constant 6 : index
    %c0_53 = arith.constant 0 : index
    %c0_54 = arith.constant 0 : index
    %39 = vector.load %arg6[%c6, %c0_53, %c0_54] : memref<16x16x128xbf16, #tpu.memory_space<vmem>>, vector<1x16x128xbf16>
    %40 = vector.shape_cast %39 : vector<1x16x128xbf16> to vector<16x128xbf16>
    %cst_55 = arith.constant dense<0.000000e+00> : vector<8x128xf32>
    %41 = tpu.matmul %38, %40, %cst_55 {dimension_numbers = #tpu.dot_dimension_numbers<[1], [0], [0], [1], [0, 0, 1, 1], [], []>} : vector<8x16xbf16>, vector<16x128xbf16>, vector<8x128xf32> -> vector<8x128xf32>
    %42 = arith.addf %36, %41 : vector<8x128xf32>
    %c0_56 = arith.constant 0 : index
    %c0_57 = arith.constant 0 : index
    %c0_58 = arith.constant 0 : index
    %c3_59 = arith.constant 3 : index
    %c0_60 = arith.constant 0 : index
    %43 = vector.load %arg3[%c0_56, %c0_57, %c0_58, %c3_59, %c0_60] : memref<1x1x1x11x16xbf16, #tpu.memory_space<vmem>>, vector<1x1x1x8x16xbf16>
    %44 = vector.shape_cast %43 : vector<1x1x1x8x16xbf16> to vector<8x16xbf16>
    %c7 = arith.constant 7 : index
    %c0_61 = arith.constant 0 : index
    %c0_62 = arith.constant 0 : index
    %45 = vector.load %arg6[%c7, %c0_61, %c0_62] : memref<16x16x128xbf16, #tpu.memory_space<vmem>>, vector<1x16x128xbf16>
    %46 = vector.shape_cast %45 : vector<1x16x128xbf16> to vector<16x128xbf16>
    %cst_63 = arith.constant dense<0.000000e+00> : vector<8x128xf32>
    %47 = tpu.matmul %44, %46, %cst_63 {dimension_numbers = #tpu.dot_dimension_numbers<[1], [0], [0], [1], [0, 0, 1, 1], [], []>} : vector<8x16xbf16>, vector<16x128xbf16>, vector<8x128xf32> -> vector<8x128xf32>
    %48 = arith.addf %42, %47 : vector<8x128xf32>
    %c0_64 = arith.constant 0 : index
    %c0_65 = arith.constant 0 : index
    %c0_66 = arith.constant 0 : index
    %c0_67 = arith.constant 0 : index
    %c0_68 = arith.constant 0 : index
    %49 = vector.load %arg4[%c0_64, %c0_65, %c0_66, %c0_67, %c0_68] : memref<1x1x1x11x16xbf16, #tpu.memory_space<vmem>>, vector<1x1x1x8x16xbf16>
    %50 = vector.shape_cast %49 : vector<1x1x1x8x16xbf16> to vector<8x16xbf16>
    %c8 = arith.constant 8 : index
    %c0_69 = arith.constant 0 : index
    %c0_70 = arith.constant 0 : index
    %51 = vector.load %arg6[%c8, %c0_69, %c0_70] : memref<16x16x128xbf16, #tpu.memory_space<vmem>>, vector<1x16x128xbf16>
    %52 = vector.shape_cast %51 : vector<1x16x128xbf16> to vector<16x128xbf16>
    %cst_71 = arith.constant dense<0.000000e+00> : vector<8x128xf32>
    %53 = tpu.matmul %50, %52, %cst_71 {dimension_numbers = #tpu.dot_dimension_numbers<[1], [0], [0], [1], [0, 0, 1, 1], [], []>} : vector<8x16xbf16>, vector<16x128xbf16>, vector<8x128xf32> -> vector<8x128xf32>
    %54 = arith.addf %48, %53 : vector<8x128xf32>
    %c0_72 = arith.constant 0 : index
    %c0_73 = arith.constant 0 : index
    %c0_74 = arith.constant 0 : index
    %c1_75 = arith.constant 1 : index
    %c0_76 = arith.constant 0 : index
    %55 = vector.load %arg4[%c0_72, %c0_73, %c0_74, %c1_75, %c0_76] : memref<1x1x1x11x16xbf16, #tpu.memory_space<vmem>>, vector<1x1x1x8x16xbf16>
    %56 = vector.shape_cast %55 : vector<1x1x1x8x16xbf16> to vector<8x16xbf16>
    %c9 = arith.constant 9 : index
    %c0_77 = arith.constant 0 : index
    %c0_78 = arith.constant 0 : index
    %57 = vector.load %arg6[%c9, %c0_77, %c0_78] : memref<16x16x128xbf16, #tpu.memory_space<vmem>>, vector<1x16x128xbf16>
    %58 = vector.shape_cast %57 : vector<1x16x128xbf16> to vector<16x128xbf16>
    %cst_79 = arith.constant dense<0.000000e+00> : vector<8x128xf32>
    %59 = tpu.matmul %56, %58, %cst_79 {dimension_numbers = #tpu.dot_dimension_numbers<[1], [0], [0], [1], [0, 0, 1, 1], [], []>} : vector<8x16xbf16>, vector<16x128xbf16>, vector<8x128xf32> -> vector<8x128xf32>
    %60 = arith.addf %54, %59 : vector<8x128xf32>
    %c0_80 = arith.constant 0 : index
    %c0_81 = arith.constant 0 : index
    %c0_82 = arith.constant 0 : index
    %c2_83 = arith.constant 2 : index
    %c0_84 = arith.constant 0 : index
    %61 = vector.load %arg4[%c0_80, %c0_81, %c0_82, %c2_83, %c0_84] : memref<1x1x1x11x16xbf16, #tpu.memory_space<vmem>>, vector<1x1x1x8x16xbf16>
    %62 = vector.shape_cast %61 : vector<1x1x1x8x16xbf16> to vector<8x16xbf16>
    %c10 = arith.constant 10 : index
    %c0_85 = arith.constant 0 : index
    %c0_86 = arith.constant 0 : index
    %63 = vector.load %arg6[%c10, %c0_85, %c0_86] : memref<16x16x128xbf16, #tpu.memory_space<vmem>>, vector<1x16x128xbf16>
    %64 = vector.shape_cast %63 : vector<1x16x128xbf16> to vector<16x128xbf16>
    %cst_87 = arith.constant dense<0.000000e+00> : vector<8x128xf32>
    %65 = tpu.matmul %62, %64, %cst_87 {dimension_numbers = #tpu.dot_dimension_numbers<[1], [0], [0], [1], [0, 0, 1, 1], [], []>} : vector<8x16xbf16>, vector<16x128xbf16>, vector<8x128xf32> -> vector<8x128xf32>
    %66 = arith.addf %60, %65 : vector<8x128xf32>
    %c0_88 = arith.constant 0 : index
    %c0_89 = arith.constant 0 : index
    %c0_90 = arith.constant 0 : index
    %c3_91 = arith.constant 3 : index
    %c0_92 = arith.constant 0 : index
    %67 = vector.load %arg4[%c0_88, %c0_89, %c0_90, %c3_91, %c0_92] : memref<1x1x1x11x16xbf16, #tpu.memory_space<vmem>>, vector<1x1x1x8x16xbf16>
    %68 = vector.shape_cast %67 : vector<1x1x1x8x16xbf16> to vector<8x16xbf16>
    %c11 = arith.constant 11 : index
    %c0_93 = arith.constant 0 : index
    %c0_94 = arith.constant 0 : index
    %69 = vector.load %arg6[%c11, %c0_93, %c0_94] : memref<16x16x128xbf16, #tpu.memory_space<vmem>>, vector<1x16x128xbf16>
    %70 = vector.shape_cast %69 : vector<1x16x128xbf16> to vector<16x128xbf16>
    %cst_95 = arith.constant dense<0.000000e+00> : vector<8x128xf32>
    %71 = tpu.matmul %68, %70, %cst_95 {dimension_numbers = #tpu.dot_dimension_numbers<[1], [0], [0], [1], [0, 0, 1, 1], [], []>} : vector<8x16xbf16>, vector<16x128xbf16>, vector<8x128xf32> -> vector<8x128xf32>
    %72 = arith.addf %66, %71 : vector<8x128xf32>
    %c0_96 = arith.constant 0 : index
    %c0_97 = arith.constant 0 : index
    %c0_98 = arith.constant 0 : index
    %c0_99 = arith.constant 0 : index
    %c0_100 = arith.constant 0 : index
    %73 = vector.load %arg5[%c0_96, %c0_97, %c0_98, %c0_99, %c0_100] : memref<1x1x1x11x16xbf16, #tpu.memory_space<vmem>>, vector<1x1x1x8x16xbf16>
    %74 = vector.shape_cast %73 : vector<1x1x1x8x16xbf16> to vector<8x16xbf16>
    %c12 = arith.constant 12 : index
    %c0_101 = arith.constant 0 : index
    %c0_102 = arith.constant 0 : index
    %75 = vector.load %arg6[%c12, %c0_101, %c0_102] : memref<16x16x128xbf16, #tpu.memory_space<vmem>>, vector<1x16x128xbf16>
    %76 = vector.shape_cast %75 : vector<1x16x128xbf16> to vector<16x128xbf16>
    %cst_103 = arith.constant dense<0.000000e+00> : vector<8x128xf32>
    %77 = tpu.matmul %74, %76, %cst_103 {dimension_numbers = #tpu.dot_dimension_numbers<[1], [0], [0], [1], [0, 0, 1, 1], [], []>} : vector<8x16xbf16>, vector<16x128xbf16>, vector<8x128xf32> -> vector<8x128xf32>
    %78 = arith.addf %72, %77 : vector<8x128xf32>
    %c0_104 = arith.constant 0 : index
    %c0_105 = arith.constant 0 : index
    %c0_106 = arith.constant 0 : index
    %c1_107 = arith.constant 1 : index
    %c0_108 = arith.constant 0 : index
    %79 = vector.load %arg5[%c0_104, %c0_105, %c0_106, %c1_107, %c0_108] : memref<1x1x1x11x16xbf16, #tpu.memory_space<vmem>>, vector<1x1x1x8x16xbf16>
    %80 = vector.shape_cast %79 : vector<1x1x1x8x16xbf16> to vector<8x16xbf16>
    %c13 = arith.constant 13 : index
    %c0_109 = arith.constant 0 : index
    %c0_110 = arith.constant 0 : index
    %81 = vector.load %arg6[%c13, %c0_109, %c0_110] : memref<16x16x128xbf16, #tpu.memory_space<vmem>>, vector<1x16x128xbf16>
    %82 = vector.shape_cast %81 : vector<1x16x128xbf16> to vector<16x128xbf16>
    %cst_111 = arith.constant dense<0.000000e+00> : vector<8x128xf32>
    %83 = tpu.matmul %80, %82, %cst_111 {dimension_numbers = #tpu.dot_dimension_numbers<[1], [0], [0], [1], [0, 0, 1, 1], [], []>} : vector<8x16xbf16>, vector<16x128xbf16>, vector<8x128xf32> -> vector<8x128xf32>
    %84 = arith.addf %78, %83 : vector<8x128xf32>
    %c0_112 = arith.constant 0 : index
    %c0_113 = arith.constant 0 : index
    %c0_114 = arith.constant 0 : index
    %c2_115 = arith.constant 2 : index
    %c0_116 = arith.constant 0 : index
    %85 = vector.load %arg5[%c0_112, %c0_113, %c0_114, %c2_115, %c0_116] : memref<1x1x1x11x16xbf16, #tpu.memory_space<vmem>>, vector<1x1x1x8x16xbf16>
    %86 = vector.shape_cast %85 : vector<1x1x1x8x16xbf16> to vector<8x16xbf16>
    %c14 = arith.constant 14 : index
    %c0_117 = arith.constant 0 : index
    %c0_118 = arith.constant 0 : index
    %87 = vector.load %arg6[%c14, %c0_117, %c0_118] : memref<16x16x128xbf16, #tpu.memory_space<vmem>>, vector<1x16x128xbf16>
    %88 = vector.shape_cast %87 : vector<1x16x128xbf16> to vector<16x128xbf16>
    %cst_119 = arith.constant dense<0.000000e+00> : vector<8x128xf32>
    %89 = tpu.matmul %86, %88, %cst_119 {dimension_numbers = #tpu.dot_dimension_numbers<[1], [0], [0], [1], [0, 0, 1, 1], [], []>} : vector<8x16xbf16>, vector<16x128xbf16>, vector<8x128xf32> -> vector<8x128xf32>
    %90 = arith.addf %84, %89 : vector<8x128xf32>
    %c0_120 = arith.constant 0 : index
    %c0_121 = arith.constant 0 : index
    %c0_122 = arith.constant 0 : index
    %c3_123 = arith.constant 3 : index
    %c0_124 = arith.constant 0 : index
    %91 = vector.load %arg5[%c0_120, %c0_121, %c0_122, %c3_123, %c0_124] : memref<1x1x1x11x16xbf16, #tpu.memory_space<vmem>>, vector<1x1x1x8x16xbf16>
    %92 = vector.shape_cast %91 : vector<1x1x1x8x16xbf16> to vector<8x16xbf16>
    %c15 = arith.constant 15 : index
    %c0_125 = arith.constant 0 : index
    %c0_126 = arith.constant 0 : index
    %93 = vector.load %arg6[%c15, %c0_125, %c0_126] : memref<16x16x128xbf16, #tpu.memory_space<vmem>>, vector<1x16x128xbf16>
    %94 = vector.shape_cast %93 : vector<1x16x128xbf16> to vector<16x128xbf16>
    %cst_127 = arith.constant dense<0.000000e+00> : vector<8x128xf32>
    %95 = tpu.matmul %92, %94, %cst_127 {dimension_numbers = #tpu.dot_dimension_numbers<[1], [0], [0], [1], [0, 0, 1, 1], [], []>} : vector<8x16xbf16>, vector<16x128xbf16>, vector<8x128xf32> -> vector<8x128xf32>
    %96 = arith.addf %90, %95 : vector<8x128xf32>
    %c0_128 = arith.constant 0 : index
    %c0_129 = arith.constant 0 : index
    %97 = vector.load %arg7[%c0_128, %c0_129] : memref<1x128xf32, #tpu.memory_space<vmem>>, vector<1x128xf32>
    %98 = vector.broadcast %97 : vector<1x128xf32> to vector<8x128xf32>
    %99 = arith.addf %96, %98 : vector<8x128xf32>
    %cst_130 = arith.constant 0.000000e+00 : f32
    %100 = vector.broadcast %cst_130 : f32 to vector<8x128xf32>
    %101 = arith.cmpf oge, %99, %100 : vector<8x128xf32>
    %cst_131 = arith.constant 2.000000e-01 : f32
    %102 = vector.broadcast %cst_131 : f32 to vector<8x128xf32>
    %103 = arith.mulf %102, %99 : vector<8x128xf32>
    %104 = arith.select %101, %99, %103 : vector<8x128xi1>, vector<8x128xf32>
    %105 = arith.truncf %104 : vector<8x128xf32> to vector<8x128xbf16>
    %c0_132 = arith.constant 0 : index
    %c0_133 = arith.constant 0 : index
    %c0_134 = arith.constant 0 : index
    %c0_135 = arith.constant 0 : index
    %106 = vector.load %arg8[%c0_132, %c0_133, %c0_134, %c0_135] : memref<1x1x8x128xbf16, #tpu.memory_space<vmem>>, vector<1x1x8x128xbf16>
    %107 = vector.shape_cast %106 : vector<1x1x8x128xbf16> to vector<8x128xbf16>
    %108 = vector.shape_cast %105 : vector<8x128xbf16> to vector<1x1x8x128xbf16>
    tpu.vector_store %arg8[%c0_132, %c0_133, %c0_134, %c0_135], %108 {strides = array<i32>} : memref<1x1x8x128xbf16, #tpu.memory_space<vmem>>, vector<1x1x8x128xbf16>,
    return
  }
  func.func @transform_0(%arg0: i32, %arg1: i32) -> (i32, i32, i32, i32, i32) {
    %c1_i32 = arith.constant 1 : i32
    %0 = arith.muli %c1_i32, %arg1 : i32
    %c0_i32 = arith.constant 0 : i32
    %1 = arith.addi %0, %c0_i32 : i32
    %c0_i32_0 = arith.constant 0 : i32
    %c0_i32_1 = arith.constant 0 : i32
    %c0_i32_2 = arith.constant 0 : i32
    %c0_i32_3 = arith.constant 0 : i32
    return %arg0, %1, %c0_i32_0, %c0_i32_1, %c0_i32_2 : i32, i32, i32, i32, i32
  }
  func.func @transform_1(%arg0: i32, %arg1: i32) -> (i32, i32, i32, i32, i32) {
    %c1_i32 = arith.constant 1 : i32
    %0 = arith.muli %c1_i32, %arg1 : i32
    %c1_i32_0 = arith.constant 1 : i32
    %1 = arith.addi %0, %c1_i32_0 : i32
    %c0_i32 = arith.constant 0 : i32
    %c0_i32_1 = arith.constant 0 : i32
    %c0_i32_2 = arith.constant 0 : i32
    %c0_i32_3 = arith.constant 0 : i32
    return %arg0, %1, %c0_i32, %c0_i32_1, %c0_i32_2 : i32, i32, i32, i32, i32
  }
  func.func @transform_2(%arg0: i32, %arg1: i32) -> (i32, i32, i32, i32, i32) {
    %c1_i32 = arith.constant 1 : i32
    %0 = arith.muli %c1_i32, %arg1 : i32
    %c2_i32 = arith.constant 2 : i32
    %1 = arith.addi %0, %c2_i32 : i32
    %c0_i32 = arith.constant 0 : i32
    %c0_i32_0 = arith.constant 0 : i32
    %c0_i32_1 = arith.constant 0 : i32
    %c0_i32_2 = arith.constant 0 : i32
    return %arg0, %1, %c0_i32, %c0_i32_0, %c0_i32_1 : i32, i32, i32, i32, i32
  }
  func.func @transform_3(%arg0: i32, %arg1: i32) -> (i32, i32, i32, i32, i32) {
    %c1_i32 = arith.constant 1 : i32
    %0 = arith.muli %c1_i32, %arg1 : i32
    %c3_i32 = arith.constant 3 : i32
    %1 = arith.addi %0, %c3_i32 : i32
    %c0_i32 = arith.constant 0 : i32
    %c0_i32_0 = arith.constant 0 : i32
    %c0_i32_1 = arith.constant 0 : i32
    %c0_i32_2 = arith.constant 0 : i32
    return %arg0, %1, %c0_i32, %c0_i32_0, %c0_i32_1 : i32, i32, i32, i32, i32
  }
  func.func @transform_4(%arg0: i32, %arg1: i32) -> (i32, i32, i32) {
    %c0_i32 = arith.constant 0 : i32
    %c0_i32_0 = arith.constant 0 : i32
    %c0_i32_1 = arith.constant 0 : i32
    %c0_i32_2 = arith.constant 0 : i32
    return %c0_i32, %c0_i32_0, %c0_i32_1 : i32, i32, i32
  }
  func.func @transform_5(%arg0: i32, %arg1: i32) -> (i32, i32) {
    %c0_i32 = arith.constant 0 : i32
    %c0_i32_0 = arith.constant 0 : i32
    %c0_i32_1 = arith.constant 0 : i32
    return %c0_i32, %c0_i32_0 : i32, i32
  }
  func.func @transform_6(%arg0: i32, %arg1: i32) -> (i32, i32, i32, i32) {
    %c0_i32 = arith.constant 0 : i32
    %c0_i32_0 = arith.constant 0 : i32
    %c0_i32_1 = arith.constant 0 : i32
    return %arg0, %arg1, %c0_i32, %c0_i32_0 : i32, i32, i32, i32
  }
}

module attributes {stable_mosaic.version = 11 : i64} {
  func.func @_cam_kernel(%arg0: i32, %arg1: memref<16x32xbf16, #tpu.memory_space<vmem>>, %arg2: memref<1x32xbf16, #tpu.memory_space<vmem>>, %arg3: memref<1x32xbf16, #tpu.memory_space<vmem>>, %arg4: memref<32x128xbf16, #tpu.memory_space<vmem>>, %arg5: memref<32x128xbf16, #tpu.memory_space<vmem>>, %arg6: memref<1x128xf32, #tpu.memory_space<vmem>>, %arg7: memref<16x64xbf16, #tpu.memory_space<vmem>>, %arg8: memref<16x128xbf16, #tpu.memory_space<vmem>>) attributes {dimension_semantics = [#tpu.dimension_semantics<parallel>], iteration_bounds = array<i64: 2>, scalar_prefetch = 0 : i64, scratch_operands = 0 : i64, tpu.core_type = #tpu.core_type<tc>, window_params = [{transform_indices = @transform_0, window_bounds = array<i64: 16, 32>}, {pipeline_mode = #tpu.pipeline_mode<synchronous>, transform_indices = @transform_1, window_bounds = array<i64: 1, 32>}, {pipeline_mode = #tpu.pipeline_mode<synchronous>, transform_indices = @transform_2, window_bounds = array<i64: 1, 32>}, {pipeline_mode = #tpu.pipeline_mode<synchronous>, transform_indices = @transform_3, window_bounds = array<i64: 32, 128>}, {pipeline_mode = #tpu.pipeline_mode<synchronous>, transform_indices = @transform_4, window_bounds = array<i64: 32, 128>}, {pipeline_mode = #tpu.pipeline_mode<synchronous>, transform_indices = @transform_5, window_bounds = array<i64: 1, 128>}, {transform_indices = @transform_6, window_bounds = array<i64: 16, 64>}, {transform_indices = @transform_7, window_bounds = array<i64: 16, 128>}]} {
    %c0 = arith.constant 0 : index
    %c0_0 = arith.constant 0 : index
    %0 = vector.load %arg1[%c0, %c0_0] : memref<16x32xbf16, #tpu.memory_space<vmem>>, vector<16x32xbf16>
    %c0_1 = arith.constant 0 : index
    %c0_2 = arith.constant 0 : index
    %1 = vector.load %arg2[%c0_1, %c0_2] : memref<1x32xbf16, #tpu.memory_space<vmem>>, vector<1x32xbf16>
    %2 = vector.broadcast %1 : vector<1x32xbf16> to vector<16x32xbf16>
    %3 = arith.mulf %0, %2 : vector<16x32xbf16>
    %c0_3 = arith.constant 0 : index
    %c0_4 = arith.constant 0 : index
    %4 = vector.load %arg3[%c0_3, %c0_4] : memref<1x32xbf16, #tpu.memory_space<vmem>>, vector<1x32xbf16>
    %5 = vector.broadcast %4 : vector<1x32xbf16> to vector<16x32xbf16>
    %6 = arith.mulf %0, %5 : vector<16x32xbf16>
    %7 = tpu.concatenate %3, %6 in 1 : vector<16x32xbf16>, vector<16x32xbf16> -> vector<16x64xbf16>
    %c0_5 = arith.constant 0 : index
    %c0_6 = arith.constant 0 : index
    %8 = vector.load %arg7[%c0_5, %c0_6] : memref<16x64xbf16, #tpu.memory_space<vmem>>, vector<16x64xbf16>
    tpu.vector_store %arg7[%c0_5, %c0_6], %7 {strides = array<i32>} : memref<16x64xbf16, #tpu.memory_space<vmem>>, vector<16x64xbf16>,
    %c0_7 = arith.constant 0 : index
    %c0_8 = arith.constant 0 : index
    %9 = vector.load %arg4[%c0_7, %c0_8] : memref<32x128xbf16, #tpu.memory_space<vmem>>, vector<32x128xbf16>
    %cst = arith.constant dense<0.000000e+00> : vector<16x128xf32>
    %10 = tpu.matmul %3, %9, %cst {dimension_numbers = #tpu.dot_dimension_numbers<[1], [0], [0], [1], [0, 0, 1, 1], [], []>} : vector<16x32xbf16>, vector<32x128xbf16>, vector<16x128xf32> -> vector<16x128xf32>
    %c0_9 = arith.constant 0 : index
    %c0_10 = arith.constant 0 : index
    %11 = vector.load %arg5[%c0_9, %c0_10] : memref<32x128xbf16, #tpu.memory_space<vmem>>, vector<32x128xbf16>
    %cst_11 = arith.constant dense<0.000000e+00> : vector<16x128xf32>
    %12 = tpu.matmul %6, %11, %cst_11 {dimension_numbers = #tpu.dot_dimension_numbers<[1], [0], [0], [1], [0, 0, 1, 1], [], []>} : vector<16x32xbf16>, vector<32x128xbf16>, vector<16x128xf32> -> vector<16x128xf32>
    %13 = arith.addf %10, %12 : vector<16x128xf32>
    %c0_12 = arith.constant 0 : index
    %c0_13 = arith.constant 0 : index
    %14 = vector.load %arg6[%c0_12, %c0_13] : memref<1x128xf32, #tpu.memory_space<vmem>>, vector<1x128xf32>
    %15 = vector.broadcast %14 : vector<1x128xf32> to vector<16x128xf32>
    %16 = arith.addf %13, %15 : vector<16x128xf32>
    %cst_14 = arith.constant 0.000000e+00 : f32
    %17 = vector.broadcast %cst_14 : f32 to vector<16x128xf32>
    %18 = arith.cmpf oge, %16, %17 : vector<16x128xf32>
    %cst_15 = arith.constant 2.000000e-01 : f32
    %19 = vector.broadcast %cst_15 : f32 to vector<16x128xf32>
    %20 = arith.mulf %19, %16 : vector<16x128xf32>
    %21 = arith.select %18, %16, %20 : vector<16x128xi1>, vector<16x128xf32>
    %22 = arith.truncf %21 : vector<16x128xf32> to vector<16x128xbf16>
    %c0_16 = arith.constant 0 : index
    %c0_17 = arith.constant 0 : index
    %23 = vector.load %arg8[%c0_16, %c0_17] : memref<16x128xbf16, #tpu.memory_space<vmem>>, vector<16x128xbf16>
    tpu.vector_store %arg8[%c0_16, %c0_17], %22 {strides = array<i32>} : memref<16x128xbf16, #tpu.memory_space<vmem>>, vector<16x128xbf16>,
    return
  }
  func.func @transform_0(%arg0: i32) -> (i32, i32) {
    %c0_i32 = arith.constant 0 : i32
    %c0_i32_0 = arith.constant 0 : i32
    return %arg0, %c0_i32 : i32, i32
  }
  func.func @transform_1(%arg0: i32) -> (i32, i32) {
    %c0_i32 = arith.constant 0 : i32
    %c0_i32_0 = arith.constant 0 : i32
    %c0_i32_1 = arith.constant 0 : i32
    return %c0_i32, %c0_i32_0 : i32, i32
  }
  func.func @transform_2(%arg0: i32) -> (i32, i32) {
    %c0_i32 = arith.constant 0 : i32
    %c0_i32_0 = arith.constant 0 : i32
    %c0_i32_1 = arith.constant 0 : i32
    return %c0_i32, %c0_i32_0 : i32, i32
  }
  func.func @transform_3(%arg0: i32) -> (i32, i32) {
    %c0_i32 = arith.constant 0 : i32
    %c0_i32_0 = arith.constant 0 : i32
    %c0_i32_1 = arith.constant 0 : i32
    return %c0_i32, %c0_i32_0 : i32, i32
  }
  func.func @transform_4(%arg0: i32) -> (i32, i32) {
    %c0_i32 = arith.constant 0 : i32
    %c0_i32_0 = arith.constant 0 : i32
    %c0_i32_1 = arith.constant 0 : i32
    return %c0_i32, %c0_i32_0 : i32, i32
  }
  func.func @transform_5(%arg0: i32) -> (i32, i32) {
    %c0_i32 = arith.constant 0 : i32
    %c0_i32_0 = arith.constant 0 : i32
    %c0_i32_1 = arith.constant 0 : i32
    return %c0_i32, %c0_i32_0 : i32, i32
  }
  func.func @transform_6(%arg0: i32) -> (i32, i32) {
    %c0_i32 = arith.constant 0 : i32
    %c0_i32_0 = arith.constant 0 : i32
    return %arg0, %c0_i32 : i32, i32
  }
  func.func @transform_7(%arg0: i32) -> (i32, i32) {
    %c0_i32 = arith.constant 0 : i32
    %c0_i32_0 = arith.constant 0 : i32
    return %arg0, %c0_i32 : i32, i32
  }
}

module attributes {stable_mosaic.version = 11 : i64} {
  func.func @_conv_tap_kernel(%arg0: i32, %arg1: i32, %arg2: memref<1x1x1x11x32xbf16, #tpu.memory_space<vmem>>, %arg3: memref<1x1x1x11x32xbf16, #tpu.memory_space<vmem>>, %arg4: memref<1x1x1x11x32xbf16, #tpu.memory_space<vmem>>, %arg5: memref<1x1x1x11x32xbf16, #tpu.memory_space<vmem>>, %arg6: memref<16x32x128xbf16, #tpu.memory_space<vmem>>, %arg7: memref<1x128xf32, #tpu.memory_space<vmem>>, %arg8: memref<1x1x8x128xf32, #tpu.memory_space<vmem>>) attributes {dimension_semantics = [#tpu.dimension_semantics<parallel>, #tpu.dimension_semantics<parallel>], iteration_bounds = array<i64: 2, 2>, scalar_prefetch = 0 : i64, scratch_operands = 0 : i64, tpu.core_type = #tpu.core_type<tc>, window_params = [{transform_indices = @transform_0, window_bounds = array<i64: 1, 1, 1, 11, 32>}, {transform_indices = @transform_1, window_bounds = array<i64: 1, 1, 1, 11, 32>}, {transform_indices = @transform_2, window_bounds = array<i64: 1, 1, 1, 11, 32>}, {transform_indices = @transform_3, window_bounds = array<i64: 1, 1, 1, 11, 32>}, {pipeline_mode = #tpu.pipeline_mode<synchronous>, transform_indices = @transform_4, window_bounds = array<i64: 16, 32, 128>}, {pipeline_mode = #tpu.pipeline_mode<synchronous>, transform_indices = @transform_5, window_bounds = array<i64: 1, 128>}, {transform_indices = @transform_6, window_bounds = array<i64: 1, 1, 8, 128>}]} {
    %cst = arith.constant 0.000000e+00 : f32
    %0 = vector.broadcast %cst : f32 to vector<8x128xf32>
    %c0 = arith.constant 0 : index
    %c0_0 = arith.constant 0 : index
    %c0_1 = arith.constant 0 : index
    %c0_2 = arith.constant 0 : index
    %c0_3 = arith.constant 0 : index
    %1 = vector.load %arg2[%c0, %c0_0, %c0_1, %c0_2, %c0_3] : memref<1x1x1x11x32xbf16, #tpu.memory_space<vmem>>, vector<1x1x1x8x32xbf16>
    %2 = vector.shape_cast %1 : vector<1x1x1x8x32xbf16> to vector<8x32xbf16>
    %c0_4 = arith.constant 0 : index
    %c0_5 = arith.constant 0 : index
    %c0_6 = arith.constant 0 : index
    %3 = vector.load %arg6[%c0_4, %c0_5, %c0_6] : memref<16x32x128xbf16, #tpu.memory_space<vmem>>, vector<1x32x128xbf16>
    %4 = vector.shape_cast %3 : vector<1x32x128xbf16> to vector<32x128xbf16>
    %cst_7 = arith.constant dense<0.000000e+00> : vector<8x128xf32>
    %5 = tpu.matmul %2, %4, %cst_7 {dimension_numbers = #tpu.dot_dimension_numbers<[1], [0], [0], [1], [0, 0, 1, 1], [], []>} : vector<8x32xbf16>, vector<32x128xbf16>, vector<8x128xf32> -> vector<8x128xf32>
    %6 = arith.addf %0, %5 : vector<8x128xf32>
    %c0_8 = arith.constant 0 : index
    %c0_9 = arith.constant 0 : index
    %c0_10 = arith.constant 0 : index
    %c1 = arith.constant 1 : index
    %c0_11 = arith.constant 0 : index
    %7 = vector.load %arg2[%c0_8, %c0_9, %c0_10, %c1, %c0_11] : memref<1x1x1x11x32xbf16, #tpu.memory_space<vmem>>, vector<1x1x1x8x32xbf16>
    %8 = vector.shape_cast %7 : vector<1x1x1x8x32xbf16> to vector<8x32xbf16>
    %c1_12 = arith.constant 1 : index
    %c0_13 = arith.constant 0 : index
    %c0_14 = arith.constant 0 : index
    %9 = vector.load %arg6[%c1_12, %c0_13, %c0_14] : memref<16x32x128xbf16, #tpu.memory_space<vmem>>, vector<1x32x128xbf16>
    %10 = vector.shape_cast %9 : vector<1x32x128xbf16> to vector<32x128xbf16>
    %cst_15 = arith.constant dense<0.000000e+00> : vector<8x128xf32>
    %11 = tpu.matmul %8, %10, %cst_15 {dimension_numbers = #tpu.dot_dimension_numbers<[1], [0], [0], [1], [0, 0, 1, 1], [], []>} : vector<8x32xbf16>, vector<32x128xbf16>, vector<8x128xf32> -> vector<8x128xf32>
    %12 = arith.addf %6, %11 : vector<8x128xf32>
    %c0_16 = arith.constant 0 : index
    %c0_17 = arith.constant 0 : index
    %c0_18 = arith.constant 0 : index
    %c2 = arith.constant 2 : index
    %c0_19 = arith.constant 0 : index
    %13 = vector.load %arg2[%c0_16, %c0_17, %c0_18, %c2, %c0_19] : memref<1x1x1x11x32xbf16, #tpu.memory_space<vmem>>, vector<1x1x1x8x32xbf16>
    %14 = vector.shape_cast %13 : vector<1x1x1x8x32xbf16> to vector<8x32xbf16>
    %c2_20 = arith.constant 2 : index
    %c0_21 = arith.constant 0 : index
    %c0_22 = arith.constant 0 : index
    %15 = vector.load %arg6[%c2_20, %c0_21, %c0_22] : memref<16x32x128xbf16, #tpu.memory_space<vmem>>, vector<1x32x128xbf16>
    %16 = vector.shape_cast %15 : vector<1x32x128xbf16> to vector<32x128xbf16>
    %cst_23 = arith.constant dense<0.000000e+00> : vector<8x128xf32>
    %17 = tpu.matmul %14, %16, %cst_23 {dimension_numbers = #tpu.dot_dimension_numbers<[1], [0], [0], [1], [0, 0, 1, 1], [], []>} : vector<8x32xbf16>, vector<32x128xbf16>, vector<8x128xf32> -> vector<8x128xf32>
    %18 = arith.addf %12, %17 : vector<8x128xf32>
    %c0_24 = arith.constant 0 : index
    %c0_25 = arith.constant 0 : index
    %c0_26 = arith.constant 0 : index
    %c3 = arith.constant 3 : index
    %c0_27 = arith.constant 0 : index
    %19 = vector.load %arg2[%c0_24, %c0_25, %c0_26, %c3, %c0_27] : memref<1x1x1x11x32xbf16, #tpu.memory_space<vmem>>, vector<1x1x1x8x32xbf16>
    %20 = vector.shape_cast %19 : vector<1x1x1x8x32xbf16> to vector<8x32xbf16>
    %c3_28 = arith.constant 3 : index
    %c0_29 = arith.constant 0 : index
    %c0_30 = arith.constant 0 : index
    %21 = vector.load %arg6[%c3_28, %c0_29, %c0_30] : memref<16x32x128xbf16, #tpu.memory_space<vmem>>, vector<1x32x128xbf16>
    %22 = vector.shape_cast %21 : vector<1x32x128xbf16> to vector<32x128xbf16>
    %cst_31 = arith.constant dense<0.000000e+00> : vector<8x128xf32>
    %23 = tpu.matmul %20, %22, %cst_31 {dimension_numbers = #tpu.dot_dimension_numbers<[1], [0], [0], [1], [0, 0, 1, 1], [], []>} : vector<8x32xbf16>, vector<32x128xbf16>, vector<8x128xf32> -> vector<8x128xf32>
    %24 = arith.addf %18, %23 : vector<8x128xf32>
    %c0_32 = arith.constant 0 : index
    %c0_33 = arith.constant 0 : index
    %c0_34 = arith.constant 0 : index
    %c0_35 = arith.constant 0 : index
    %c0_36 = arith.constant 0 : index
    %25 = vector.load %arg3[%c0_32, %c0_33, %c0_34, %c0_35, %c0_36] : memref<1x1x1x11x32xbf16, #tpu.memory_space<vmem>>, vector<1x1x1x8x32xbf16>
    %26 = vector.shape_cast %25 : vector<1x1x1x8x32xbf16> to vector<8x32xbf16>
    %c4 = arith.constant 4 : index
    %c0_37 = arith.constant 0 : index
    %c0_38 = arith.constant 0 : index
    %27 = vector.load %arg6[%c4, %c0_37, %c0_38] : memref<16x32x128xbf16, #tpu.memory_space<vmem>>, vector<1x32x128xbf16>
    %28 = vector.shape_cast %27 : vector<1x32x128xbf16> to vector<32x128xbf16>
    %cst_39 = arith.constant dense<0.000000e+00> : vector<8x128xf32>
    %29 = tpu.matmul %26, %28, %cst_39 {dimension_numbers = #tpu.dot_dimension_numbers<[1], [0], [0], [1], [0, 0, 1, 1], [], []>} : vector<8x32xbf16>, vector<32x128xbf16>, vector<8x128xf32> -> vector<8x128xf32>
    %30 = arith.addf %24, %29 : vector<8x128xf32>
    %c0_40 = arith.constant 0 : index
    %c0_41 = arith.constant 0 : index
    %c0_42 = arith.constant 0 : index
    %c1_43 = arith.constant 1 : index
    %c0_44 = arith.constant 0 : index
    %31 = vector.load %arg3[%c0_40, %c0_41, %c0_42, %c1_43, %c0_44] : memref<1x1x1x11x32xbf16, #tpu.memory_space<vmem>>, vector<1x1x1x8x32xbf16>
    %32 = vector.shape_cast %31 : vector<1x1x1x8x32xbf16> to vector<8x32xbf16>
    %c5 = arith.constant 5 : index
    %c0_45 = arith.constant 0 : index
    %c0_46 = arith.constant 0 : index
    %33 = vector.load %arg6[%c5, %c0_45, %c0_46] : memref<16x32x128xbf16, #tpu.memory_space<vmem>>, vector<1x32x128xbf16>
    %34 = vector.shape_cast %33 : vector<1x32x128xbf16> to vector<32x128xbf16>
    %cst_47 = arith.constant dense<0.000000e+00> : vector<8x128xf32>
    %35 = tpu.matmul %32, %34, %cst_47 {dimension_numbers = #tpu.dot_dimension_numbers<[1], [0], [0], [1], [0, 0, 1, 1], [], []>} : vector<8x32xbf16>, vector<32x128xbf16>, vector<8x128xf32> -> vector<8x128xf32>
    %36 = arith.addf %30, %35 : vector<8x128xf32>
    %c0_48 = arith.constant 0 : index
    %c0_49 = arith.constant 0 : index
    %c0_50 = arith.constant 0 : index
    %c2_51 = arith.constant 2 : index
    %c0_52 = arith.constant 0 : index
    %37 = vector.load %arg3[%c0_48, %c0_49, %c0_50, %c2_51, %c0_52] : memref<1x1x1x11x32xbf16, #tpu.memory_space<vmem>>, vector<1x1x1x8x32xbf16>
    %38 = vector.shape_cast %37 : vector<1x1x1x8x32xbf16> to vector<8x32xbf16>
    %c6 = arith.constant 6 : index
    %c0_53 = arith.constant 0 : index
    %c0_54 = arith.constant 0 : index
    %39 = vector.load %arg6[%c6, %c0_53, %c0_54] : memref<16x32x128xbf16, #tpu.memory_space<vmem>>, vector<1x32x128xbf16>
    %40 = vector.shape_cast %39 : vector<1x32x128xbf16> to vector<32x128xbf16>
    %cst_55 = arith.constant dense<0.000000e+00> : vector<8x128xf32>
    %41 = tpu.matmul %38, %40, %cst_55 {dimension_numbers = #tpu.dot_dimension_numbers<[1], [0], [0], [1], [0, 0, 1, 1], [], []>} : vector<8x32xbf16>, vector<32x128xbf16>, vector<8x128xf32> -> vector<8x128xf32>
    %42 = arith.addf %36, %41 : vector<8x128xf32>
    %c0_56 = arith.constant 0 : index
    %c0_57 = arith.constant 0 : index
    %c0_58 = arith.constant 0 : index
    %c3_59 = arith.constant 3 : index
    %c0_60 = arith.constant 0 : index
    %43 = vector.load %arg3[%c0_56, %c0_57, %c0_58, %c3_59, %c0_60] : memref<1x1x1x11x32xbf16, #tpu.memory_space<vmem>>, vector<1x1x1x8x32xbf16>
    %44 = vector.shape_cast %43 : vector<1x1x1x8x32xbf16> to vector<8x32xbf16>
    %c7 = arith.constant 7 : index
    %c0_61 = arith.constant 0 : index
    %c0_62 = arith.constant 0 : index
    %45 = vector.load %arg6[%c7, %c0_61, %c0_62] : memref<16x32x128xbf16, #tpu.memory_space<vmem>>, vector<1x32x128xbf16>
    %46 = vector.shape_cast %45 : vector<1x32x128xbf16> to vector<32x128xbf16>
    %cst_63 = arith.constant dense<0.000000e+00> : vector<8x128xf32>
    %47 = tpu.matmul %44, %46, %cst_63 {dimension_numbers = #tpu.dot_dimension_numbers<[1], [0], [0], [1], [0, 0, 1, 1], [], []>} : vector<8x32xbf16>, vector<32x128xbf16>, vector<8x128xf32> -> vector<8x128xf32>
    %48 = arith.addf %42, %47 : vector<8x128xf32>
    %c0_64 = arith.constant 0 : index
    %c0_65 = arith.constant 0 : index
    %c0_66 = arith.constant 0 : index
    %c0_67 = arith.constant 0 : index
    %c0_68 = arith.constant 0 : index
    %49 = vector.load %arg4[%c0_64, %c0_65, %c0_66, %c0_67, %c0_68] : memref<1x1x1x11x32xbf16, #tpu.memory_space<vmem>>, vector<1x1x1x8x32xbf16>
    %50 = vector.shape_cast %49 : vector<1x1x1x8x32xbf16> to vector<8x32xbf16>
    %c8 = arith.constant 8 : index
    %c0_69 = arith.constant 0 : index
    %c0_70 = arith.constant 0 : index
    %51 = vector.load %arg6[%c8, %c0_69, %c0_70] : memref<16x32x128xbf16, #tpu.memory_space<vmem>>, vector<1x32x128xbf16>
    %52 = vector.shape_cast %51 : vector<1x32x128xbf16> to vector<32x128xbf16>
    %cst_71 = arith.constant dense<0.000000e+00> : vector<8x128xf32>
    %53 = tpu.matmul %50, %52, %cst_71 {dimension_numbers = #tpu.dot_dimension_numbers<[1], [0], [0], [1], [0, 0, 1, 1], [], []>} : vector<8x32xbf16>, vector<32x128xbf16>, vector<8x128xf32> -> vector<8x128xf32>
    %54 = arith.addf %48, %53 : vector<8x128xf32>
    %c0_72 = arith.constant 0 : index
    %c0_73 = arith.constant 0 : index
    %c0_74 = arith.constant 0 : index
    %c1_75 = arith.constant 1 : index
    %c0_76 = arith.constant 0 : index
    %55 = vector.load %arg4[%c0_72, %c0_73, %c0_74, %c1_75, %c0_76] : memref<1x1x1x11x32xbf16, #tpu.memory_space<vmem>>, vector<1x1x1x8x32xbf16>
    %56 = vector.shape_cast %55 : vector<1x1x1x8x32xbf16> to vector<8x32xbf16>
    %c9 = arith.constant 9 : index
    %c0_77 = arith.constant 0 : index
    %c0_78 = arith.constant 0 : index
    %57 = vector.load %arg6[%c9, %c0_77, %c0_78] : memref<16x32x128xbf16, #tpu.memory_space<vmem>>, vector<1x32x128xbf16>
    %58 = vector.shape_cast %57 : vector<1x32x128xbf16> to vector<32x128xbf16>
    %cst_79 = arith.constant dense<0.000000e+00> : vector<8x128xf32>
    %59 = tpu.matmul %56, %58, %cst_79 {dimension_numbers = #tpu.dot_dimension_numbers<[1], [0], [0], [1], [0, 0, 1, 1], [], []>} : vector<8x32xbf16>, vector<32x128xbf16>, vector<8x128xf32> -> vector<8x128xf32>
    %60 = arith.addf %54, %59 : vector<8x128xf32>
    %c0_80 = arith.constant 0 : index
    %c0_81 = arith.constant 0 : index
    %c0_82 = arith.constant 0 : index
    %c2_83 = arith.constant 2 : index
    %c0_84 = arith.constant 0 : index
    %61 = vector.load %arg4[%c0_80, %c0_81, %c0_82, %c2_83, %c0_84] : memref<1x1x1x11x32xbf16, #tpu.memory_space<vmem>>, vector<1x1x1x8x32xbf16>
    %62 = vector.shape_cast %61 : vector<1x1x1x8x32xbf16> to vector<8x32xbf16>
    %c10 = arith.constant 10 : index
    %c0_85 = arith.constant 0 : index
    %c0_86 = arith.constant 0 : index
    %63 = vector.load %arg6[%c10, %c0_85, %c0_86] : memref<16x32x128xbf16, #tpu.memory_space<vmem>>, vector<1x32x128xbf16>
    %64 = vector.shape_cast %63 : vector<1x32x128xbf16> to vector<32x128xbf16>
    %cst_87 = arith.constant dense<0.000000e+00> : vector<8x128xf32>
    %65 = tpu.matmul %62, %64, %cst_87 {dimension_numbers = #tpu.dot_dimension_numbers<[1], [0], [0], [1], [0, 0, 1, 1], [], []>} : vector<8x32xbf16>, vector<32x128xbf16>, vector<8x128xf32> -> vector<8x128xf32>
    %66 = arith.addf %60, %65 : vector<8x128xf32>
    %c0_88 = arith.constant 0 : index
    %c0_89 = arith.constant 0 : index
    %c0_90 = arith.constant 0 : index
    %c3_91 = arith.constant 3 : index
    %c0_92 = arith.constant 0 : index
    %67 = vector.load %arg4[%c0_88, %c0_89, %c0_90, %c3_91, %c0_92] : memref<1x1x1x11x32xbf16, #tpu.memory_space<vmem>>, vector<1x1x1x8x32xbf16>
    %68 = vector.shape_cast %67 : vector<1x1x1x8x32xbf16> to vector<8x32xbf16>
    %c11 = arith.constant 11 : index
    %c0_93 = arith.constant 0 : index
    %c0_94 = arith.constant 0 : index
    %69 = vector.load %arg6[%c11, %c0_93, %c0_94] : memref<16x32x128xbf16, #tpu.memory_space<vmem>>, vector<1x32x128xbf16>
    %70 = vector.shape_cast %69 : vector<1x32x128xbf16> to vector<32x128xbf16>
    %cst_95 = arith.constant dense<0.000000e+00> : vector<8x128xf32>
    %71 = tpu.matmul %68, %70, %cst_95 {dimension_numbers = #tpu.dot_dimension_numbers<[1], [0], [0], [1], [0, 0, 1, 1], [], []>} : vector<8x32xbf16>, vector<32x128xbf16>, vector<8x128xf32> -> vector<8x128xf32>
    %72 = arith.addf %66, %71 : vector<8x128xf32>
    %c0_96 = arith.constant 0 : index
    %c0_97 = arith.constant 0 : index
    %c0_98 = arith.constant 0 : index
    %c0_99 = arith.constant 0 : index
    %c0_100 = arith.constant 0 : index
    %73 = vector.load %arg5[%c0_96, %c0_97, %c0_98, %c0_99, %c0_100] : memref<1x1x1x11x32xbf16, #tpu.memory_space<vmem>>, vector<1x1x1x8x32xbf16>
    %74 = vector.shape_cast %73 : vector<1x1x1x8x32xbf16> to vector<8x32xbf16>
    %c12 = arith.constant 12 : index
    %c0_101 = arith.constant 0 : index
    %c0_102 = arith.constant 0 : index
    %75 = vector.load %arg6[%c12, %c0_101, %c0_102] : memref<16x32x128xbf16, #tpu.memory_space<vmem>>, vector<1x32x128xbf16>
    %76 = vector.shape_cast %75 : vector<1x32x128xbf16> to vector<32x128xbf16>
    %cst_103 = arith.constant dense<0.000000e+00> : vector<8x128xf32>
    %77 = tpu.matmul %74, %76, %cst_103 {dimension_numbers = #tpu.dot_dimension_numbers<[1], [0], [0], [1], [0, 0, 1, 1], [], []>} : vector<8x32xbf16>, vector<32x128xbf16>, vector<8x128xf32> -> vector<8x128xf32>
    %78 = arith.addf %72, %77 : vector<8x128xf32>
    %c0_104 = arith.constant 0 : index
    %c0_105 = arith.constant 0 : index
    %c0_106 = arith.constant 0 : index
    %c1_107 = arith.constant 1 : index
    %c0_108 = arith.constant 0 : index
    %79 = vector.load %arg5[%c0_104, %c0_105, %c0_106, %c1_107, %c0_108] : memref<1x1x1x11x32xbf16, #tpu.memory_space<vmem>>, vector<1x1x1x8x32xbf16>
    %80 = vector.shape_cast %79 : vector<1x1x1x8x32xbf16> to vector<8x32xbf16>
    %c13 = arith.constant 13 : index
    %c0_109 = arith.constant 0 : index
    %c0_110 = arith.constant 0 : index
    %81 = vector.load %arg6[%c13, %c0_109, %c0_110] : memref<16x32x128xbf16, #tpu.memory_space<vmem>>, vector<1x32x128xbf16>
    %82 = vector.shape_cast %81 : vector<1x32x128xbf16> to vector<32x128xbf16>
    %cst_111 = arith.constant dense<0.000000e+00> : vector<8x128xf32>
    %83 = tpu.matmul %80, %82, %cst_111 {dimension_numbers = #tpu.dot_dimension_numbers<[1], [0], [0], [1], [0, 0, 1, 1], [], []>} : vector<8x32xbf16>, vector<32x128xbf16>, vector<8x128xf32> -> vector<8x128xf32>
    %84 = arith.addf %78, %83 : vector<8x128xf32>
    %c0_112 = arith.constant 0 : index
    %c0_113 = arith.constant 0 : index
    %c0_114 = arith.constant 0 : index
    %c2_115 = arith.constant 2 : index
    %c0_116 = arith.constant 0 : index
    %85 = vector.load %arg5[%c0_112, %c0_113, %c0_114, %c2_115, %c0_116] : memref<1x1x1x11x32xbf16, #tpu.memory_space<vmem>>, vector<1x1x1x8x32xbf16>
    %86 = vector.shape_cast %85 : vector<1x1x1x8x32xbf16> to vector<8x32xbf16>
    %c14 = arith.constant 14 : index
    %c0_117 = arith.constant 0 : index
    %c0_118 = arith.constant 0 : index
    %87 = vector.load %arg6[%c14, %c0_117, %c0_118] : memref<16x32x128xbf16, #tpu.memory_space<vmem>>, vector<1x32x128xbf16>
    %88 = vector.shape_cast %87 : vector<1x32x128xbf16> to vector<32x128xbf16>
    %cst_119 = arith.constant dense<0.000000e+00> : vector<8x128xf32>
    %89 = tpu.matmul %86, %88, %cst_119 {dimension_numbers = #tpu.dot_dimension_numbers<[1], [0], [0], [1], [0, 0, 1, 1], [], []>} : vector<8x32xbf16>, vector<32x128xbf16>, vector<8x128xf32> -> vector<8x128xf32>
    %90 = arith.addf %84, %89 : vector<8x128xf32>
    %c0_120 = arith.constant 0 : index
    %c0_121 = arith.constant 0 : index
    %c0_122 = arith.constant 0 : index
    %c3_123 = arith.constant 3 : index
    %c0_124 = arith.constant 0 : index
    %91 = vector.load %arg5[%c0_120, %c0_121, %c0_122, %c3_123, %c0_124] : memref<1x1x1x11x32xbf16, #tpu.memory_space<vmem>>, vector<1x1x1x8x32xbf16>
    %92 = vector.shape_cast %91 : vector<1x1x1x8x32xbf16> to vector<8x32xbf16>
    %c15 = arith.constant 15 : index
    %c0_125 = arith.constant 0 : index
    %c0_126 = arith.constant 0 : index
    %93 = vector.load %arg6[%c15, %c0_125, %c0_126] : memref<16x32x128xbf16, #tpu.memory_space<vmem>>, vector<1x32x128xbf16>
    %94 = vector.shape_cast %93 : vector<1x32x128xbf16> to vector<32x128xbf16>
    %cst_127 = arith.constant dense<0.000000e+00> : vector<8x128xf32>
    %95 = tpu.matmul %92, %94, %cst_127 {dimension_numbers = #tpu.dot_dimension_numbers<[1], [0], [0], [1], [0, 0, 1, 1], [], []>} : vector<8x32xbf16>, vector<32x128xbf16>, vector<8x128xf32> -> vector<8x128xf32>
    %96 = arith.addf %90, %95 : vector<8x128xf32>
    %c0_128 = arith.constant 0 : index
    %c0_129 = arith.constant 0 : index
    %97 = vector.load %arg7[%c0_128, %c0_129] : memref<1x128xf32, #tpu.memory_space<vmem>>, vector<1x128xf32>
    %98 = vector.broadcast %97 : vector<1x128xf32> to vector<8x128xf32>
    %99 = arith.addf %96, %98 : vector<8x128xf32>
    %c0_130 = arith.constant 0 : index
    %c0_131 = arith.constant 0 : index
    %c0_132 = arith.constant 0 : index
    %c0_133 = arith.constant 0 : index
    %100 = vector.load %arg8[%c0_130, %c0_131, %c0_132, %c0_133] : memref<1x1x8x128xf32, #tpu.memory_space<vmem>>, vector<1x1x8x128xf32>
    %101 = vector.shape_cast %100 : vector<1x1x8x128xf32> to vector<8x128xf32>
    %102 = vector.shape_cast %99 : vector<8x128xf32> to vector<1x1x8x128xf32>
    tpu.vector_store %arg8[%c0_130, %c0_131, %c0_132, %c0_133], %102 {strides = array<i32>} : memref<1x1x8x128xf32, #tpu.memory_space<vmem>>, vector<1x1x8x128xf32>,
    return
  }
  func.func @transform_0(%arg0: i32, %arg1: i32) -> (i32, i32, i32, i32, i32) {
    %c1_i32 = arith.constant 1 : i32
    %0 = arith.muli %c1_i32, %arg1 : i32
    %c0_i32 = arith.constant 0 : i32
    %1 = arith.addi %0, %c0_i32 : i32
    %c0_i32_0 = arith.constant 0 : i32
    %c0_i32_1 = arith.constant 0 : i32
    %c0_i32_2 = arith.constant 0 : i32
    %c0_i32_3 = arith.constant 0 : i32
    return %arg0, %1, %c0_i32_0, %c0_i32_1, %c0_i32_2 : i32, i32, i32, i32, i32
  }
  func.func @transform_1(%arg0: i32, %arg1: i32) -> (i32, i32, i32, i32, i32) {
    %c1_i32 = arith.constant 1 : i32
    %0 = arith.muli %c1_i32, %arg1 : i32
    %c1_i32_0 = arith.constant 1 : i32
    %1 = arith.addi %0, %c1_i32_0 : i32
    %c0_i32 = arith.constant 0 : i32
    %c0_i32_1 = arith.constant 0 : i32
    %c0_i32_2 = arith.constant 0 : i32
    %c0_i32_3 = arith.constant 0 : i32
    return %arg0, %1, %c0_i32, %c0_i32_1, %c0_i32_2 : i32, i32, i32, i32, i32
  }
  func.func @transform_2(%arg0: i32, %arg1: i32) -> (i32, i32, i32, i32, i32) {
    %c1_i32 = arith.constant 1 : i32
    %0 = arith.muli %c1_i32, %arg1 : i32
    %c2_i32 = arith.constant 2 : i32
    %1 = arith.addi %0, %c2_i32 : i32
    %c0_i32 = arith.constant 0 : i32
    %c0_i32_0 = arith.constant 0 : i32
    %c0_i32_1 = arith.constant 0 : i32
    %c0_i32_2 = arith.constant 0 : i32
    return %arg0, %1, %c0_i32, %c0_i32_0, %c0_i32_1 : i32, i32, i32, i32, i32
  }
  func.func @transform_3(%arg0: i32, %arg1: i32) -> (i32, i32, i32, i32, i32) {
    %c1_i32 = arith.constant 1 : i32
    %0 = arith.muli %c1_i32, %arg1 : i32
    %c3_i32 = arith.constant 3 : i32
    %1 = arith.addi %0, %c3_i32 : i32
    %c0_i32 = arith.constant 0 : i32
    %c0_i32_0 = arith.constant 0 : i32
    %c0_i32_1 = arith.constant 0 : i32
    %c0_i32_2 = arith.constant 0 : i32
    return %arg0, %1, %c0_i32, %c0_i32_0, %c0_i32_1 : i32, i32, i32, i32, i32
  }
  func.func @transform_4(%arg0: i32, %arg1: i32) -> (i32, i32, i32) {
    %c0_i32 = arith.constant 0 : i32
    %c0_i32_0 = arith.constant 0 : i32
    %c0_i32_1 = arith.constant 0 : i32
    %c0_i32_2 = arith.constant 0 : i32
    return %c0_i32, %c0_i32_0, %c0_i32_1 : i32, i32, i32
  }
  func.func @transform_5(%arg0: i32, %arg1: i32) -> (i32, i32) {
    %c0_i32 = arith.constant 0 : i32
    %c0_i32_0 = arith.constant 0 : i32
    %c0_i32_1 = arith.constant 0 : i32
    return %c0_i32, %c0_i32_0 : i32, i32
  }
  func.func @transform_6(%arg0: i32, %arg1: i32) -> (i32, i32, i32, i32) {
    %c0_i32 = arith.constant 0 : i32
    %c0_i32_0 = arith.constant 0 : i32
    %c0_i32_1 = arith.constant 0 : i32
    return %arg0, %arg1, %c0_i32, %c0_i32_0 : i32, i32, i32, i32
  }
}

</mosaic_0001>

<bundles_post_ra>
// kernel: _lambda_.5
= control target key start
LH: loop header
LB: loop body
LE: loop exit
PB: predicated region body
PF: predicated region fallthrough
CT: control target
= control target key end

     0   :  { %s1957_s21 = smov 0   ;;  %s1959_s22 = smov 0   ;;  %s2170_s0 = inlined_call_operand.vmem [shape: bf16[2,18,2,9,16], index: 0, kind: input, shape index: {}, may-alias: {0,1,2,3}]   ;;  %s2171_s1 = inlined_call_operand.vmem [shape: bf16[2,18,2,9,16], index: 1, kind: input, shape index: {}, may-alias: {0,1,2,3}]   ;;  %s2172_s2 = inlined_call_operand.vmem [shape: bf16[2,18,2,9,16], index: 2, kind: input, shape index: {}, may-alias: {0,1,2,3}]   ;;  %s2173_s3 = inlined_call_operand.vmem [shape: bf16[2,18,2,9,16], index: 3, kind: input, shape index: {}, may-alias: {0,1,2,3}]   ;;  %s2174_s4 = inlined_call_operand.vmem [shape: bf16[16,16,128], index: 4, kind: input, shape index: {}]   ;;  %s2175_s5 = inlined_call_operand.vmem [shape: f32[1,128], index: 5, kind: input, shape index: {}]   ;;  %s2176_s6 = inlined_call_operand.vmem [shape: bf16[2,8,8,128], index: 6, kind: output, shape index: {}]  }
   0x1   :  { %s1961_s23 = smov 0   ;;  %s1963_s24 = smov 0  }
   0x2   :  { %s1965_s25 = smov 0  }
   0x3 LB: > { %s25_s26 = sadd.s32 1, %s1910_s23  ;;  %s28_s27 = sadd.s32 1, %s1914_s24  ;;  %s1918_s25 = sphi %s1965_s25, %s16_s25   ;;  %s1914_s24 = sphi %s1963_s24, %s2180_s24   ;;  %s1910_s23 = sphi %s1961_s23, %s2179_s23   ;;  %s1906_s22 = sphi %s1959_s22, %s2178_s22   ;;  %s1902_s21 = sphi %s1957_s21, %s2177_s21  }
   0x4   : > { %p26_p0 = scmp.ge.s32.totalorder %s25_s26, 8  ;;  %p1585_p1 = scmp.ge.s32.totalorder %s1918_s25, 1 }
   0x5   : > { %p308_p2 = scmp.lt.s32.totalorder %s1918_s25, 17 }
   0x6   : > { %s2182_s26 = smov (%p26_p0, %s25_s26), 0  ;;  %s2184_s27 = smov (!%p26_p0, %s28_s27), %s1914_s24 }
   0x7   : > { %p309_p3 = pnand %p1585_p1, %p308_p2  ;;  %p30_p4 = scmp.ge.s32.totalorder %s2184_s27, 2 }
   0x8   : > { %v1856_v0 = vld [vmem:[%s2174_s4 + $0x8] sm:$0xff] (!%p309_p3)   ;;  %v1920_v1 = vmov (!%p309_p3), 0.0   ;;  %v1857_v2 = vld [vmem:[%s2174_s4] sm:$0xff] (!%p309_p3)   ;;  %vm1921_vm0 = vmmov (!%p309_p3), 0   ;;  %s2000_s8 = sshll.u32 (!%p309_p3), %s1902_s21, 1  ;;  %p380_p5 = scmp.lt.s32.totalorder (!%p309_p3), %s1906_s22, 1 }
   0x9   : > { %s2186_s27 = smov (%p30_p4, %s2184_s27), 0  ;;  %312 = sbr.rel (%p309_p3) target bundleno = 304 (0x130), region = 44 }
   0xa   : > { %1717 = vmatprep.subr.bf16.mxu0 (!%p309_p3), %v1920_v1  ;;  %1723 = vmatprep.subr.bf16.mxu1 (!%p309_p3), %v1920_v1  ;;  %p382_p6 = scmp.lt.s32.totalorder (!%p309_p3), %s2000_s8, 17  ;;  %s391_s11 = sadd.s32 (!%p309_p3), 1, %s2000_s8  ;;  %vm452_vm1 = vcmask (!%p309_p3), 130048   ;;  %v1858_v3 = vld [vmem:[%s2174_s4 + $0x10] sm:$0xff] (!%p309_p3)   ;;  %v1859_v4 = vld [vmem:[%s2174_s4 + $0x18] sm:$0xff] (!%p309_p3)   ;;  %v1862_v13 = vld [vmem:[%s2174_s4 + $0x20] sm:$0xff] (!%p309_p3)  }
   0xb   : > { %1718 = vmatpush3.bf16.msra.mxu0 (!%p309_p3), %v1856_v0  ;;  %1719 = vmatprep.mubr.msk.bf16.mxu0 (!%p309_p3), %vm1921_vm0, %v1920_v1  ;;  %p394_p7 = scmp.lt.s32.totalorder (!%p309_p3), %s391_s11, 17  ;;  %s404_s29 = sadd.s32 (!%p309_p3), 2, %s2000_s8  ;;  %v1863_v17 = vld [vmem:[%s2174_s4 + $0x28] sm:$0xff] (!%p309_p3)   ;;  %v1864_v23 = vld [vmem:[%s2174_s4 + $0x30] sm:$0xff] (!%p309_p3)   ;;  %v1865_v26 = vld [vmem:[%s2174_s4 + $0x38] sm:$0xff] (!%p309_p3)  }
   0xc   : > { %1724 = vmatpush3.bf16.msra.mxu1 (!%p309_p3), %v1857_v2  ;;  %1725 = vmatprep.mubr.msk.bf16.mxu1 (!%p309_p3), %vm1921_vm0, %v1920_v1  ;;  %p407_p8 = scmp.lt.s32.totalorder (!%p309_p3), %s404_s29, 17  ;;  %v1868_v33 = vld [vmem:[%s2174_s4 + $0x40] sm:$0xff] (!%p309_p3)   ;;  %v1869_v34 = vld [vmem:[%s2174_s4 + $0x48] sm:$0xff] (!%p309_p3)   ;;  %v1870_v39 = vld [vmem:[%s2174_s4 + $0x50] sm:$0xff] (!%p309_p3)   ;;  %p431_p10 = scmp.lt.s32.totalorder (!%p309_p3), %s1902_s21, 7 }
   0xd   : > { %1729 = vmatprep.subr.bf16.mxu0 (!%p309_p3), %v1920_v1  ;;  %1735 = vmatprep.subr.bf16.mxu1 (!%p309_p3), %v1920_v1  ;;  %v1871_v42 = vld [vmem:[%s2174_s4 + $0x58] sm:$0xff] (!%p309_p3)   ;;  %v1874_v49 = vld [vmem:[%s2174_s4 + $0x60] sm:$0xff] (!%p309_p3)   ;;  %v1875_v50 = vld [vmem:[%s2174_s4 + $0x68] sm:$0xff] (!%p309_p3)  }
   0xe   : > { %v1876_v55 = vld [vmem:[%s2174_s4 + $0x70] sm:$0xff] (!%p309_p3)   ;;  %v1877_v58 = vld [vmem:[%s2174_s4 + $0x78] sm:$0xff] (!%p309_p3)  }
  0x10   : > { %s2188_s22 = smov (!%p380_p5, %s1906_s22), 1  ;;  %s2190_s11 = smov (!%p394_p7, %s391_s11), 17 }
  0x11   : > { %s383_s9 = scalar_select %p382_p6, %s2000_s8, 17 }
  0x12   : > { %s2011_s10 = smul.u32 72, %s2188_s22  ;;  %s2192_s29 = smov (!%p407_p8, %s404_s29), 17 }
  0x13   : > { %s1587_s12 = sshll.u32 %s383_s9, 2  ;;  %s1590_s9 = sshll.u32 %s2190_s11, 2 }
  0x14   : > { %s386_s17 = sadd.s32 %s2011_s10, %s1587_s12  ;;  %s398_s12 = sadd.s32 %s2011_s10, %s1590_s9 }
  0x15   : > { %s1588_s18 = sshll.u32 %s386_s17, 2  ;;  %s1591_s13 = sshll.u32 %s398_s12, 2 }
  0x16   : > { %s388_s28 = scalar_lea.vmem %s2170_s0, %s1588_s18  ;;  %s400_s18 = scalar_lea.vmem %s2171_s1, %s1591_s13 }
  0x17   : > { %v1600_v5 = vld [vmem:[%s388_s28 + $0x8] sm:$0xf]  ;;  %v438_v6 = vld [vmem:[%s388_s28] sm:$0xf]  ;;  %s417_s11 = sadd.s32 3, %s2000_s8  ;;  %s1593_s19 = sshll.u32 %s2192_s29, 2 }
  0x18   : > { %1720 = vmatmul.mubr.msk.bf16.vlgmr.msra.gmra.mrb[0].mxu0 %vm452_vm1, %v1600_v5  ;;  %1726 = vmatmul.mubr.msk.bf16.vlgmr.msra.gmra.mrb[0].mxu1 %vm452_vm1, %v438_v6  ;;  %v1860_v7 = vld [vmem:[%s388_s28] sm:$0x1f]   ;;  %v1861_v8 = vld [vmem:[%s388_s28 + $0x8] sm:$0x1f]   ;;  %s411_s20 = sadd.s32 %s2011_s10, %s1593_s19  ;;  %p420_p9 = scmp.lt.s32.totalorder %s417_s11, 17 }
  0x19   : > { %1730 = vmatpush3.bf16.msra.mxu0 %v1858_v3  ;;  %1736 = vmatpush3.bf16.msra.mxu1 %v1859_v4  ;;  %v556_v9 = vshrl.u32 %v1860_v7, 16  ;;  %v558_v10 = vshll.u32 %v1860_v7, 16  ;;  %v623_v11 = vshrl.u32 %v1861_v8, 16  ;;  %v625_v12 = vshll.u32 %v1861_v8, 16  ;;  %v1866_v19 = vld [vmem:[%s400_s18] sm:$0x1f]  }
  0x1a   : > { %1731 = vmatprep.mubr.msk.bf16.mxu0 %vm1921_vm0, %v1920_v1  ;;  %1737 = vmatprep.mubr.msk.bf16.mxu1 %vm1921_vm0, %v1920_v1  ;;  %v1867_v20 = vld [vmem:[%s400_s18 + $0x8] sm:$0x1f]   ;;  %v801_v21 = vshll.u32 %v1866_v19, 16  ;;  %v679_v22 = vld [vmem:[%s400_s18] sm:$0xf]  ;;  %s1594_s7 = sshll.u32 %s411_s20, 2 }
  0x1b   : > { %1741 = vmatprep.subr.bf16.mxu0 %v1920_v1  ;;  %1747 = vmatprep.subr.bf16.mxu1 %v1920_v1  ;;  %v560_v14 = vrot.slane %v558_v10, 1  ;;  %v627_v15 = vrot.slane %v625_v12, 1  ;;  %v868_v24 = vshll.u32 %v1867_v20, 16  ;;  %v1623_v25 = vld [vmem:[%s400_s18 + $0x8] sm:$0xf]  ;;  %s2066_s29 = scalar_lea.vmem %s2172_s2, %s1594_s7  ;;  %v799_v27 = vshrl.u32 %v1866_v19, 16 }
  0x1c   : > { %v803_v28 = vrot.slane %v801_v21, 1  ;;  %v866_v29 = vshrl.u32 %v1867_v20, 16  ;;  %s2194_s11 = smov (!%p420_p9, %s417_s11), 17  ;;  %v1872_v35 = vld [vmem:[%s2066_s29] sm:$0x1f]   ;;  %s2196_s21 = smov (!%p431_p10, %s1902_s21), 7 }
  0x1d   : > { %v561_v16 = vor.u32 %v560_v14, %v556_v9  ;;  %v628_v18 = vor.u32 %v627_v15, %v623_v11  ;;  %v870_v30 = vrot.slane %v868_v24, 1  ;;  %s1596_s14 = sshll.u32 %s2194_s11, 2  ;;  %v1873_v36 = vld [vmem:[%s2066_s29 + $0x8] sm:$0x1f]   ;;  %v1044_v37 = vshll.u32 %v1872_v35, 16  ;;  %s1598_s19 = sshll.u32 %s2188_s22, 3 }
  0x1e   : > { %v804_v31 = vor.u32 %v803_v28, %v799_v27  ;;  %s424_s15 = sadd.s32 %s2011_s10, %s1596_s14  ;;  %v922_v38 = vld [vmem:[%s2066_s29] sm:$0xf]  ;;  %v1111_v40 = vshll.u32 %v1873_v36, 16  ;;  %v1644_v41 = vld [vmem:[%s2066_s29 + $0x8] sm:$0xf]  ;;  %v1042_v43 = vshrl.u32 %v1872_v35, 16  ;;  %s434_s30 = sadd.s32 %s1598_s19, %s2196_s21 }
  0x1f   : > { %v871_v32 = vor.u32 %v870_v30, %v866_v29  ;;  %s1597_s18 = sshll.u32 %s424_s15, 2  ;;  %v1046_v44 = vrot.slane %v1044_v37, 1  ;;  %v1109_v45 = vshrl.u32 %v1873_v36, 16 }
  0x20   : > { %1732 = vmatmul.mubr.msk.bf16.vlgmr.msra.gmra.mrb[4].mxu0 %vm452_vm1, %v561_v16  ;;  %1738 = vmatmul.mubr.msk.bf16.vlgmr.msra.gmra.mrb[4].mxu1 %vm452_vm1, %v628_v18  ;;  %s2086_s11 = scalar_lea.vmem %s2173_s3, %s1597_s18  ;;  %v1113_v46 = vrot.slane %v1111_v40, 1 }
  0x21   : > { %1742 = vmatpush3.bf16.msra.mxu0 %v1862_v13  ;;  %1748 = vmatpush3.bf16.msra.mxu1 %v1863_v17  ;;  %v1047_v47 = vor.u32 %v1046_v44, %v1042_v43  ;;  %v1878_v51 = vld [vmem:[%s2086_s11] sm:$0x1f]   ;;  %v1879_v52 = vld [vmem:[%s2086_s11 + $0x8] sm:$0x1f]  }
  0x22   : > { %1743 = vmatprep.mubr.msk.bf16.mxu0 %vm1921_vm0, %v1920_v1  ;;  %1749 = vmatprep.mubr.msk.bf16.mxu1 %vm1921_vm0, %v1920_v1  ;;  %v1114_v48 = vor.u32 %v1113_v46, %v1109_v45  ;;  %v1287_v53 = vshll.u32 %v1878_v51, 16  ;;  %v1165_v54 = vld [vmem:[%s2086_s11] sm:$0xf]  ;;  %v1354_v56 = vshll.u32 %v1879_v52, 16  ;;  %v1665_v57 = vld [vmem:[%s2086_s11 + $0x8] sm:$0xf] }
  0x23   : > { %1753 = vmatprep.subr.bf16.mxu0 %v1920_v1  ;;  %1759 = vmatprep.subr.bf16.mxu1 %v1920_v1  ;;  %v1285_v59 = vshrl.u32 %v1878_v51, 16  ;;  %v1352_v61 = vshrl.u32 %v1879_v52, 16  ;;  %s1599_s11 = sshll.u32 %s434_s30, 2 }
  0x24   : > { %v1289_v60 = vrot.slane %v1287_v53, 1  ;;  %v1356_v62 = vrot.slane %v1354_v56, 1  ;;  %s436_s7 = scalar_lea.vmem %s2176_s6, %s1599_s11 }
  0x26   : > { %v1290_v63 = vor.u32 %v1289_v60, %v1285_v59  ;;  %v1357_v0 = vor.u32 %v1356_v62, %v1352_v61 }
  0x28   : > { %1744 = vmatmul.mubr.msk.bf16.vlgmr.msra.gmra.mrb[8].mxu0 %vm452_vm1, %v679_v22  ;;  %1750 = vmatmul.mubr.msk.bf16.vlgmr.msra.gmra.mrb[8].mxu1 %vm452_vm1, %v1623_v25 }
  0x29   : > { %1754 = vmatpush3.bf16.msra.mxu0 %v1864_v23  ;;  %1760 = vmatpush3.bf16.msra.mxu1 %v1865_v26 }
  0x2a   : > { %1755 = vmatprep.mubr.msk.bf16.mxu0 %vm1921_vm0, %v1920_v1  ;;  %1761 = vmatprep.mubr.msk.bf16.mxu1 %vm1921_vm0, %v1920_v1 }
  0x2b   : > { %1765 = vmatprep.subr.bf16.mxu0 %v1920_v1  ;;  %1771 = vmatprep.subr.bf16.mxu1 %v1920_v1 }
  0x30   : > { %1756 = vmatmul.mubr.msk.bf16.vlgmr.msra.gmra.mrb[12].mxu0 %vm452_vm1, %v804_v31  ;;  %1762 = vmatmul.mubr.msk.bf16.vlgmr.msra.gmra.mrb[12].mxu1 %vm452_vm1, %v871_v32 }
  0x31   : > { %1766 = vmatpush3.bf16.msra.mxu0 %v1868_v33  ;;  %1772 = vmatpush3.bf16.msra.mxu1 %v1869_v34 }
  0x32   : > { %1767 = vmatprep.mubr.msk.bf16.mxu0 %vm1921_vm0, %v1920_v1  ;;  %1773 = vmatprep.mubr.msk.bf16.mxu1 %vm1921_vm0, %v1920_v1 }
  0x33   : > { %1777 = vmatprep.subr.bf16.mxu0 %v1920_v1  ;;  %1783 = vmatprep.subr.bf16.mxu1 %v1920_v1 }
  0x38   : > { %1768 = vmatmul.mubr.msk.bf16.vlgmr.msra.gmra.mrb[16].mxu0 %vm452_vm1, %v922_v38  ;;  %1774 = vmatmul.mubr.msk.bf16.vlgmr.msra.gmra.mrb[16].mxu1 %vm452_vm1, %v1644_v41 }
  0x39   : > { %1778 = vmatpush3.bf16.msra.mxu0 %v1870_v39  ;;  %1784 = vmatpush3.bf16.msra.mxu1 %v1871_v42 }
  0x3a   : > { %1779 = vmatprep.mubr.msk.bf16.mxu0 %vm1921_vm0, %v1920_v1  ;;  %1785 = vmatprep.mubr.msk.bf16.mxu1 %vm1921_vm0, %v1920_v1 }
  0x3b   : > { %1789 = vmatprep.subr.bf16.mxu0 %v1920_v1  ;;  %1795 = vmatprep.subr.bf16.mxu1 %v1920_v1 }
  0x40   : > { %1780 = vmatmul.mubr.msk.bf16.vlgmr.msra.gmra.mrb[20].mxu0 %vm452_vm1, %v1047_v47  ;;  %1786 = vmatmul.mubr.msk.bf16.vlgmr.msra.gmra.mrb[20].mxu1 %vm452_vm1, %v1114_v48 }
  0x41   : > { %1790 = vmatpush3.bf16.msra.mxu0 %v1874_v49  ;;  %1796 = vmatpush3.bf16.msra.mxu1 %v1875_v50 }
  0x42   : > { %1791 = vmatprep.mubr.msk.bf16.mxu0 %vm1921_vm0, %v1920_v1  ;;  %1797 = vmatprep.mubr.msk.bf16.mxu1 %vm1921_vm0, %v1920_v1 }
  0x43   : > { %1801 = vmatprep.subr.bf16.mxu0 %v1920_v1  ;;  %1807 = vmatprep.subr.bf16.mxu1 %v1920_v1 }
  0x48   : > { %1792 = vmatmul.mubr.msk.bf16.vlgmr.msra.gmra.mrb[24].mxu0 %vm452_vm1, %v1165_v54  ;;  %1798 = vmatmul.mubr.msk.bf16.vlgmr.msra.gmra.mrb[24].mxu1 %vm452_vm1, %v1665_v57 }
  0x49   : > { %1802 = vmatpush3.bf16.msra.mxu0 %v1876_v55  ;;  %1808 = vmatpush3.bf16.msra.mxu1 %v1877_v58 }
  0x4a   : > { %1803 = vmatprep.mubr.msk.bf16.mxu0 %vm1921_vm0, %v1920_v1  ;;  %1809 = vmatprep.mubr.msk.bf16.mxu1 %vm1921_vm0, %v1920_v1 }
  0x50   : > { %1804 = vmatmul.mubr.msk.bf16.vlgmr.msra.gmra.mrb[28].mxu0 %vm452_vm1, %v1290_v63  ;;  %1810 = vmatmul.mubr.msk.bf16.vlgmr.msra.gmra.mrb[28].mxu1 %vm452_vm1, %v1357_v0 }
  0xeb   : > { %v490_v2 = vpop.f32.mrb[0].mxu0  ;;  %v539_v3 = vpop.f32.mrb[0].mxu1 }
  0xec   : > { %v540_v4 = vadd.f32 %v539_v3, %v490_v2  ;;  %v1721_v5 = vpop.f32.mrb[1].mxu0  ;;  %v1727_v6 = vpop.f32.mrb[1].mxu1 }
  0xed   : > { %v493_v7 = vpop.f32.mrb[2].mxu0  ;;  %v542_v8 = vpop.f32.mrb[2].mxu1 }
  0xee   : > { %v1722_v9 = vpop.f32.mrb[3].mxu0  ;;  %v1728_v10 = vpop.f32.mrb[3].mxu1 }
  0xf3   : > { %v605_v11 = vpop.f32.mrb[4].mxu0  ;;  %v672_v13 = vpop.f32.mrb[4].mxu1 }
  0xf4   : > { %v611_v12 = vadd.f32 %v605_v11, %v540_v4  ;;  %v1733_v14 = vpop.f32.mrb[5].mxu0  ;;  %v1739_v1 = vpop.f32.mrb[5].mxu1  ;;  %v1682_v11 = vld [vmem:[%s2175_s5] ss:$0 sm:$0xff] }
  0xf5   : > { %v608_v15 = vpop.f32.mrb[6].mxu0  ;;  %v675_v17 = vpop.f32.mrb[6].mxu1 }
  0xf6   : > { %v678_v16 = vadd.f32 %v672_v13, %v611_v12  ;;  %v1734_v18 = vpop.f32.mrb[7].mxu0  ;;  %v1740_v19 = vpop.f32.mrb[7].mxu1 }
  0xfb   : > { %v726_v20 = vpop.f32.mrb[8].mxu0  ;;  %v781_v22 = vpop.f32.mrb[8].mxu1 }
  0xfc   : > { %v732_v21 = vadd.f32 %v726_v20, %v678_v16  ;;  %v1745_v23 = vpop.f32.mrb[9].mxu0  ;;  %v1751_v24 = vpop.f32.mrb[9].mxu1 }
  0xfd   : > { %v729_v25 = vpop.f32.mrb[10].mxu0  ;;  %v784_v27 = vpop.f32.mrb[10].mxu1 }
  0xfe   : > { %v787_v26 = vadd.f32 %v781_v22, %v732_v21  ;;  %v1746_v28 = vpop.f32.mrb[11].mxu0  ;;  %v1752_v29 = vpop.f32.mrb[11].mxu1 }
 0x103   : > { %v848_v30 = vpop.f32.mrb[12].mxu0  ;;  %v915_v32 = vpop.f32.mrb[12].mxu1 }
 0x104   : > { %v854_v31 = vadd.f32 %v848_v30, %v787_v26  ;;  %v1757_v33 = vpop.f32.mrb[13].mxu0  ;;  %v1763_v34 = vpop.f32.mrb[13].mxu1 }
 0x105   : > { %v851_v35 = vpop.f32.mrb[14].mxu0  ;;  %v918_v37 = vpop.f32.mrb[14].mxu1 }
 0x106   : > { %v921_v36 = vadd.f32 %v915_v32, %v854_v31  ;;  %v1758_v38 = vpop.f32.mrb[15].mxu0  ;;  %v1764_v39 = vpop.f32.mrb[15].mxu1 }
 0x10b   : > { %v969_v40 = vpop.f32.mrb[16].mxu0  ;;  %v1024_v42 = vpop.f32.mrb[16].mxu1 }
 0x10c   : > { %v975_v41 = vadd.f32 %v969_v40, %v921_v36  ;;  %v1769_v43 = vpop.f32.mrb[17].mxu0  ;;  %v1775_v44 = vpop.f32.mrb[17].mxu1 }
 0x10d   : > { %v972_v45 = vpop.f32.mrb[18].mxu0  ;;  %v1027_v47 = vpop.f32.mrb[18].mxu1 }
 0x10e   : > { %v1030_v46 = vadd.f32 %v1024_v42, %v975_v41  ;;  %v1770_v48 = vpop.f32.mrb[19].mxu0  ;;  %v1776_v49 = vpop.f32.mrb[19].mxu1 }
 0x113   : > { %v1091_v50 = vpop.f32.mrb[20].mxu0  ;;  %v1158_v52 = vpop.f32.mrb[20].mxu1 }
 0x114   : > { %v1097_v51 = vadd.f32 %v1091_v50, %v1030_v46  ;;  %v1781_v53 = vpop.f32.mrb[21].mxu0  ;;  %v1787_v54 = vpop.f32.mrb[21].mxu1 }
 0x115   : > { %v1094_v55 = vpop.f32.mrb[22].mxu0  ;;  %v1161_v57 = vpop.f32.mrb[22].mxu1 }
 0x116   : > { %v1164_v56 = vadd.f32 %v1158_v52, %v1097_v51  ;;  %v1782_v58 = vpop.f32.mrb[23].mxu0  ;;  %v1788_v59 = vpop.f32.mrb[23].mxu1 }
 0x11b   : > { %v1212_v60 = vpop.f32.mrb[24].mxu0  ;;  %v1267_v62 = vpop.f32.mrb[24].mxu1 }
 0x11c   : > { %v1218_v61 = vadd.f32 %v1212_v60, %v1164_v56  ;;  %v1793_v63 = vpop.f32.mrb[25].mxu0  ;;  %v1799_v0 = vpop.f32.mrb[25].mxu1 }
 0x11d   : > { %v1215_v2 = vpop.f32.mrb[26].mxu0  ;;  %v1270_v4 = vpop.f32.mrb[26].mxu1 }
 0x11e   : > { %v1273_v3 = vadd.f32 %v1267_v62, %v1218_v61  ;;  %v1794_v5 = vpop.f32.mrb[27].mxu0  ;;  %v1800_v6 = vpop.f32.mrb[27].mxu1 }
 0x123   : > { %v1334_v7 = vpop.f32.mrb[28].mxu0  ;;  %v1401_v9 = vpop.f32.mrb[28].mxu1 }
 0x124   : > { %v1340_v8 = vadd.f32 %v1334_v7, %v1273_v3  ;;  %v1805_v10 = vpop.f32.mrb[29].mxu0  ;;  %v1811_v12 = vpop.f32.mrb[29].mxu1 }
 0x125   : > { %v1337_v13 = vpop.f32.mrb[30].mxu0  ;;  %v1404_v1 = vpop.f32.mrb[30].mxu1 }
 0x126   : > { %v1407_v14 = vadd.f32 %v1401_v9, %v1340_v8  ;;  %v1806_v15 = vpop.f32.mrb[31].mxu0  ;;  %v1812_v16 = vpop.f32.mrb[31].mxu1 }
 0x128   : > { %v1415_v17 = vadd.f32 %v1682_v11, %v1407_v14 }
 0x12a   : > { %vm1416_vm2 = vcmp.ge.f32.partialorder %v1415_v17, 0.0  ;;  %v1417_v18 = vmul.f32 0.2, %v1415_v17 }
 0x12c   : > { %v1418_v19 = vsel %vm1416_vm2, %v1415_v17, %v1417_v18 }
 0x12d   : > { %v1419_v20 = vpack.c.bf16 %v1418_v19, %v1418_v19 }
 0x12f   : > { %1420 = vst [vmem:[%s436_s7] sm:$0xf] %v1419_v20 }
 0x130 PF: > { %s16_s25 = sadd.s32 1, %s1918_s25   ;;  %s2177_s21 = smov %s1910_s23 }
 0x131   : > { %p13_p11 = scmp.ge.s32.totalorder %s16_s25, 18   ;;  %s2178_s22 = smov %s1914_s24 }
 0x132   : > { %s2179_s23 = smov %s2182_s26  ;;  %s2180_s24 = smov %s2186_s27 }
 0x133   :  { %15 = sbr.rel (!%p13_p11) target bundleno = 3 (0x3), region = 102 }

// kernel: _lambda_.6
= control target key start
LH: loop header
LB: loop body
LE: loop exit
PB: predicated region body
PF: predicated region fallthrough
CT: control target
= control target key end

     0   :  { %s1957_s21 = smov 0   ;;  %s1959_s22 = smov 0   ;;  %s2170_s0 = inlined_call_operand.vmem [shape: bf16[2,10,2,9,16], index: 0, kind: input, shape index: {}, may-alias: {0,1,2,3}]   ;;  %s2171_s1 = inlined_call_operand.vmem [shape: bf16[2,10,2,9,16], index: 1, kind: input, shape index: {}, may-alias: {0,1,2,3}]   ;;  %s2172_s2 = inlined_call_operand.vmem [shape: bf16[2,10,2,9,16], index: 2, kind: input, shape index: {}, may-alias: {0,1,2,3}]   ;;  %s2173_s3 = inlined_call_operand.vmem [shape: bf16[2,10,2,9,16], index: 3, kind: input, shape index: {}, may-alias: {0,1,2,3}]   ;;  %s2174_s4 = inlined_call_operand.vmem [shape: bf16[16,16,128], index: 4, kind: input, shape index: {}]   ;;  %s2175_s5 = inlined_call_operand.vmem [shape: f32[1,128], index: 5, kind: input, shape index: {}]   ;;  %s2176_s6 = inlined_call_operand.vmem [shape: bf16[2,4,8,128], index: 6, kind: output, shape index: {}]  }
   0x1   :  { %s1961_s23 = smov 0   ;;  %s1963_s24 = smov 0  }
   0x2   :  { %s1965_s25 = smov 0  }
   0x3 LB: > { %s25_s26 = sadd.s32 1, %s1910_s23  ;;  %s28_s27 = sadd.s32 1, %s1914_s24  ;;  %s1918_s25 = sphi %s1965_s25, %s16_s25   ;;  %s1914_s24 = sphi %s1963_s24, %s2180_s24   ;;  %s1910_s23 = sphi %s1961_s23, %s2179_s23   ;;  %s1906_s22 = sphi %s1959_s22, %s2178_s22   ;;  %s1902_s21 = sphi %s1957_s21, %s2177_s21  }
   0x4   : > { %p26_p0 = scmp.ge.s32.totalorder %s25_s26, 4  ;;  %p1585_p1 = scmp.ge.s32.totalorder %s1918_s25, 1 }
   0x5   : > { %p308_p2 = scmp.lt.s32.totalorder %s1918_s25, 9 }
   0x6   : > { %s2182_s26 = smov (%p26_p0, %s25_s26), 0  ;;  %s2184_s27 = smov (!%p26_p0, %s28_s27), %s1914_s24 }
   0x7   : > { %p309_p3 = pnand %p1585_p1, %p308_p2  ;;  %p30_p4 = scmp.ge.s32.totalorder %s2184_s27, 2 }
   0x8   : > { %v1856_v0 = vld [vmem:[%s2174_s4 + $0x8] sm:$0xff] (!%p309_p3)   ;;  %v1920_v1 = vmov (!%p309_p3), 0.0   ;;  %v1857_v2 = vld [vmem:[%s2174_s4] sm:$0xff] (!%p309_p3)   ;;  %vm1921_vm0 = vmmov (!%p309_p3), 0   ;;  %s2000_s8 = sshll.u32 (!%p309_p3), %s1902_s21, 1  ;;  %p380_p5 = scmp.lt.s32.totalorder (!%p309_p3), %s1906_s22, 1 }
   0x9   : > { %s2186_s27 = smov (%p30_p4, %s2184_s27), 0  ;;  %312 = sbr.rel (%p309_p3) target bundleno = 304 (0x130), region = 44 }
   0xa   : > { %1717 = vmatprep.subr.bf16.mxu0 (!%p309_p3), %v1920_v1  ;;  %1723 = vmatprep.subr.bf16.mxu1 (!%p309_p3), %v1920_v1  ;;  %p382_p6 = scmp.lt.s32.totalorder (!%p309_p3), %s2000_s8, 9  ;;  %s391_s11 = sadd.s32 (!%p309_p3), 1, %s2000_s8  ;;  %vm452_vm1 = vcmask (!%p309_p3), 130048   ;;  %v1858_v3 = vld [vmem:[%s2174_s4 + $0x10] sm:$0xff] (!%p309_p3)   ;;  %v1859_v4 = vld [vmem:[%s2174_s4 + $0x18] sm:$0xff] (!%p309_p3)   ;;  %v1862_v13 = vld [vmem:[%s2174_s4 + $0x20] sm:$0xff] (!%p309_p3)  }
   0xb   : > { %1718 = vmatpush3.bf16.msra.mxu0 (!%p309_p3), %v1856_v0  ;;  %1719 = vmatprep.mubr.msk.bf16.mxu0 (!%p309_p3), %vm1921_vm0, %v1920_v1  ;;  %p394_p7 = scmp.lt.s32.totalorder (!%p309_p3), %s391_s11, 9  ;;  %s404_s29 = sadd.s32 (!%p309_p3), 2, %s2000_s8  ;;  %v1863_v17 = vld [vmem:[%s2174_s4 + $0x28] sm:$0xff] (!%p309_p3)   ;;  %v1864_v23 = vld [vmem:[%s2174_s4 + $0x30] sm:$0xff] (!%p309_p3)   ;;  %v1865_v26 = vld [vmem:[%s2174_s4 + $0x38] sm:$0xff] (!%p309_p3)  }
   0xc   : > { %1724 = vmatpush3.bf16.msra.mxu1 (!%p309_p3), %v1857_v2  ;;  %1725 = vmatprep.mubr.msk.bf16.mxu1 (!%p309_p3), %vm1921_vm0, %v1920_v1  ;;  %p407_p8 = scmp.lt.s32.totalorder (!%p309_p3), %s404_s29, 9  ;;  %v1868_v33 = vld [vmem:[%s2174_s4 + $0x40] sm:$0xff] (!%p309_p3)   ;;  %v1869_v34 = vld [vmem:[%s2174_s4 + $0x48] sm:$0xff] (!%p309_p3)   ;;  %v1870_v39 = vld [vmem:[%s2174_s4 + $0x50] sm:$0xff] (!%p309_p3)   ;;  %p431_p10 = scmp.lt.s32.totalorder (!%p309_p3), %s1902_s21, 3 }
   0xd   : > { %1729 = vmatprep.subr.bf16.mxu0 (!%p309_p3), %v1920_v1  ;;  %1735 = vmatprep.subr.bf16.mxu1 (!%p309_p3), %v1920_v1  ;;  %v1871_v42 = vld [vmem:[%s2174_s4 + $0x58] sm:$0xff] (!%p309_p3)   ;;  %v1874_v49 = vld [vmem:[%s2174_s4 + $0x60] sm:$0xff] (!%p309_p3)   ;;  %v1875_v50 = vld [vmem:[%s2174_s4 + $0x68] sm:$0xff] (!%p309_p3)  }
   0xe   : > { %v1876_v55 = vld [vmem:[%s2174_s4 + $0x70] sm:$0xff] (!%p309_p3)   ;;  %v1877_v58 = vld [vmem:[%s2174_s4 + $0x78] sm:$0xff] (!%p309_p3)  }
  0x10   : > { %s2188_s22 = smov (!%p380_p5, %s1906_s22), 1  ;;  %s2190_s11 = smov (!%p394_p7, %s391_s11), 9 }
  0x11   : > { %s383_s9 = scalar_select %p382_p6, %s2000_s8, 9 }
  0x12   : > { %s2011_s10 = smul.u32 40, %s2188_s22  ;;  %s2192_s29 = smov (!%p407_p8, %s404_s29), 9 }
  0x13   : > { %s1587_s12 = sshll.u32 %s383_s9, 2  ;;  %s1590_s9 = sshll.u32 %s2190_s11, 2 }
  0x14   : > { %s386_s17 = sadd.s32 %s2011_s10, %s1587_s12  ;;  %s398_s12 = sadd.s32 %s2011_s10, %s1590_s9 }
  0x15   : > { %s1588_s18 = sshll.u32 %s386_s17, 2  ;;  %s1591_s13 = sshll.u32 %s398_s12, 2 }
  0x16   : > { %s388_s28 = scalar_lea.vmem %s2170_s0, %s1588_s18  ;;  %s400_s18 = scalar_lea.vmem %s2171_s1, %s1591_s13 }
  0x17   : > { %v1600_v5 = vld [vmem:[%s388_s28 + $0x8] sm:$0xf]  ;;  %v438_v6 = vld [vmem:[%s388_s28] sm:$0xf]  ;;  %s417_s11 = sadd.s32 3, %s2000_s8  ;;  %s1593_s19 = sshll.u32 %s2192_s29, 2 }
  0x18   : > { %1720 = vmatmul.mubr.msk.bf16.vlgmr.msra.gmra.mrb[0].mxu0 %vm452_vm1, %v1600_v5  ;;  %1726 = vmatmul.mubr.msk.bf16.vlgmr.msra.gmra.mrb[0].mxu1 %vm452_vm1, %v438_v6  ;;  %v1860_v7 = vld [vmem:[%s388_s28] sm:$0x1f]   ;;  %v1861_v8 = vld [vmem:[%s388_s28 + $0x8] sm:$0x1f]   ;;  %s411_s20 = sadd.s32 %s2011_s10, %s1593_s19  ;;  %p420_p9 = scmp.lt.s32.totalorder %s417_s11, 9 }
  0x19   : > { %1730 = vmatpush3.bf16.msra.mxu0 %v1858_v3  ;;  %1736 = vmatpush3.bf16.msra.mxu1 %v1859_v4  ;;  %v556_v9 = vshrl.u32 %v1860_v7, 16  ;;  %v558_v10 = vshll.u32 %v1860_v7, 16  ;;  %v623_v11 = vshrl.u32 %v1861_v8, 16  ;;  %v625_v12 = vshll.u32 %v1861_v8, 16  ;;  %v1866_v19 = vld [vmem:[%s400_s18] sm:$0x1f]  }
  0x1a   : > { %1731 = vmatprep.mubr.msk.bf16.mxu0 %vm1921_vm0, %v1920_v1  ;;  %1737 = vmatprep.mubr.msk.bf16.mxu1 %vm1921_vm0, %v1920_v1  ;;  %v1867_v20 = vld [vmem:[%s400_s18 + $0x8] sm:$0x1f]   ;;  %v801_v21 = vshll.u32 %v1866_v19, 16  ;;  %v679_v22 = vld [vmem:[%s400_s18] sm:$0xf]  ;;  %s1594_s7 = sshll.u32 %s411_s20, 2 }
  0x1b   : > { %1741 = vmatprep.subr.bf16.mxu0 %v1920_v1  ;;  %1747 = vmatprep.subr.bf16.mxu1 %v1920_v1  ;;  %v560_v14 = vrot.slane %v558_v10, 1  ;;  %v627_v15 = vrot.slane %v625_v12, 1  ;;  %v868_v24 = vshll.u32 %v1867_v20, 16  ;;  %v1623_v25 = vld [vmem:[%s400_s18 + $0x8] sm:$0xf]  ;;  %s2066_s29 = scalar_lea.vmem %s2172_s2, %s1594_s7  ;;  %v799_v27 = vshrl.u32 %v1866_v19, 16 }
  0x1c   : > { %v803_v28 = vrot.slane %v801_v21, 1  ;;  %v866_v29 = vshrl.u32 %v1867_v20, 16  ;;  %s2194_s11 = smov (!%p420_p9, %s417_s11), 9  ;;  %v1872_v35 = vld [vmem:[%s2066_s29] sm:$0x1f]   ;;  %s2196_s21 = smov (!%p431_p10, %s1902_s21), 3 }
  0x1d   : > { %v561_v16 = vor.u32 %v560_v14, %v556_v9  ;;  %v628_v18 = vor.u32 %v627_v15, %v623_v11  ;;  %v870_v30 = vrot.slane %v868_v24, 1  ;;  %s1596_s14 = sshll.u32 %s2194_s11, 2  ;;  %v1873_v36 = vld [vmem:[%s2066_s29 + $0x8] sm:$0x1f]   ;;  %v1044_v37 = vshll.u32 %v1872_v35, 16  ;;  %s1598_s19 = sshll.u32 %s2188_s22, 2 }
  0x1e   : > { %v804_v31 = vor.u32 %v803_v28, %v799_v27  ;;  %s424_s15 = sadd.s32 %s2011_s10, %s1596_s14  ;;  %v922_v38 = vld [vmem:[%s2066_s29] sm:$0xf]  ;;  %v1111_v40 = vshll.u32 %v1873_v36, 16  ;;  %v1644_v41 = vld [vmem:[%s2066_s29 + $0x8] sm:$0xf]  ;;  %v1042_v43 = vshrl.u32 %v1872_v35, 16  ;;  %s434_s30 = sadd.s32 %s1598_s19, %s2196_s21 }
  0x1f   : > { %v871_v32 = vor.u32 %v870_v30, %v866_v29  ;;  %s1597_s18 = sshll.u32 %s424_s15, 2  ;;  %v1046_v44 = vrot.slane %v1044_v37, 1  ;;  %v1109_v45 = vshrl.u32 %v1873_v36, 16 }
  0x20   : > { %1732 = vmatmul.mubr.msk.bf16.vlgmr.msra.gmra.mrb[4].mxu0 %vm452_vm1, %v561_v16  ;;  %1738 = vmatmul.mubr.msk.bf16.vlgmr.msra.gmra.mrb[4].mxu1 %vm452_vm1, %v628_v18  ;;  %s2086_s11 = scalar_lea.vmem %s2173_s3, %s1597_s18  ;;  %v1113_v46 = vrot.slane %v1111_v40, 1 }
  0x21   : > { %1742 = vmatpush3.bf16.msra.mxu0 %v1862_v13  ;;  %1748 = vmatpush3.bf16.msra.mxu1 %v1863_v17  ;;  %v1047_v47 = vor.u32 %v1046_v44, %v1042_v43  ;;  %v1878_v51 = vld [vmem:[%s2086_s11] sm:$0x1f]   ;;  %v1879_v52 = vld [vmem:[%s2086_s11 + $0x8] sm:$0x1f]  }
  0x22   : > { %1743 = vmatprep.mubr.msk.bf16.mxu0 %vm1921_vm0, %v1920_v1  ;;  %1749 = vmatprep.mubr.msk.bf16.mxu1 %vm1921_vm0, %v1920_v1  ;;  %v1114_v48 = vor.u32 %v1113_v46, %v1109_v45  ;;  %v1287_v53 = vshll.u32 %v1878_v51, 16  ;;  %v1165_v54 = vld [vmem:[%s2086_s11] sm:$0xf]  ;;  %v1354_v56 = vshll.u32 %v1879_v52, 16  ;;  %v1665_v57 = vld [vmem:[%s2086_s11 + $0x8] sm:$0xf] }
  0x23   : > { %1753 = vmatprep.subr.bf16.mxu0 %v1920_v1  ;;  %1759 = vmatprep.subr.bf16.mxu1 %v1920_v1  ;;  %v1285_v59 = vshrl.u32 %v1878_v51, 16  ;;  %v1352_v61 = vshrl.u32 %v1879_v52, 16  ;;  %s1599_s11 = sshll.u32 %s434_s30, 2 }
  0x24   : > { %v1289_v60 = vrot.slane %v1287_v53, 1  ;;  %v1356_v62 = vrot.slane %v1354_v56, 1  ;;  %s436_s7 = scalar_lea.vmem %s2176_s6, %s1599_s11 }
  0x26   : > { %v1290_v63 = vor.u32 %v1289_v60, %v1285_v59  ;;  %v1357_v0 = vor.u32 %v1356_v62, %v1352_v61 }
  0x28   : > { %1744 = vmatmul.mubr.msk.bf16.vlgmr.msra.gmra.mrb[8].mxu0 %vm452_vm1, %v679_v22  ;;  %1750 = vmatmul.mubr.msk.bf16.vlgmr.msra.gmra.mrb[8].mxu1 %vm452_vm1, %v1623_v25 }
  0x29   : > { %1754 = vmatpush3.bf16.msra.mxu0 %v1864_v23  ;;  %1760 = vmatpush3.bf16.msra.mxu1 %v1865_v26 }
  0x2a   : > { %1755 = vmatprep.mubr.msk.bf16.mxu0 %vm1921_vm0, %v1920_v1  ;;  %1761 = vmatprep.mubr.msk.bf16.mxu1 %vm1921_vm0, %v1920_v1 }
  0x2b   : > { %1765 = vmatprep.subr.bf16.mxu0 %v1920_v1  ;;  %1771 = vmatprep.subr.bf16.mxu1 %v1920_v1 }
  0x30   : > { %1756 = vmatmul.mubr.msk.bf16.vlgmr.msra.gmra.mrb[12].mxu0 %vm452_vm1, %v804_v31  ;;  %1762 = vmatmul.mubr.msk.bf16.vlgmr.msra.gmra.mrb[12].mxu1 %vm452_vm1, %v871_v32 }
  0x31   : > { %1766 = vmatpush3.bf16.msra.mxu0 %v1868_v33  ;;  %1772 = vmatpush3.bf16.msra.mxu1 %v1869_v34 }
  0x32   : > { %1767 = vmatprep.mubr.msk.bf16.mxu0 %vm1921_vm0, %v1920_v1  ;;  %1773 = vmatprep.mubr.msk.bf16.mxu1 %vm1921_vm0, %v1920_v1 }
  0x33   : > { %1777 = vmatprep.subr.bf16.mxu0 %v1920_v1  ;;  %1783 = vmatprep.subr.bf16.mxu1 %v1920_v1 }
  0x38   : > { %1768 = vmatmul.mubr.msk.bf16.vlgmr.msra.gmra.mrb[16].mxu0 %vm452_vm1, %v922_v38  ;;  %1774 = vmatmul.mubr.msk.bf16.vlgmr.msra.gmra.mrb[16].mxu1 %vm452_vm1, %v1644_v41 }
  0x39   : > { %1778 = vmatpush3.bf16.msra.mxu0 %v1870_v39  ;;  %1784 = vmatpush3.bf16.msra.mxu1 %v1871_v42 }
  0x3a   : > { %1779 = vmatprep.mubr.msk.bf16.mxu0 %vm1921_vm0, %v1920_v1  ;;  %1785 = vmatprep.mubr.msk.bf16.mxu1 %vm1921_vm0, %v1920_v1 }
  0x3b   : > { %1789 = vmatprep.subr.bf16.mxu0 %v1920_v1  ;;  %1795 = vmatprep.subr.bf16.mxu1 %v1920_v1 }
  0x40   : > { %1780 = vmatmul.mubr.msk.bf16.vlgmr.msra.gmra.mrb[20].mxu0 %vm452_vm1, %v1047_v47  ;;  %1786 = vmatmul.mubr.msk.bf16.vlgmr.msra.gmra.mrb[20].mxu1 %vm452_vm1, %v1114_v48 }
  0x41   : > { %1790 = vmatpush3.bf16.msra.mxu0 %v1874_v49  ;;  %1796 = vmatpush3.bf16.msra.mxu1 %v1875_v50 }
  0x42   : > { %1791 = vmatprep.mubr.msk.bf16.mxu0 %vm1921_vm0, %v1920_v1  ;;  %1797 = vmatprep.mubr.msk.bf16.mxu1 %vm1921_vm0, %v1920_v1 }
  0x43   : > { %1801 = vmatprep.subr.bf16.mxu0 %v1920_v1  ;;  %1807 = vmatprep.subr.bf16.mxu1 %v1920_v1 }
  0x48   : > { %1792 = vmatmul.mubr.msk.bf16.vlgmr.msra.gmra.mrb[24].mxu0 %vm452_vm1, %v1165_v54  ;;  %1798 = vmatmul.mubr.msk.bf16.vlgmr.msra.gmra.mrb[24].mxu1 %vm452_vm1, %v1665_v57 }
  0x49   : > { %1802 = vmatpush3.bf16.msra.mxu0 %v1876_v55  ;;  %1808 = vmatpush3.bf16.msra.mxu1 %v1877_v58 }
  0x4a   : > { %1803 = vmatprep.mubr.msk.bf16.mxu0 %vm1921_vm0, %v1920_v1  ;;  %1809 = vmatprep.mubr.msk.bf16.mxu1 %vm1921_vm0, %v1920_v1 }
  0x50   : > { %1804 = vmatmul.mubr.msk.bf16.vlgmr.msra.gmra.mrb[28].mxu0 %vm452_vm1, %v1290_v63  ;;  %1810 = vmatmul.mubr.msk.bf16.vlgmr.msra.gmra.mrb[28].mxu1 %vm452_vm1, %v1357_v0 }
  0xeb   : > { %v490_v2 = vpop.f32.mrb[0].mxu0  ;;  %v539_v3 = vpop.f32.mrb[0].mxu1 }
  0xec   : > { %v540_v4 = vadd.f32 %v539_v3, %v490_v2  ;;  %v1721_v5 = vpop.f32.mrb[1].mxu0  ;;  %v1727_v6 = vpop.f32.mrb[1].mxu1 }
  0xed   : > { %v493_v7 = vpop.f32.mrb[2].mxu0  ;;  %v542_v8 = vpop.f32.mrb[2].mxu1 }
  0xee   : > { %v1722_v9 = vpop.f32.mrb[3].mxu0  ;;  %v1728_v10 = vpop.f32.mrb[3].mxu1 }
  0xf3   : > { %v605_v11 = vpop.f32.mrb[4].mxu0  ;;  %v672_v13 = vpop.f32.mrb[4].mxu1 }
  0xf4   : > { %v611_v12 = vadd.f32 %v605_v11, %v540_v4  ;;  %v1733_v14 = vpop.f32.mrb[5].mxu0  ;;  %v1739_v1 = vpop.f32.mrb[5].mxu1  ;;  %v1682_v11 = vld [vmem:[%s2175_s5] ss:$0 sm:$0xff] }
  0xf5   : > { %v608_v15 = vpop.f32.mrb[6].mxu0  ;;  %v675_v17 = vpop.f32.mrb[6].mxu1 }
  0xf6   : > { %v678_v16 = vadd.f32 %v672_v13, %v611_v12  ;;  %v1734_v18 = vpop.f32.mrb[7].mxu0  ;;  %v1740_v19 = vpop.f32.mrb[7].mxu1 }
  0xfb   : > { %v726_v20 = vpop.f32.mrb[8].mxu0  ;;  %v781_v22 = vpop.f32.mrb[8].mxu1 }
  0xfc   : > { %v732_v21 = vadd.f32 %v726_v20, %v678_v16  ;;  %v1745_v23 = vpop.f32.mrb[9].mxu0  ;;  %v1751_v24 = vpop.f32.mrb[9].mxu1 }
  0xfd   : > { %v729_v25 = vpop.f32.mrb[10].mxu0  ;;  %v784_v27 = vpop.f32.mrb[10].mxu1 }
  0xfe   : > { %v787_v26 = vadd.f32 %v781_v22, %v732_v21  ;;  %v1746_v28 = vpop.f32.mrb[11].mxu0  ;;  %v1752_v29 = vpop.f32.mrb[11].mxu1 }
 0x103   : > { %v848_v30 = vpop.f32.mrb[12].mxu0  ;;  %v915_v32 = vpop.f32.mrb[12].mxu1 }
 0x104   : > { %v854_v31 = vadd.f32 %v848_v30, %v787_v26  ;;  %v1757_v33 = vpop.f32.mrb[13].mxu0  ;;  %v1763_v34 = vpop.f32.mrb[13].mxu1 }
 0x105   : > { %v851_v35 = vpop.f32.mrb[14].mxu0  ;;  %v918_v37 = vpop.f32.mrb[14].mxu1 }
 0x106   : > { %v921_v36 = vadd.f32 %v915_v32, %v854_v31  ;;  %v1758_v38 = vpop.f32.mrb[15].mxu0  ;;  %v1764_v39 = vpop.f32.mrb[15].mxu1 }
 0x10b   : > { %v969_v40 = vpop.f32.mrb[16].mxu0  ;;  %v1024_v42 = vpop.f32.mrb[16].mxu1 }
 0x10c   : > { %v975_v41 = vadd.f32 %v969_v40, %v921_v36  ;;  %v1769_v43 = vpop.f32.mrb[17].mxu0  ;;  %v1775_v44 = vpop.f32.mrb[17].mxu1 }
 0x10d   : > { %v972_v45 = vpop.f32.mrb[18].mxu0  ;;  %v1027_v47 = vpop.f32.mrb[18].mxu1 }
 0x10e   : > { %v1030_v46 = vadd.f32 %v1024_v42, %v975_v41  ;;  %v1770_v48 = vpop.f32.mrb[19].mxu0  ;;  %v1776_v49 = vpop.f32.mrb[19].mxu1 }
 0x113   : > { %v1091_v50 = vpop.f32.mrb[20].mxu0  ;;  %v1158_v52 = vpop.f32.mrb[20].mxu1 }
 0x114   : > { %v1097_v51 = vadd.f32 %v1091_v50, %v1030_v46  ;;  %v1781_v53 = vpop.f32.mrb[21].mxu0  ;;  %v1787_v54 = vpop.f32.mrb[21].mxu1 }
 0x115   : > { %v1094_v55 = vpop.f32.mrb[22].mxu0  ;;  %v1161_v57 = vpop.f32.mrb[22].mxu1 }
 0x116   : > { %v1164_v56 = vadd.f32 %v1158_v52, %v1097_v51  ;;  %v1782_v58 = vpop.f32.mrb[23].mxu0  ;;  %v1788_v59 = vpop.f32.mrb[23].mxu1 }
 0x11b   : > { %v1212_v60 = vpop.f32.mrb[24].mxu0  ;;  %v1267_v62 = vpop.f32.mrb[24].mxu1 }
 0x11c   : > { %v1218_v61 = vadd.f32 %v1212_v60, %v1164_v56  ;;  %v1793_v63 = vpop.f32.mrb[25].mxu0  ;;  %v1799_v0 = vpop.f32.mrb[25].mxu1 }
 0x11d   : > { %v1215_v2 = vpop.f32.mrb[26].mxu0  ;;  %v1270_v4 = vpop.f32.mrb[26].mxu1 }
 0x11e   : > { %v1273_v3 = vadd.f32 %v1267_v62, %v1218_v61  ;;  %v1794_v5 = vpop.f32.mrb[27].mxu0  ;;  %v1800_v6 = vpop.f32.mrb[27].mxu1 }
 0x123   : > { %v1334_v7 = vpop.f32.mrb[28].mxu0  ;;  %v1401_v9 = vpop.f32.mrb[28].mxu1 }
 0x124   : > { %v1340_v8 = vadd.f32 %v1334_v7, %v1273_v3  ;;  %v1805_v10 = vpop.f32.mrb[29].mxu0  ;;  %v1811_v12 = vpop.f32.mrb[29].mxu1 }
 0x125   : > { %v1337_v13 = vpop.f32.mrb[30].mxu0  ;;  %v1404_v1 = vpop.f32.mrb[30].mxu1 }
 0x126   : > { %v1407_v14 = vadd.f32 %v1401_v9, %v1340_v8  ;;  %v1806_v15 = vpop.f32.mrb[31].mxu0  ;;  %v1812_v16 = vpop.f32.mrb[31].mxu1 }
 0x128   : > { %v1415_v17 = vadd.f32 %v1682_v11, %v1407_v14 }
 0x12a   : > { %vm1416_vm2 = vcmp.ge.f32.partialorder %v1415_v17, 0.0  ;;  %v1417_v18 = vmul.f32 0.2, %v1415_v17 }
 0x12c   : > { %v1418_v19 = vsel %vm1416_vm2, %v1415_v17, %v1417_v18 }
 0x12d   : > { %v1419_v20 = vpack.c.bf16 %v1418_v19, %v1418_v19 }
 0x12f   : > { %1420 = vst [vmem:[%s436_s7] sm:$0xf] %v1419_v20 }
 0x130 PF: > { %s16_s25 = sadd.s32 1, %s1918_s25   ;;  %s2177_s21 = smov %s1910_s23 }
 0x131   : > { %p13_p11 = scmp.ge.s32.totalorder %s16_s25, 10   ;;  %s2178_s22 = smov %s1914_s24 }
 0x132   : > { %s2179_s23 = smov %s2182_s26  ;;  %s2180_s24 = smov %s2186_s27 }
 0x133   :  { %15 = sbr.rel (!%p13_p11) target bundleno = 3 (0x3), region = 102 }

// kernel: _lambda_.8
= control target key start
LH: loop header
LB: loop body
LE: loop exit
PB: predicated region body
PF: predicated region fallthrough
CT: control target
= control target key end

     0   :  { %s710_s24 = smov 0   ;;  %s756_s0 = inlined_call_operand.vmem [shape: bf16[32,32], index: 0, kind: input, shape index: {}]   ;;  %s757_s1 = inlined_call_operand.vmem [shape: bf16[1,32], index: 1, kind: input, shape index: {}]   ;;  %s758_s2 = inlined_call_operand.vmem [shape: bf16[1,32], index: 2, kind: input, shape index: {}]   ;;  %s759_s3 = inlined_call_operand.vmem [shape: bf16[32,128], index: 3, kind: input, shape index: {}]   ;;  %s760_s4 = inlined_call_operand.vmem [shape: bf16[32,128], index: 4, kind: input, shape index: {}]   ;;  %s761_s5 = inlined_call_operand.vmem [shape: f32[1,128], index: 5, kind: input, shape index: {}]   ;;  %s762_s6 = inlined_call_operand.vmem [shape: bf16[32,64], index: 6, kind: output, shape index: {0}]   ;;  %s763_s7 = inlined_call_operand.vmem [shape: bf16[32,128], index: 7, kind: output, shape index: {1}]  }
   0x1 LB: > { %s587_s25 = sadd.s32 4294967295, %s665_s24   ;;  %p591_p0 = scmp.ge.s32.totalorder %s665_s24, 1  ;;  %s665_s24 = sphi %s710_s24, %s18_s24  }
   0x2   : > { %p241_p1 = scmp.lt.s32.totalorder %s665_s24, 3 }
   0x4   : > { %p242_p2 = pnand %p591_p0, %p241_p1 }
   0x5   : > { %v655_v0 = vld [vmem:[%s760_s4] sm:$0xff] (!%p242_p2)   ;;  %v303_v1 = vlaneseq (!%p242_p2)  ;;  %v667_v2 = vmov (!%p242_p2), 0.0   ;;  %v657_v4 = vld [vmem:[%s760_s4 + $0x8] sm:$0xff] (!%p242_p2)   ;;  %vm668_vm0 = vmmov (!%p242_p2), 0   ;;  %s592_s9 = sshll.u32 (!%p242_p2), %s587_s25, 1  ;;  %vm339_vm1 = vcmask (!%p242_p2), 261120  }
   0x6   : > { %245 = sbr.rel (%p242_p2) target bundleno = 245 (0xf5), region = 44  ;;  %628 = vmatprep.subr.bf16.mxu0 (!%p242_p2), %v667_v2  ;;  %636 = vmatprep.subr.bf16.mxu1 (!%p242_p2), %v667_v2  ;;  %v656_v3 = vld [vmem:[%s759_s3] sm:$0xff] (!%p242_p2)   ;;  %v658_v5 = vld [vmem:[%s759_s3 + $0x8] sm:$0xff] (!%p242_p2)   ;;  %p279_p3 = scmp.lt.s32.totalorder (!%p242_p2), %s592_s9, 3  ;;  %vm350_vm2 = vcmask (!%p242_p2), 519168  }
   0x7   : > { %629 = vmatpush3.bf16.msra.mxu0 (!%p242_p2), %v655_v0  ;;  %632 = vmatprep.mubr.msk.bf16.mxu0 (!%p242_p2), %vm668_vm0, %v667_v2  ;;  %v304_v6 = vshrl.u32 (!%p242_p2), %v303_v1, 7  ;;  %v313_v7 = vld [vmem:[%s758_s2] sm:$0x1] (!%p242_p2)  ;;  %s669_s20 = smov (!%p242_p2), 32  }
   0x8   : > { %637 = vmatpush3.bf16.msra.mxu1 (!%p242_p2), %v656_v3  ;;  %630 = vmatprep.subr.bf16.mxu0 (!%p242_p2), %v667_v2  ;;  %v299_v8 = vld [vmem:[%s757_s1] sm:$0x1] (!%p242_p2)  ;;  %v315_v9 = vpack.i.b16 (!%p242_p2), %v313_v7, %v313_v7 }
   0x9   : > { %638 = vmatprep.subr.bf16.mxu1 (!%p242_p2), %v667_v2  ;;  %640 = vmatprep.mubr.msk.bf16.mxu1 (!%p242_p2), %vm668_vm0, %v667_v2  ;;  %v301_v10 = vpack.i.b16 (!%p242_p2), %v299_v8, %v299_v8  ;;  %v305_v11 = vsub.s32 (!%p242_p2), 0, %v304_v6  ;;  %v610_v30 = vld [vmem:[%s761_s5] ss:$0 sm:$0xff] (!%p242_p2) }
   0xb   : > { %631 = vmatpush3.bf16.msra.mxu0 (!%p242_p2), %v657_v4  ;;  %v320_v12 = vrot.slane (!%p242_p2), %v315_v9, %v305_v11  ;;  %v306_v13 = vrot.slane (!%p242_p2), %v301_v10, %v305_v11 }
   0xc   : > { %639 = vmatpush3.bf16.msra.mxu1 (!%p242_p2), %v658_v5 }
   0xd   : > { %s765_s9 = smov (!%p279_p3, %s592_s9), 3  ;;  %v599_v16 = vcombine.low %v320_v12, %v320_v12  ;;  %v598_v17 = vcombine.low %v306_v13, %v306_v13 }
   0xe   : > { %s736_s16 = sshll.u32 %s765_s9, 2 }
   0xf   : > { %s282_s19 = scalar_lea.vmem %s756_s0, %s736_s16  ;;  %s288_s23 = scalar_lea.vmem %s762_s6, %s736_s16 }
  0x10   : > { %v297_v14 = vld [vmem:[%s282_s19] sm:$0xf]  ;;  %v298_v15 = vld [vmem:[%s282_s19 + $0x4] sm:$0xf]  ;;  %s294_s29 = scalar_lea.vmem %s763_s7, %s736_s16 }
  0x11   : > { %v325_v18 = vmul.bf16 %v599_v16, %v297_v14  ;;  %v326_v19 = vmul.bf16 %v599_v16, %v298_v15  ;;  %v311_v20 = vmul.bf16 %v598_v17, %v297_v14  ;;  %v312_v21 = vmul.bf16 %v598_v17, %v298_v15 }
  0x13   : > { %v601_v22 = vcombine.low %v325_v18, %v326_v19  ;;  %v600_v23 = vcombine.low %v311_v20, %v312_v21 }
  0x15   : > { %633 = vmatmul.mubr.msk.bf16.vlgmr.msra.gmra.mrb[0].mxu0 %vm339_vm1, %v601_v22  ;;  %641 = vmatmul.mubr.msk.bf16.vlgmr.msra.gmra.mrb[0].mxu1 %vm339_vm1, %v600_v23 }
  0x16   : > { %337 = vrot.lane.b32.xlu0 %v601_v22, %s669_s20 }
  0x88   : > { %v338_v24 = vpop.permute.xlu0 %337 }
  0x89   : > { %v342_v25 = vsel %vm339_vm1, %v600_v23, %v338_v24 }
  0x8a   : > { %v602_v26 = vcombine.low %v342_v25, %v342_v25  ;;  %v603_v27 = vcombine.high %v342_v25, %v342_v25 }
  0x8c   : > { %351 = vst.msk [vmem:[%s288_s23] sm:$0xf] %vm350_vm2, %v602_v26  ;;  %352 = vst.msk [vmem:[%s288_s23 + $0x4] sm:$0xf] %vm350_vm2, %v603_v27 }
  0xe8   : > { %v410_v28 = vpop.f32.mrb[0].mxu0  ;;  %v465_v29 = vpop.f32.mrb[0].mxu1 }
  0xe9   : > { %v466_v31 = vadd.f32 %v465_v29, %v410_v28  ;;  %v634_v32 = vpop.f32.mrb[1].mxu0  ;;  %v642_v33 = vpop.f32.mrb[1].mxu1 }
  0xea   : > { %v413_v34 = vpop.f32.mrb[2].mxu0  ;;  %v468_v35 = vpop.f32.mrb[2].mxu1 }
  0xeb   : > { %v479_v36 = vadd.f32 %v610_v30, %v466_v31  ;;  %v469_v37 = vadd.f32 %v468_v35, %v413_v34  ;;  %v635_v38 = vpop.f32.mrb[3].mxu0  ;;  %v643_v39 = vpop.f32.mrb[3].mxu1 }
  0xed   : > { %v483_v40 = vmul.f32 0.2, %v479_v36  ;;  %v480_v41 = vadd.f32 %v610_v30, %v469_v37  ;;  %vm481_vm3 = vcmp.ge.f32.partialorder %v479_v36, 0.0 }
  0xef   : > { %vm482_vm4 = vcmp.ge.f32.partialorder %v480_v41, 0.0  ;;  %v484_v42 = vmul.f32 0.2, %v480_v41  ;;  %v485_v43 = vsel %vm481_vm3, %v479_v36, %v483_v40 }
  0xf1   : > { %v486_v44 = vsel %vm482_vm4, %v480_v41, %v484_v42 }
  0xf2   : > { %v620_v45 = vpack.c.bf16 %v486_v44, %v485_v43 }
  0xf4   : > { %621 = vst [vmem:[%s294_s29] sm:$0xff] %v620_v45  }
  0xf5 PF: > { %s18_s24 = sadd.s32 1, %s665_s24  }
  0xf6   : > { %p15_p4 = scmp.ge.s32.totalorder %s18_s24, 4  }
  0xf8   :  { %17 = sbr.rel (!%p15_p4) target bundleno = 1 (0x1), region = 86 }

// kernel: _lambda_.7
= control target key start
LH: loop header
LB: loop body
LE: loop exit
PB: predicated region body
PF: predicated region fallthrough
CT: control target
= control target key end

     0   :  { %s1916_s21 = smov 0   ;;  %s1918_s22 = smov 0   ;;  %s2145_s0 = inlined_call_operand.vmem [shape: bf16[2,6,1,11,16], index: 0, kind: input, shape index: {}, may-alias: {0,1,2,3}]   ;;  %s2146_s1 = inlined_call_operand.vmem [shape: bf16[2,6,1,11,16], index: 1, kind: input, shape index: {}, may-alias: {0,1,2,3}]   ;;  %s2147_s2 = inlined_call_operand.vmem [shape: bf16[2,6,1,11,16], index: 2, kind: input, shape index: {}, may-alias: {0,1,2,3}]   ;;  %s2148_s3 = inlined_call_operand.vmem [shape: bf16[2,6,1,11,16], index: 3, kind: input, shape index: {}, may-alias: {0,1,2,3}]   ;;  %s2149_s4 = inlined_call_operand.vmem [shape: bf16[16,16,128], index: 4, kind: input, shape index: {}]   ;;  %s2150_s5 = inlined_call_operand.vmem [shape: f32[1,128], index: 5, kind: input, shape index: {}]   ;;  %s2151_s6 = inlined_call_operand.vmem [shape: bf16[2,3,8,128], index: 6, kind: output, shape index: {}]  }
   0x1   :  { %s1920_s23 = smov 0   ;;  %s1922_s24 = smov 0  }
   0x2   :  { %s1924_s25 = smov 0  }
   0x3 LB: > { %s25_s26 = sadd.s32 1, %s1869_s23  ;;  %s28_s27 = sadd.s32 1, %s1873_s24  ;;  %s1877_s25 = sphi %s1924_s25, %s16_s25   ;;  %s1873_s24 = sphi %s1922_s24, %s2156_s24   ;;  %s1869_s23 = sphi %s1920_s23, %s2155_s23   ;;  %s1865_s22 = sphi %s1918_s22, %s2154_s22   ;;  %s1861_s21 = sphi %s1916_s21, %s2153_s21  }
   0x4   : > { %p26_p0 = scmp.ge.s32.totalorder %s25_s26, 3  ;;  %p1552_p1 = scmp.ge.s32.totalorder %s1877_s25, 1 }
   0x5   : > { %p292_p2 = scmp.lt.s32.totalorder %s1877_s25, 7 }
   0x6   : > { %s2158_s26 = smov (%p26_p0, %s25_s26), 0  ;;  %s2160_s27 = smov (!%p26_p0, %s28_s27), %s1873_s24 }
   0x7   : > { %p293_p3 = pnand %p1552_p1, %p292_p2  ;;  %p30_p4 = scmp.ge.s32.totalorder %s2160_s27, 2 }
   0x8   : > { %v1811_v0 = vld [vmem:[%s2149_s4 + $0x8] sm:$0xff] (!%p293_p3)   ;;  %v1879_v1 = vmov (!%p293_p3), 0.0   ;;  %v1812_v2 = vld [vmem:[%s2149_s4] sm:$0xff] (!%p293_p3)   ;;  %vm1880_vm0 = vmmov (!%p293_p3), 0   ;;  %p359_p5 = scmp.lt.s32.totalorder (!%p293_p3), %s1865_s22, 1  ;;  %p361_p6 = scmp.lt.s32.totalorder (!%p293_p3), %s1861_s21, 5 }
   0x9   : > { %s2162_s27 = smov (%p30_p4, %s2160_s27), 0  ;;  %296 = sbr.rel (%p293_p3) target bundleno = 312 (0x138), region = 44 }
   0xa   : > { %1671 = vmatprep.subr.bf16.mxu0 (!%p293_p3), %v1879_v1  ;;  %1677 = vmatprep.subr.bf16.mxu1 (!%p293_p3), %v1879_v1  ;;  %s368_s10 = sadd.s32 (!%p293_p3), 1, %s1861_s21  ;;  %vm435_vm1 = vcmask (!%p293_p3), 130048   ;;  %s379_s14 = sadd.s32 (!%p293_p3), 2, %s1861_s21  ;;  %v1817_v3 = vld [vmem:[%s2149_s4 + $0x18] sm:$0xff] (!%p293_p3)   ;;  %v1816_v17 = vld [vmem:[%s2149_s4 + $0x10] sm:$0xff] (!%p293_p3)   ;;  %v1819_v22 = vld [vmem:[%s2149_s4 + $0x28] sm:$0xff] (!%p293_p3)  }
   0xb   : > { %1672 = vmatpush3.bf16.msra.mxu0 (!%p293_p3), %v1811_v0  ;;  %1679 = vmatprep.mubr.msk.bf16.mxu1 (!%p293_p3), %vm1880_vm0, %v1879_v1  ;;  %p1970_p7 = scmp.lt.s32.totalorder (!%p293_p3), %s368_s10, 5  ;;  %p382_p8 = scmp.lt.s32.totalorder (!%p293_p3), %s379_s14, 5  ;;  %v1818_v32 = vld [vmem:[%s2149_s4 + $0x20] sm:$0xff] (!%p293_p3)   ;;  %v1822_v36 = vld [vmem:[%s2149_s4 + $0x38] sm:$0xff] (!%p293_p3)   ;;  %v1821_v43 = vld [vmem:[%s2149_s4 + $0x30] sm:$0xff] (!%p293_p3)  }
   0xc   : > { %1678 = vmatpush3.bf16.msra.mxu1 (!%p293_p3), %v1812_v2  ;;  %1673 = vmatprep.mubr.msk.bf16.mxu0 (!%p293_p3), %vm1880_vm0, %v1879_v1  ;;  %s390_s18 = sadd.s32 (!%p293_p3), 3, %s1861_s21  ;;  %v1826_v46 = vld [vmem:[%s2149_s4 + $0x48] sm:$0xff] (!%p293_p3)   ;;  %v1825_v54 = vld [vmem:[%s2149_s4 + $0x40] sm:$0xff] (!%p293_p3)   ;;  %v1829_v58 = vld [vmem:[%s2149_s4 + $0x58] sm:$0xff] (!%p293_p3)   ;;  %p403_p10 = scmp.lt.s32.totalorder (!%p293_p3), %s1861_s21, 2 }
   0xd   : > { %1683 = vmatprep.subr.bf16.mxu0 (!%p293_p3), %v1879_v1  ;;  %1689 = vmatprep.subr.bf16.mxu1 (!%p293_p3), %v1879_v1  ;;  %p393_p9 = scmp.lt.s32.totalorder (!%p293_p3), %s390_s18, 5  ;;  %v1828_v2 = vld [vmem:[%s2149_s4 + $0x50] sm:$0xff] (!%p293_p3)  }
  0x10   : > { %s2164_s22 = smov (!%p359_p5, %s1865_s22), 1  ;;  %s2166_s10 = smov (!%p1970_p7, %s368_s10), 5 }
  0x11   : > { %s362_s8 = scalar_select %p361_p6, %s1861_s21, 5 }
  0x12   : > { %s1967_s9 = smul.u32 12, %s2164_s22  ;;  %s2168_s14 = smov (!%p382_p8, %s379_s14), 5 }
  0x13   : > { %s1553_s11 = sshll.u32 %s362_s8, 1  ;;  %s1555_s28 = sshll.u32 %s2166_s10, 1 }
  0x14   : > { %s365_s13 = sadd.s32 %s1967_s9, %s1553_s11  ;;  %s375_s29 = sadd.s32 %s1967_s9, %s1555_s28 }
  0x15   : > { %s1554_s15 = sshll.u32 %s365_s13, 2  ;;  %s1557_s30 = sshll.u32 %s2168_s14, 1 }
  0x16   : > { %s367_s20 = scalar_lea.vmem %s2145_s0, %s1554_s15  ;;  %s1556_s7 = sshll.u32 %s375_s29, 2 }
  0x17   : > { %v410_v4 = vld [vmem:[%s367_s20] sm:$0xf]  ;;  %v413_v5 = vld [vmem:[%s367_s20 + $0x4] sm:$0x1]  ;;  %s1995_s15 = scalar_lea.vmem %s2146_s1, %s1556_s7  ;;  %s386_s10 = sadd.s32 %s1967_s9, %s1557_s30 }
  0x18   : > { %v528_v6 = vld [vmem:[%s367_s20] sm:$0xe]  ;;  %v1564_v7 = vcombine.low %v410_v4, %v413_v5  ;;  %1680 = vmatmul.mubr.msk.bf16.vlgmr.msra.gmra.mrb[0].mxu1 %vm435_vm1, %v410_v4  ;;  %v586_v8 = vld [vmem:[%s367_s20 + $0x4] sm:$0x3]  ;;  %s1558_s17 = sshll.u32 %s386_s10, 2  ;;  %s2170_s18 = smov (!%p393_p9, %s390_s18), 5 }
  0x19   : > { %v1576_v9 = vcombine.low %v528_v6, %v586_v8  ;;  %1690 = vmatpush3.bf16.msra.mxu1 %v1817_v3  ;;  %1691 = vmatprep.mubr.msk.bf16.mxu1 %vm1880_vm0, %v1879_v1  ;;  %v705_v19 = vld [vmem:[%s1995_s15] sm:$0xf]  ;;  %v1999_v20 = vld [vmem:[%s1995_s15 + $0x4] sm:$0x1]  ;;  %v1571_v26 = vcombine.low %v528_v6, %v413_v5  ;;  %s2020_s28 = scalar_lea.vmem %s2147_s2, %s1558_s17  ;;  %s1559_s11 = sshll.u32 %s2170_s18, 1  ;;  %v1833_v5 = vld [vmem:[%s2149_s4 + $0x68] sm:$0xff]  }
  0x1a   : > { %v423_v10 = vshrl.u32 %v1564_v7, 16  ;;  %v425_v11 = vshll.u32 %v1564_v7, 16  ;;  %1701 = vmatprep.subr.bf16.mxu1 %v1879_v1  ;;  %v1585_v23 = vcombine.low %v705_v19, %v1999_v20  ;;  %v772_v24 = vld [vmem:[%s1995_s15] sm:$0xe]  ;;  %v830_v25 = vld [vmem:[%s1995_s15 + $0x4] sm:$0x3]  ;;  %s397_s10 = sadd.s32 %s1967_s9, %s1559_s11 }
  0x1b   : > { %v594_v12 = vshrl.u32 %v1576_v9, 16  ;;  %v597_v13 = vshll.u32 %v1576_v9, 16  ;;  %v1595_v29 = vcombine.low %v772_v24, %v830_v25  ;;  %v535_v31 = vrot.slane %v1571_v26, 1  ;;  %v949_v37 = vld [vmem:[%s2020_s28] sm:$0xf]  ;;  %s1768_s9 = smul.u32 3, %s2164_s22 }
  0x1c   : > { %v427_v14 = vrot.slane %v425_v11, 1  ;;  %v718_v27 = vshll.u32 %v1585_v23, 16  ;;  %v716_v28 = vshrl.u32 %v1585_v23, 16  ;;  %v2030_v38 = vld [vmem:[%s2020_s28 + $0x4] sm:$0x1]  ;;  %v1590_v49 = vcombine.low %v772_v24, %v1999_v20  ;;  %s2172_s21 = smov (!%p403_p10, %s1861_s21), 2 }
  0x1d   : > { %v596_v15 = vrot.slane %v594_v12, 1  ;;  %v599_v16 = vrot.slane %v597_v13, 2  ;;  %v838_v34 = vshrl.u32 %v1595_v29, 16  ;;  %v841_v35 = vshll.u32 %v1595_v29, 16  ;;  %v651_v42 = vld [vmem:[%s1995_s15] sm:$0xf]  ;;  %s406_s19 = sadd.s32 %s1768_s9, %s2172_s21 }
  0x1e   : > { %v428_v18 = vor.u32 %v427_v14, %v423_v10  ;;  %v720_v30 = vrot.slane %v718_v27, 1  ;;  %v1604_v41 = vcombine.low %v949_v37, %v2030_v38  ;;  %v1016_v47 = vld [vmem:[%s2020_s28] sm:$0xe]  ;;  %v1074_v48 = vld [vmem:[%s2020_s28 + $0x4] sm:$0x3]  ;;  %s1560_s15 = sshll.u32 %s397_s10, 2 }
  0x1f   : > { %v600_v21 = vor.u32 %v599_v16, %v596_v15  ;;  %v840_v39 = vrot.slane %v838_v34, 1  ;;  %v843_v40 = vrot.slane %v841_v35, 2  ;;  %v1614_v52 = vcombine.low %v1016_v47, %v1074_v48  ;;  %s2063_s18 = scalar_lea.vmem %s2148_s3, %s1560_s15  ;;  %v895_v0 = vld [vmem:[%s2020_s28] sm:$0xf]  ;;  %s1561_s20 = sshll.u32 %s406_s19, 2 }
  0x20   : > { %1674 = vmatmul.mubr.msk.bf16.vlgmr.msra.gmra.mrb[0].mxu0 %vm435_vm1, %v428_v18  ;;  %v721_v33 = vor.u32 %v720_v30, %v716_v28  ;;  %v962_v45 = vshll.u32 %v1604_v41, 16  ;;  %v960_v50 = vshrl.u32 %v1604_v41, 16  ;;  %v779_v53 = vrot.slane %v1590_v49, 1  ;;  %v1193_v59 = vld [vmem:[%s2063_s18] sm:$0xf]  ;;  %s408_s22 = scalar_lea.vmem %s2151_s6, %s1561_s20 }
  0x21   : > { %1684 = vmatpush3.bf16.msra.mxu0 %v1816_v17  ;;  %1685 = vmatprep.mubr.msk.bf16.mxu0 %vm1880_vm0, %v1879_v1  ;;  %v844_v44 = vor.u32 %v843_v40, %v840_v39  ;;  %v1082_v56 = vshrl.u32 %v1614_v52, 16  ;;  %v1085_v57 = vshll.u32 %v1614_v52, 16  ;;  %v1194_v60 = vld [vmem:[%s2063_s18 + $0x4] sm:$0x1]  ;;  %v1260_v6 = vld [vmem:[%s2063_s18] sm:$0xe]  ;;  %v1609_v8 = vcombine.low %v1016_v47, %v2030_v38 }
  0x22   : > { %1692 = vmatmul.mubr.msk.bf16.vlgmr.msra.gmra.mrb[4].mxu1 %vm435_vm1, %v600_v21  ;;  %1695 = vmatprep.subr.bf16.mxu0 %v1879_v1  ;;  %v964_v51 = vrot.slane %v962_v45, 1  ;;  %v1623_v63 = vcombine.low %v1193_v59, %v1194_v60  ;;  %v1318_v7 = vld [vmem:[%s2063_s18 + $0x4] sm:$0x3]  ;;  %v1836_v17 = vld [vmem:[%s2149_s4 + $0x78] sm:$0xff]   ;;  %v1139_v20 = vld [vmem:[%s2063_s18] sm:$0xf]  ;;  %v1628_v23 = vcombine.low %v1260_v6, %v1194_v60 }
  0x23   : > { %1702 = vmatpush3.bf16.msra.mxu1 %v1819_v22  ;;  %1703 = vmatprep.mubr.msk.bf16.mxu1 %vm1880_vm0, %v1879_v1  ;;  %v1084_v61 = vrot.slane %v1082_v56, 1  ;;  %v1087_v62 = vrot.slane %v1085_v57, 2  ;;  %v1633_v11 = vcombine.low %v1260_v6, %v1318_v7  ;;  %v1023_v12 = vrot.slane %v1609_v8, 1  ;;  %v1832_v13 = vld [vmem:[%s2149_s4 + $0x60] sm:$0xff]   ;;  %v1835_v21 = vld [vmem:[%s2149_s4 + $0x70] sm:$0xff]  }
  0x24   : > { %1713 = vmatprep.subr.bf16.mxu1 %v1879_v1  ;;  %v965_v55 = vor.u32 %v964_v51, %v960_v50  ;;  %v1206_v4 = vshll.u32 %v1623_v63, 16  ;;  %v1204_v9 = vshrl.u32 %v1623_v63, 16  ;;  %v1267_v24 = vrot.slane %v1628_v23, 1 }
  0x25   : > { %v1088_v3 = vor.u32 %v1087_v62, %v1084_v61  ;;  %v1326_v15 = vshrl.u32 %v1633_v11, 16  ;;  %v1329_v16 = vshll.u32 %v1633_v11, 16 }
  0x26   : > { %v1208_v10 = vrot.slane %v1206_v4, 1 }
  0x27   : > { %v1328_v18 = vrot.slane %v1326_v15, 1  ;;  %v1331_v19 = vrot.slane %v1329_v16, 2 }
  0x28   : > { %1686 = vmatmul.mubr.msk.bf16.vlgmr.msra.gmra.mrb[4].mxu0 %vm435_vm1, %v535_v31  ;;  %v1209_v14 = vor.u32 %v1208_v10, %v1204_v9 }
  0x29   : > { %1696 = vmatpush3.bf16.msra.mxu0 %v1818_v32  ;;  %1697 = vmatprep.mubr.msk.bf16.mxu0 %vm1880_vm0, %v1879_v1  ;;  %v1332_v22 = vor.u32 %v1331_v19, %v1328_v18 }
  0x2a   : > { %1704 = vmatmul.mubr.msk.bf16.vlgmr.msra.gmra.mrb[8].mxu1 %vm435_vm1, %v721_v33  ;;  %1707 = vmatprep.subr.bf16.mxu0 %v1879_v1 }
  0x2b   : > { %1714 = vmatpush3.bf16.msra.mxu1 %v1822_v36  ;;  %1715 = vmatprep.mubr.msk.bf16.mxu1 %vm1880_vm0, %v1879_v1 }
  0x2c   : > { %1725 = vmatprep.subr.bf16.mxu1 %v1879_v1 }
  0x30   : > { %1698 = vmatmul.mubr.msk.bf16.vlgmr.msra.gmra.mrb[8].mxu0 %vm435_vm1, %v651_v42 }
  0x31   : > { %1708 = vmatpush3.bf16.msra.mxu0 %v1821_v43  ;;  %1709 = vmatprep.mubr.msk.bf16.mxu0 %vm1880_vm0, %v1879_v1 }
  0x32   : > { %1716 = vmatmul.mubr.msk.bf16.vlgmr.msra.gmra.mrb[12].mxu1 %vm435_vm1, %v844_v44  ;;  %1719 = vmatprep.subr.bf16.mxu0 %v1879_v1 }
  0x33   : > { %1726 = vmatpush3.bf16.msra.mxu1 %v1826_v46  ;;  %1727 = vmatprep.mubr.msk.bf16.mxu1 %vm1880_vm0, %v1879_v1 }
  0x34   : > { %1737 = vmatprep.subr.bf16.mxu1 %v1879_v1 }
  0x38   : > { %1710 = vmatmul.mubr.msk.bf16.vlgmr.msra.gmra.mrb[12].mxu0 %vm435_vm1, %v779_v53 }
  0x39   : > { %1720 = vmatpush3.bf16.msra.mxu0 %v1825_v54  ;;  %1721 = vmatprep.mubr.msk.bf16.mxu0 %vm1880_vm0, %v1879_v1 }
  0x3a   : > { %1728 = vmatmul.mubr.msk.bf16.vlgmr.msra.gmra.mrb[16].mxu1 %vm435_vm1, %v965_v55  ;;  %1731 = vmatprep.subr.bf16.mxu0 %v1879_v1 }
  0x3b   : > { %1738 = vmatpush3.bf16.msra.mxu1 %v1829_v58  ;;  %1739 = vmatprep.mubr.msk.bf16.mxu1 %vm1880_vm0, %v1879_v1 }
  0x3c   : > { %1749 = vmatprep.subr.bf16.mxu1 %v1879_v1 }
  0x40   : > { %1722 = vmatmul.mubr.msk.bf16.vlgmr.msra.gmra.mrb[16].mxu0 %vm435_vm1, %v895_v0 }
  0x41   : > { %1732 = vmatpush3.bf16.msra.mxu0 %v1828_v2  ;;  %1733 = vmatprep.mubr.msk.bf16.mxu0 %vm1880_vm0, %v1879_v1 }
  0x42   : > { %1740 = vmatmul.mubr.msk.bf16.vlgmr.msra.gmra.mrb[20].mxu1 %vm435_vm1, %v1088_v3  ;;  %1743 = vmatprep.subr.bf16.mxu0 %v1879_v1 }
  0x43   : > { %1750 = vmatpush3.bf16.msra.mxu1 %v1833_v5  ;;  %1751 = vmatprep.mubr.msk.bf16.mxu1 %vm1880_vm0, %v1879_v1 }
  0x44   : > { %1761 = vmatprep.subr.bf16.mxu1 %v1879_v1 }
  0x48   : > { %1734 = vmatmul.mubr.msk.bf16.vlgmr.msra.gmra.mrb[20].mxu0 %vm435_vm1, %v1023_v12 }
  0x49   : > { %1744 = vmatpush3.bf16.msra.mxu0 %v1832_v13  ;;  %1745 = vmatprep.mubr.msk.bf16.mxu0 %vm1880_vm0, %v1879_v1 }
  0x4a   : > { %1752 = vmatmul.mubr.msk.bf16.vlgmr.msra.gmra.mrb[24].mxu1 %vm435_vm1, %v1209_v14  ;;  %1755 = vmatprep.subr.bf16.mxu0 %v1879_v1 }
  0x4b   : > { %1762 = vmatpush3.bf16.msra.mxu1 %v1836_v17  ;;  %1763 = vmatprep.mubr.msk.bf16.mxu1 %vm1880_vm0, %v1879_v1 }
  0x50   : > { %1746 = vmatmul.mubr.msk.bf16.vlgmr.msra.gmra.mrb[24].mxu0 %vm435_vm1, %v1139_v20 }
  0x51   : > { %1756 = vmatpush3.bf16.msra.mxu0 %v1835_v21  ;;  %1757 = vmatprep.mubr.msk.bf16.mxu0 %vm1880_vm0, %v1879_v1 }
  0x52   : > { %1764 = vmatmul.mubr.msk.bf16.vlgmr.msra.gmra.mrb[28].mxu1 %vm435_vm1, %v1332_v22 }
  0x58   : > { %1758 = vmatmul.mubr.msk.bf16.vlgmr.msra.gmra.mrb[28].mxu0 %vm435_vm1, %v1267_v24 }
  0xeb   : > { %v522_v25 = vpop.f32.mrb[0].mxu1 }
  0xec   : > { %v1681_v26 = vpop.f32.mrb[1].mxu1 }
  0xed   : > { %v525_v27 = vpop.f32.mrb[2].mxu1 }
  0xee   : > { %v1682_v28 = vpop.f32.mrb[3].mxu1 }
  0xf3   : > { %v473_v29 = vpop.f32.mrb[0].mxu0 }
  0xf4   : > { %v523_v30 = vadd.f32 %v522_v25, %v473_v29  ;;  %v1675_v31 = vpop.f32.mrb[1].mxu0 }
  0xf5   : > { %v476_v32 = vpop.f32.mrb[2].mxu0  ;;  %v644_v33 = vpop.f32.mrb[4].mxu1 }
  0xf6   : > { %v1676_v34 = vpop.f32.mrb[3].mxu0  ;;  %v1693_v35 = vpop.f32.mrb[5].mxu1 }
  0xf7   : > { %v647_v36 = vpop.f32.mrb[6].mxu1 }
  0xf8   : > { %v1694_v37 = vpop.f32.mrb[7].mxu1 }
  0xf9   : > { %v1636_v37 = vld [vmem:[%s2150_s5] ss:$0 sm:$0xff] }
  0xfb   : > { %v579_v38 = vpop.f32.mrb[4].mxu0 }
  0xfc   : > { %v585_v1 = vadd.f32 %v579_v38, %v523_v30  ;;  %v1687_v39 = vpop.f32.mrb[5].mxu0 }
  0xfd   : > { %v582_v40 = vpop.f32.mrb[6].mxu0  ;;  %v765_v41 = vpop.f32.mrb[8].mxu1 }
  0xfe   : > { %v1688_v42 = vpop.f32.mrb[7].mxu0  ;;  %v650_v43 = vadd.f32 %v644_v33, %v585_v1  ;;  %v1705_v44 = vpop.f32.mrb[9].mxu1 }
  0xff   : > { %v768_v45 = vpop.f32.mrb[10].mxu1 }
 0x100   : > { %v1706_v46 = vpop.f32.mrb[11].mxu1 }
 0x103   : > { %v698_v47 = vpop.f32.mrb[8].mxu0 }
 0x104   : > { %v704_v48 = vadd.f32 %v698_v47, %v650_v43  ;;  %v1699_v49 = vpop.f32.mrb[9].mxu0 }
 0x105   : > { %v701_v50 = vpop.f32.mrb[10].mxu0  ;;  %v888_v51 = vpop.f32.mrb[12].mxu1 }
 0x106   : > { %v1700_v52 = vpop.f32.mrb[11].mxu0  ;;  %v771_v53 = vadd.f32 %v765_v41, %v704_v48  ;;  %v1717_v54 = vpop.f32.mrb[13].mxu1 }
 0x107   : > { %v891_v55 = vpop.f32.mrb[14].mxu1 }
 0x108   : > { %v1718_v56 = vpop.f32.mrb[15].mxu1 }
 0x10b   : > { %v823_v57 = vpop.f32.mrb[12].mxu0 }
 0x10c   : > { %v829_v58 = vadd.f32 %v823_v57, %v771_v53  ;;  %v1711_v59 = vpop.f32.mrb[13].mxu0 }
 0x10d   : > { %v826_v60 = vpop.f32.mrb[14].mxu0  ;;  %v1009_v61 = vpop.f32.mrb[16].mxu1 }
 0x10e   : > { %v1712_v62 = vpop.f32.mrb[15].mxu0  ;;  %v894_v63 = vadd.f32 %v888_v51, %v829_v58  ;;  %v1729_v0 = vpop.f32.mrb[17].mxu1 }
 0x10f   : > { %v1012_v2 = vpop.f32.mrb[18].mxu1 }
 0x110   : > { %v1730_v3 = vpop.f32.mrb[19].mxu1 }
 0x113   : > { %v942_v4 = vpop.f32.mrb[16].mxu0 }
 0x114   : > { %v948_v5 = vadd.f32 %v942_v4, %v894_v63  ;;  %v1723_v6 = vpop.f32.mrb[17].mxu0 }
 0x115   : > { %v945_v7 = vpop.f32.mrb[18].mxu0  ;;  %v1132_v8 = vpop.f32.mrb[20].mxu1 }
 0x116   : > { %v1724_v9 = vpop.f32.mrb[19].mxu0  ;;  %v1015_v10 = vadd.f32 %v1009_v61, %v948_v5  ;;  %v1741_v11 = vpop.f32.mrb[21].mxu1 }
 0x117   : > { %v1135_v12 = vpop.f32.mrb[22].mxu1 }
 0x118   : > { %v1742_v13 = vpop.f32.mrb[23].mxu1 }
 0x11b   : > { %v1067_v14 = vpop.f32.mrb[20].mxu0 }
 0x11c   : > { %v1073_v15 = vadd.f32 %v1067_v14, %v1015_v10  ;;  %v1735_v16 = vpop.f32.mrb[21].mxu0 }
 0x11d   : > { %v1070_v17 = vpop.f32.mrb[22].mxu0  ;;  %v1253_v18 = vpop.f32.mrb[24].mxu1 }
 0x11e   : > { %v1736_v19 = vpop.f32.mrb[23].mxu0  ;;  %v1138_v20 = vadd.f32 %v1132_v8, %v1073_v15  ;;  %v1753_v21 = vpop.f32.mrb[25].mxu1 }
 0x11f   : > { %v1256_v22 = vpop.f32.mrb[26].mxu1 }
 0x120   : > { %v1754_v23 = vpop.f32.mrb[27].mxu1 }
 0x123   : > { %v1186_v24 = vpop.f32.mrb[24].mxu0 }
 0x124   : > { %v1192_v25 = vadd.f32 %v1186_v24, %v1138_v20  ;;  %v1747_v26 = vpop.f32.mrb[25].mxu0 }
 0x125   : > { %v1189_v27 = vpop.f32.mrb[26].mxu0  ;;  %v1376_v28 = vpop.f32.mrb[28].mxu1 }
 0x126   : > { %v1748_v29 = vpop.f32.mrb[27].mxu0  ;;  %v1259_v30 = vadd.f32 %v1253_v18, %v1192_v25  ;;  %v1765_v31 = vpop.f32.mrb[29].mxu1 }
 0x127   : > { %v1379_v32 = vpop.f32.mrb[30].mxu1 }
 0x128   : > { %v1766_v33 = vpop.f32.mrb[31].mxu1 }
 0x12b   : > { %v1311_v34 = vpop.f32.mrb[28].mxu0 }
 0x12c   : > { %v1317_v35 = vadd.f32 %v1311_v34, %v1259_v30  ;;  %v1759_v36 = vpop.f32.mrb[29].mxu0 }
 0x12d   : > { %v1314_v38 = vpop.f32.mrb[30].mxu0 }
 0x12e   : > { %v1382_v1 = vadd.f32 %v1376_v28, %v1317_v35  ;;  %v1760_v39 = vpop.f32.mrb[31].mxu0 }
 0x130   : > { %v1390_v40 = vadd.f32 %v1636_v37, %v1382_v1 }
 0x132   : > { %vm1391_vm2 = vcmp.ge.f32.partialorder %v1390_v40, 0.0  ;;  %v1392_v41 = vmul.f32 0.2, %v1390_v40 }
 0x134   : > { %v1393_v42 = vsel %vm1391_vm2, %v1390_v40, %v1392_v41 }
 0x135   : > { %v1394_v43 = vpack.c.bf16 %v1393_v42, %v1393_v42 }
 0x137   : > { %1395 = vst [vmem:[%s408_s22] sm:$0xf] %v1394_v43 }
 0x138 PF: > { %s16_s25 = sadd.s32 1, %s1877_s25   ;;  %s2153_s21 = smov %s1869_s23 }
 0x139   : > { %p13_p11 = scmp.ge.s32.totalorder %s16_s25, 8   ;;  %s2154_s22 = smov %s1873_s24 }
 0x13a   : > { %s2155_s23 = smov %s2158_s26  ;;  %s2156_s24 = smov %s2162_s27 }
 0x13b   :  { %15 = sbr.rel (!%p13_p11) target bundleno = 3 (0x3), region = 98 }

// kernel: _lambda_.9
= control target key start
LH: loop header
LB: loop body
LE: loop exit
PB: predicated region body
PF: predicated region fallthrough
CT: control target
= control target key end

     0   :  { %s2150_s21 = smov 0   ;;  %s2152_s22 = smov 0   ;;  %s2459_s0 = inlined_call_operand.vmem [shape: bf16[2,5,1,11,32], index: 0, kind: input, shape index: {}, may-alias: {0,1,2,3}]   ;;  %s2460_s1 = inlined_call_operand.vmem [shape: bf16[2,5,1,11,32], index: 1, kind: input, shape index: {}, may-alias: {0,1,2,3}]   ;;  %s2461_s2 = inlined_call_operand.vmem [shape: bf16[2,5,1,11,32], index: 2, kind: input, shape index: {}, may-alias: {0,1,2,3}]   ;;  %s2462_s3 = inlined_call_operand.vmem [shape: bf16[2,5,1,11,32], index: 3, kind: input, shape index: {}, may-alias: {0,1,2,3}]   ;;  %s2463_s4 = inlined_call_operand.vmem [shape: bf16[16,32,128], index: 4, kind: input, shape index: {}]   ;;  %s2464_s5 = inlined_call_operand.vmem [shape: f32[1,128], index: 5, kind: input, shape index: {}]   ;;  %s2465_s6 = inlined_call_operand.vmem [shape: f32[2,2,8,128], index: 6, kind: output, shape index: {}]  }
   0x1   :  { %s2154_s23 = smov 0   ;;  %s2156_s24 = smov 0  }
   0x2   :  { %s2158_s25 = smov 0  }
   0x3 LB: > { %s25_s26 = sadd.s32 1, %s2103_s23  ;;  %s28_s27 = sadd.s32 1, %s2107_s24  ;;  %s2111_s25 = sphi %s2158_s25, %s16_s25   ;;  %s2107_s24 = sphi %s2156_s24, %s2470_s24   ;;  %s2103_s23 = sphi %s2154_s23, %s2469_s23   ;;  %s2099_s22 = sphi %s2152_s22, %s2468_s22   ;;  %s2095_s21 = sphi %s2150_s21, %s2467_s21  }
   0x4   : > { %p26_p0 = scmp.ge.s32.totalorder %s25_s26, 2  ;;  %p1676_p1 = scmp.ge.s32.totalorder %s2111_s25, 1 }
   0x5   : > { %p292_p2 = scmp.lt.s32.totalorder %s2111_s25, 5 }
   0x6   : > { %s2472_s26 = smov (%p26_p0, %s25_s26), 0  ;;  %s2474_s27 = smov (!%p26_p0, %s28_s27), %s2107_s24 }
   0x7   : > { %p293_p3 = pnand %p1676_p1, %p292_p2  ;;  %p30_p4 = scmp.ge.s32.totalorder %s2474_s27, 2 }
   0x8   : > { %v2029_v0 = vld [vmem:[%s2463_s4 + $0x10] sm:$0xff] (!%p293_p3)   ;;  %v2113_v1 = vmov (!%p293_p3), 0.0   ;;  %v2030_v2 = vld [vmem:[%s2463_s4] sm:$0xff] (!%p293_p3)   ;;  %v2031_v3 = vld [vmem:[%s2463_s4 + $0x18] sm:$0xff] (!%p293_p3)   ;;  %vm2114_vm0 = vmmov (!%p293_p3), 0   ;;  %p359_p5 = scmp.lt.s32.totalorder (!%p293_p3), %s2099_s22, 1 }
   0x9   : > { %s2476_s27 = smov (%p30_p4, %s2474_s27), 0  ;;  %296 = sbr.rel (%p293_p3) target bundleno = 307 (0x133), region = 44 }
   0xa   : > { %1858 = vmatprep.subr.bf16.mxu0 (!%p293_p3), %v2113_v1  ;;  %1866 = vmatprep.subr.bf16.mxu1 (!%p293_p3), %v2113_v1  ;;  %v2032_v4 = vld [vmem:[%s2463_s4 + $0x8] sm:$0xff] (!%p293_p3)   ;;  %p361_p6 = scmp.lt.s32.totalorder (!%p293_p3), %s2095_s21, 4  ;;  %vm445_vm1 = vcmask (!%p293_p3), 261120   ;;  %s368_s16 = sadd.s32 (!%p293_p3), 1, %s2095_s21  ;;  %v2037_v5 = vld [vmem:[%s2463_s4 + $0x30] sm:$0xff] (!%p293_p3)   ;;  %v2039_v12 = vld [vmem:[%s2463_s4 + $0x38] sm:$0xff] (!%p293_p3)  }
   0xb   : > { %1859 = vmatpush3.bf16.msra.mxu0 (!%p293_p3), %v2029_v0  ;;  %1870 = vmatprep.mubr.msk.bf16.mxu1 (!%p293_p3), %vm2114_vm0, %v2113_v1  ;;  %p371_p7 = scmp.lt.s32.totalorder (!%p293_p3), %s368_s16, 4  ;;  %v2036_v20 = vld [vmem:[%s2463_s4 + $0x20] sm:$0xff] (!%p293_p3)   ;;  %v2041_v22 = vld [vmem:[%s2463_s4 + $0x50] sm:$0xff] (!%p293_p3)   ;;  %v2038_v30 = vld [vmem:[%s2463_s4 + $0x28] sm:$0xff] (!%p293_p3)   ;;  %s379_s28 = sadd.s32 (!%p293_p3), 2, %s2095_s21 }
   0xc   : > { %1867 = vmatpush3.bf16.msra.mxu1 (!%p293_p3), %v2030_v2  ;;  %1860 = vmatprep.subr.bf16.mxu0 (!%p293_p3), %v2113_v1  ;;  %v2040_v34 = vld [vmem:[%s2463_s4 + $0x40] sm:$0xff] (!%p293_p3)   ;;  %v2043_v35 = vld [vmem:[%s2463_s4 + $0x58] sm:$0xff] (!%p293_p3)   ;;  %p382_p8 = scmp.lt.s32.totalorder (!%p293_p3), %s379_s28, 4  ;;  %v2046_v41 = vld [vmem:[%s2463_s4 + $0x70] sm:$0xff] (!%p293_p3)   ;;  %s390_s11 = sadd.s32 (!%p293_p3), 3, %s2095_s21 }
   0xd   : > { %1868 = vmatprep.subr.bf16.mxu1 (!%p293_p3), %v2113_v1  ;;  %1862 = vmatprep.mubr.msk.bf16.mxu0 (!%p293_p3), %vm2114_vm0, %v2113_v1  ;;  %v2042_v42 = vld [vmem:[%s2463_s4 + $0x48] sm:$0xff] (!%p293_p3)   ;;  %p2286_p9 = scmp.lt.s32.totalorder (!%p293_p3), %s390_s11, 4  ;;  %v2048_v45 = vld [vmem:[%s2463_s4 + $0x78] sm:$0xff] (!%p293_p3)   ;;  %v2045_v46 = vld [vmem:[%s2463_s4 + $0x60] sm:$0xff] (!%p293_p3)   ;;  %p403_p10 = scmp.lt.s32.totalorder (!%p293_p3), %s2095_s21, 1 }
   0xe   : > { %v2052_v53 = vld [vmem:[%s2463_s4 + $0x90] sm:$0xff] (!%p293_p3)   ;;  %v2047_v57 = vld [vmem:[%s2463_s4 + $0x68] sm:$0xff] (!%p293_p3)   ;;  %v2054_v61 = vld [vmem:[%s2463_s4 + $0x98] sm:$0xff] (!%p293_p3)  }
   0xf   : > { %1861 = vmatpush3.bf16.msra.mxu0 (!%p293_p3), %v2031_v3  ;;  %v2051_v63 = vld [vmem:[%s2463_s4 + $0x80] sm:$0xff] (!%p293_p3)  }
  0x10   : > { %s2478_s22 = smov (!%p359_p5, %s2099_s22), 1  ;;  %1869 = vmatpush3.bf16.msra.mxu1 %v2032_v4  ;;  %1874 = vmatprep.subr.bf16.mxu0 %v2113_v1  ;;  %s2480_s16 = smov (!%p371_p7, %s368_s16), 4  ;;  %v2057_v4 = vld [vmem:[%s2463_s4 + $0xb0] sm:$0xff]  }
  0x11   : > { %s362_s12 = scalar_select %p361_p6, %s2095_s21, 4  ;;  %1882 = vmatprep.subr.bf16.mxu1 %v2113_v1 }
  0x12   : > { %s2211_s13 = smul.u32 10, %s2478_s22  ;;  %s1679_s8 = sshll.u32 %s2480_s16, 1 }
  0x13   : > { %s1677_s14 = sshll.u32 %s362_s12, 1  ;;  %s2482_s28 = smov (!%p382_p8, %s379_s28), 4 }
  0x14   : > { %s365_s15 = sadd.s32 %s2211_s13, %s1677_s14  ;;  %s375_s9 = sadd.s32 %s2211_s13, %s1679_s8 }
  0x15   : > { %s1678_s17 = sshll.u32 %s365_s15, 2  ;;  %s1680_s10 = sshll.u32 %s375_s9, 2 }
  0x16   : > { %s367_s29 = scalar_lea.vmem %s2459_s0, %s1678_s17  ;;  %s2237_s17 = scalar_lea.vmem %s2460_s1, %s1680_s10 }
  0x17   : > { %v410_v6 = vld [vmem:[%s367_s29] sm:$0xf]  ;;  %v415_v7 = vld [vmem:[%s367_s29 + $0x4] sm:$0x1]  ;;  %s1681_s15 = sshll.u32 %s2482_s28, 1  ;;  %s2484_s11 = smov (!%p2286_p9, %s390_s11), 4 }
  0x18   : > { %v544_v8 = vld [vmem:[%s367_s29] sm:$0xe]  ;;  %v1691_v9 = vcombine.low %v410_v6, %v415_v7  ;;  %1871 = vmatmul.mubr.msk.bf16.vlgmr.msra.gmra.mrb[0].mxu1 %vm445_vm1, %v410_v6  ;;  %v610_v10 = vld [vmem:[%s367_s29 + $0x4] sm:$0x3]  ;;  %s386_s16 = sadd.s32 %s2211_s13, %s1681_s15  ;;  %s2486_s21 = smov (!%p403_p10, %s2095_s21), 1 }
  0x19   : > { %v1710_v11 = vcombine.low %v544_v8, %v610_v10  ;;  %1883 = vmatpush3.bf16.msra.mxu1 %v2037_v5  ;;  %1886 = vmatprep.mubr.msk.bf16.mxu1 %vm2114_vm0, %v2113_v1  ;;  %v745_v23 = vld [vmem:[%s2237_s17] sm:$0xf]  ;;  %v2245_v24 = vld [vmem:[%s2237_s17 + $0x4] sm:$0x1]  ;;  %v1702_v28 = vcombine.low %v544_v8, %v415_v7  ;;  %s1682_s18 = sshll.u32 %s386_s16, 2  ;;  %v2053_v7 = vld [vmem:[%s2463_s4 + $0x88] sm:$0xff]  }
  0x1a   : > { %v427_v13 = vshrl.u32 %v1691_v9, 16  ;;  %v429_v14 = vshll.u32 %v1691_v9, 16  ;;  %1884 = vmatprep.subr.bf16.mxu1 %v2113_v1  ;;  %v1725_v26 = vcombine.low %v745_v23, %v2245_v24  ;;  %v2249_v27 = vld [vmem:[%s2237_s17] sm:$0xe]  ;;  %v886_v29 = vld [vmem:[%s2237_s17 + $0x4] sm:$0x3]  ;;  %s2298_s7 = scalar_lea.vmem %s2461_s2, %s1682_s18 }
  0x1b   : > { %v620_v15 = vshrl.u32 %v1710_v11, 16  ;;  %v623_v16 = vshll.u32 %v1710_v11, 16  ;;  %v1741_v32 = vcombine.low %v2249_v27, %v886_v29  ;;  %v553_v37 = vrot.slane %v1702_v28, 1  ;;  %v1021_v47 = vld [vmem:[%s2298_s7] sm:$0xf]  ;;  %v2059_v11 = vld [vmem:[%s2463_s4 + $0xb8] sm:$0xff]  }
  0x1c   : > { %v431_v17 = vrot.slane %v429_v14, 1  ;;  %v760_v31 = vshll.u32 %v1725_v26, 16  ;;  %v758_v33 = vshrl.u32 %v1725_v26, 16  ;;  %v2306_v48 = vld [vmem:[%s2298_s7 + $0x4] sm:$0x1]  ;;  %v1733_v56 = vcombine.low %v2249_v27, %v2245_v24  ;;  %v2065_v24 = vld [vmem:[%s2463_s4 + $0xd8] sm:$0xff]  }
  0x1d   : > { %v622_v18 = vrot.slane %v620_v15, 1  ;;  %v625_v19 = vrot.slane %v623_v16, 2  ;;  %1885 = vmatpush3.bf16.msra.mxu1 %v2039_v12  ;;  %v896_v38 = vshrl.u32 %v1741_v32, 16  ;;  %v899_v39 = vshll.u32 %v1741_v32, 16  ;;  %v683_v49 = vld [vmem:[%s2237_s17] sm:$0xf] }
  0x1e   : > { %v432_v21 = vor.u32 %v431_v17, %v427_v13  ;;  %1898 = vmatprep.subr.bf16.mxu1 %v2113_v1  ;;  %v762_v36 = vrot.slane %v760_v31, 1  ;;  %v1756_v50 = vcombine.low %v1021_v47, %v2306_v48  ;;  %v2311_v51 = vld [vmem:[%s2298_s7] sm:$0xe]  ;;  %v1162_v55 = vld [vmem:[%s2298_s7 + $0x4] sm:$0x3]  ;;  %s1683_s17 = sshll.u32 %s2484_s11, 1 }
  0x1f   : > { %v626_v25 = vor.u32 %v625_v19, %v622_v18  ;;  %v898_v43 = vrot.slane %v896_v38, 1  ;;  %v901_v44 = vrot.slane %v899_v39, 2  ;;  %s397_s16 = sadd.s32 %s2211_s13, %s1683_s17  ;;  %v1772_v60 = vcombine.low %v2311_v51, %v1162_v55  ;;  %v959_v12 = vld [vmem:[%s2298_s7] sm:$0xf]  ;;  %v2063_v16 = vld [vmem:[%s2463_s4 + $0xd0] sm:$0xff]   ;;  %v2064_v31 = vld [vmem:[%s2463_s4 + $0xc8] sm:$0xff]  }
  0x20   : > { %1863 = vmatmul.mubr.msk.bf16.vlgmr.msra.gmra.mrb[0].mxu0 %vm445_vm1, %v432_v21  ;;  %v763_v40 = vor.u32 %v762_v36, %v758_v33  ;;  %v1036_v54 = vshll.u32 %v1756_v50, 16  ;;  %v1034_v58 = vshrl.u32 %v1756_v50, 16  ;;  %s1684_s18 = sshll.u32 %s397_s16, 2  ;;  %v829_v62 = vrot.slane %v1733_v56, 1  ;;  %v2056_v13 = vld [vmem:[%s2463_s4 + $0xa0] sm:$0xff]   ;;  %v2069_v39 = vld [vmem:[%s2463_s4 + $0xe8] sm:$0xff]  }
  0x21   : > { %1875 = vmatpush3.bf16.msra.mxu0 %v2036_v20  ;;  %1878 = vmatprep.mubr.msk.bf16.mxu0 %vm2114_vm0, %v2113_v1  ;;  %v902_v52 = vor.u32 %v901_v44, %v898_v43  ;;  %s2342_s28 = scalar_lea.vmem %s2462_s3, %s1684_s18  ;;  %v1172_v2 = vshrl.u32 %v1772_v60, 16  ;;  %v1175_v3 = vshll.u32 %v1772_v60, 16  ;;  %v1764_v19 = vcombine.low %v2311_v51, %v2306_v48  ;;  %v2058_v20 = vld [vmem:[%s2463_s4 + $0xa8] sm:$0xff]   ;;  %v2062_v26 = vld [vmem:[%s2463_s4 + $0xc0] sm:$0xff]  }
  0x22   : > { %1876 = vmatprep.subr.bf16.mxu0 %v2113_v1  ;;  %1887 = vmatmul.mubr.msk.bf16.vlgmr.msra.gmra.mrb[4].mxu1 %vm445_vm1, %v626_v25  ;;  %v1038_v59 = vrot.slane %v1036_v54, 1  ;;  %v1297_v5 = vld [vmem:[%s2342_s28] sm:$0xf]  ;;  %v2353_v6 = vld [vmem:[%s2342_s28 + $0x4] sm:$0x1] }
  0x23   : > { %1899 = vmatpush3.bf16.msra.mxu1 %v2041_v22  ;;  %1902 = vmatprep.mubr.msk.bf16.mxu1 %vm2114_vm0, %v2113_v1  ;;  %v1174_v8 = vrot.slane %v1172_v2, 1  ;;  %v1177_v9 = vrot.slane %v1175_v3, 2  ;;  %v1787_v10 = vcombine.low %v1297_v5, %v2353_v6  ;;  %v1372_v17 = vld [vmem:[%s2342_s28] sm:$0xe]  ;;  %v1438_v18 = vld [vmem:[%s2342_s28 + $0x4] sm:$0x3] }
  0x24   : > { %1900 = vmatprep.subr.bf16.mxu1 %v2113_v1  ;;  %v1039_v0 = vor.u32 %v1038_v59, %v1034_v58  ;;  %v1803_v23 = vcombine.low %v1372_v17, %v1438_v18  ;;  %v1105_v25 = vrot.slane %v1764_v19, 1  ;;  %v2067_v36 = vld [vmem:[%s2463_s4 + $0xe0] sm:$0xff]   ;;  %v1795_v38 = vcombine.low %v1372_v17, %v2353_v6 }
  0x25   : > { %1877 = vmatpush3.bf16.msra.mxu0 %v2038_v30  ;;  %v1178_v14 = vor.u32 %v1177_v9, %v1174_v8  ;;  %v1312_v15 = vshll.u32 %v1787_v10, 16  ;;  %v1310_v21 = vshrl.u32 %v1787_v10, 16  ;;  %v2068_v30 = vld [vmem:[%s2463_s4 + $0xf0] sm:$0xff]  }
  0x26   : > { %1890 = vmatprep.subr.bf16.mxu0 %v2113_v1  ;;  %v1448_v28 = vshrl.u32 %v1803_v23, 16  ;;  %v1451_v29 = vshll.u32 %v1803_v23, 16 }
  0x27   : > { %1901 = vmatpush3.bf16.msra.mxu1 %v2043_v35  ;;  %v1314_v22 = vrot.slane %v1312_v15, 1  ;;  %v1235_v35 = vld [vmem:[%s2342_s28] sm:$0xf]  ;;  %s1685_s28 = sshll.u32 %s2478_s22, 1 }
  0x28   : > { %1879 = vmatmul.mubr.msk.bf16.vlgmr.msra.gmra.mrb[4].mxu0 %vm445_vm1, %v553_v37  ;;  %1914 = vmatprep.subr.bf16.mxu1 %v2113_v1  ;;  %v1450_v32 = vrot.slane %v1448_v28, 1  ;;  %v1453_v33 = vrot.slane %v1451_v29, 2  ;;  %s406_s7 = sadd.s32 %s1685_s28, %s2486_s21 }
  0x29   : > { %1891 = vmatpush3.bf16.msra.mxu0 %v2040_v34  ;;  %1894 = vmatprep.mubr.msk.bf16.mxu0 %vm2114_vm0, %v2113_v1  ;;  %v1315_v27 = vor.u32 %v1314_v22, %v1310_v21  ;;  %v2070_v34 = vld [vmem:[%s2463_s4 + $0xf8] sm:$0xff]   ;;  %s1686_s19 = sshll.u32 %s406_s7, 3 }
  0x2a   : > { %1892 = vmatprep.subr.bf16.mxu0 %v2113_v1  ;;  %1903 = vmatmul.mubr.msk.bf16.vlgmr.msra.gmra.mrb[8].mxu1 %vm445_vm1, %v763_v40  ;;  %v1454_v37 = vor.u32 %v1453_v33, %v1450_v32  ;;  %v1381_v40 = vrot.slane %v1795_v38, 1  ;;  %s408_s22 = scalar_lea.vmem %s2465_s6, %s1686_s19 }
  0x2b   : > { %1915 = vmatpush3.bf16.msra.mxu1 %v2046_v41  ;;  %1918 = vmatprep.mubr.msk.bf16.mxu1 %vm2114_vm0, %v2113_v1 }
  0x2c   : > { %1916 = vmatprep.subr.bf16.mxu1 %v2113_v1 }
  0x2d   : > { %1893 = vmatpush3.bf16.msra.mxu0 %v2042_v42 }
  0x2e   : > { %1906 = vmatprep.subr.bf16.mxu0 %v2113_v1 }
  0x2f   : > { %1917 = vmatpush3.bf16.msra.mxu1 %v2048_v45 }
  0x30   : > { %1895 = vmatmul.mubr.msk.bf16.vlgmr.msra.gmra.mrb[8].mxu0 %vm445_vm1, %v683_v49  ;;  %1930 = vmatprep.subr.bf16.mxu1 %v2113_v1 }
  0x31   : > { %1907 = vmatpush3.bf16.msra.mxu0 %v2045_v46  ;;  %1910 = vmatprep.mubr.msk.bf16.mxu0 %vm2114_vm0, %v2113_v1 }
  0x32   : > { %1908 = vmatprep.subr.bf16.mxu0 %v2113_v1  ;;  %1919 = vmatmul.mubr.msk.bf16.vlgmr.msra.gmra.mrb[12].mxu1 %vm445_vm1, %v902_v52 }
  0x33   : > { %1931 = vmatpush3.bf16.msra.mxu1 %v2052_v53  ;;  %1934 = vmatprep.mubr.msk.bf16.mxu1 %vm2114_vm0, %v2113_v1 }
  0x34   : > { %1932 = vmatprep.subr.bf16.mxu1 %v2113_v1 }
  0x35   : > { %1909 = vmatpush3.bf16.msra.mxu0 %v2047_v57 }
  0x36   : > { %1922 = vmatprep.subr.bf16.mxu0 %v2113_v1 }
  0x37   : > { %1933 = vmatpush3.bf16.msra.mxu1 %v2054_v61 }
  0x38   : > { %1911 = vmatmul.mubr.msk.bf16.vlgmr.msra.gmra.mrb[12].mxu0 %vm445_vm1, %v829_v62  ;;  %1946 = vmatprep.subr.bf16.mxu1 %v2113_v1 }
  0x39   : > { %1923 = vmatpush3.bf16.msra.mxu0 %v2051_v63  ;;  %1926 = vmatprep.mubr.msk.bf16.mxu0 %vm2114_vm0, %v2113_v1 }
  0x3a   : > { %1924 = vmatprep.subr.bf16.mxu0 %v2113_v1  ;;  %1935 = vmatmul.mubr.msk.bf16.vlgmr.msra.gmra.mrb[16].mxu1 %vm445_vm1, %v1039_v0 }
  0x3b   : > { %1947 = vmatpush3.bf16.msra.mxu1 %v2057_v4  ;;  %1950 = vmatprep.mubr.msk.bf16.mxu1 %vm2114_vm0, %v2113_v1 }
  0x3c   : > { %1948 = vmatprep.subr.bf16.mxu1 %v2113_v1 }
  0x3d   : > { %1925 = vmatpush3.bf16.msra.mxu0 %v2053_v7 }
  0x3e   : > { %1938 = vmatprep.subr.bf16.mxu0 %v2113_v1 }
  0x3f   : > { %1949 = vmatpush3.bf16.msra.mxu1 %v2059_v11 }
  0x40   : > { %1927 = vmatmul.mubr.msk.bf16.vlgmr.msra.gmra.mrb[16].mxu0 %vm445_vm1, %v959_v12  ;;  %1962 = vmatprep.subr.bf16.mxu1 %v2113_v1 }
  0x41   : > { %1939 = vmatpush3.bf16.msra.mxu0 %v2056_v13  ;;  %1942 = vmatprep.mubr.msk.bf16.mxu0 %vm2114_vm0, %v2113_v1 }
  0x42   : > { %1940 = vmatprep.subr.bf16.mxu0 %v2113_v1  ;;  %1951 = vmatmul.mubr.msk.bf16.vlgmr.msra.gmra.mrb[20].mxu1 %vm445_vm1, %v1178_v14 }
  0x43   : > { %1963 = vmatpush3.bf16.msra.mxu1 %v2063_v16  ;;  %1966 = vmatprep.mubr.msk.bf16.mxu1 %vm2114_vm0, %v2113_v1 }
  0x44   : > { %1964 = vmatprep.subr.bf16.mxu1 %v2113_v1 }
  0x45   : > { %1941 = vmatpush3.bf16.msra.mxu0 %v2058_v20 }
  0x46   : > { %1954 = vmatprep.subr.bf16.mxu0 %v2113_v1 }
  0x47   : > { %1965 = vmatpush3.bf16.msra.mxu1 %v2065_v24 }
  0x48   : > { %1943 = vmatmul.mubr.msk.bf16.vlgmr.msra.gmra.mrb[20].mxu0 %vm445_vm1, %v1105_v25  ;;  %1978 = vmatprep.subr.bf16.mxu1 %v2113_v1 }
  0x49   : > { %1955 = vmatpush3.bf16.msra.mxu0 %v2062_v26  ;;  %1958 = vmatprep.mubr.msk.bf16.mxu0 %vm2114_vm0, %v2113_v1 }
  0x4a   : > { %1956 = vmatprep.subr.bf16.mxu0 %v2113_v1  ;;  %1967 = vmatmul.mubr.msk.bf16.vlgmr.msra.gmra.mrb[24].mxu1 %vm445_vm1, %v1315_v27 }
  0x4b   : > { %1979 = vmatpush3.bf16.msra.mxu1 %v2068_v30  ;;  %1982 = vmatprep.mubr.msk.bf16.mxu1 %vm2114_vm0, %v2113_v1 }
  0x4c   : > { %1980 = vmatprep.subr.bf16.mxu1 %v2113_v1 }
  0x4d   : > { %1957 = vmatpush3.bf16.msra.mxu0 %v2064_v31 }
  0x4e   : > { %1970 = vmatprep.subr.bf16.mxu0 %v2113_v1 }
  0x4f   : > { %1981 = vmatpush3.bf16.msra.mxu1 %v2070_v34 }
  0x50   : > { %1959 = vmatmul.mubr.msk.bf16.vlgmr.msra.gmra.mrb[24].mxu0 %vm445_vm1, %v1235_v35 }
  0x51   : > { %1971 = vmatpush3.bf16.msra.mxu0 %v2067_v36  ;;  %1974 = vmatprep.mubr.msk.bf16.mxu0 %vm2114_vm0, %v2113_v1 }
  0x52   : > { %1972 = vmatprep.subr.bf16.mxu0 %v2113_v1  ;;  %1983 = vmatmul.mubr.msk.bf16.vlgmr.msra.gmra.mrb[28].mxu1 %vm445_vm1, %v1454_v37 }
  0x55   : > { %1973 = vmatpush3.bf16.msra.mxu0 %v2069_v39 }
  0x58   : > { %1975 = vmatmul.mubr.msk.bf16.vlgmr.msra.gmra.mrb[28].mxu0 %vm445_vm1, %v1381_v40 }
  0xeb   : > { %v538_v41 = vpop.f32.mrb[0].mxu1 }
  0xec   : > { %v1872_v42 = vpop.f32.mrb[1].mxu1 }
  0xed   : > { %v541_v43 = vpop.f32.mrb[2].mxu1 }
  0xee   : > { %v1873_v44 = vpop.f32.mrb[3].mxu1 }
  0xf3   : > { %v483_v45 = vpop.f32.mrb[0].mxu0 }
  0xf4   : > { %v539_v46 = vadd.f32 %v538_v41, %v483_v45  ;;  %v1864_v47 = vpop.f32.mrb[1].mxu0 }
  0xf5   : > { %v486_v48 = vpop.f32.mrb[2].mxu0  ;;  %v676_v49 = vpop.f32.mrb[4].mxu1 }
  0xf6   : > { %v1865_v50 = vpop.f32.mrb[3].mxu0  ;;  %v1888_v51 = vpop.f32.mrb[5].mxu1 }
  0xf7   : > { %v679_v52 = vpop.f32.mrb[6].mxu1 }
  0xf8   : > { %v1889_v53 = vpop.f32.mrb[7].mxu1 }
  0xf9   : > { %v1807_v53 = vld [vmem:[%s2464_s5] ss:$0 sm:$0xff] }
  0xfb   : > { %v603_v1 = vpop.f32.mrb[4].mxu0 }
  0xfc   : > { %v609_v54 = vadd.f32 %v603_v1, %v539_v46  ;;  %v1880_v55 = vpop.f32.mrb[5].mxu0 }
  0xfd   : > { %v606_v56 = vpop.f32.mrb[6].mxu0  ;;  %v813_v57 = vpop.f32.mrb[8].mxu1 }
  0xfe   : > { %v1881_v58 = vpop.f32.mrb[7].mxu0  ;;  %v682_v59 = vadd.f32 %v676_v49, %v609_v54  ;;  %v1904_v60 = vpop.f32.mrb[9].mxu1 }
  0xff   : > { %v816_v61 = vpop.f32.mrb[10].mxu1 }
 0x100   : > { %v1905_v62 = vpop.f32.mrb[11].mxu1 }
 0x103   : > { %v738_v63 = vpop.f32.mrb[8].mxu0 }
 0x104   : > { %v744_v0 = vadd.f32 %v738_v63, %v682_v59  ;;  %v1896_v2 = vpop.f32.mrb[9].mxu0 }
 0x105   : > { %v741_v3 = vpop.f32.mrb[10].mxu0  ;;  %v952_v4 = vpop.f32.mrb[12].mxu1 }
 0x106   : > { %v1897_v5 = vpop.f32.mrb[11].mxu0  ;;  %v819_v6 = vadd.f32 %v813_v57, %v744_v0  ;;  %v1920_v7 = vpop.f32.mrb[13].mxu1 }
 0x107   : > { %v955_v8 = vpop.f32.mrb[14].mxu1 }
 0x108   : > { %v1921_v9 = vpop.f32.mrb[15].mxu1 }
 0x10b   : > { %v879_v10 = vpop.f32.mrb[12].mxu0 }
 0x10c   : > { %v885_v11 = vadd.f32 %v879_v10, %v819_v6  ;;  %v1912_v12 = vpop.f32.mrb[13].mxu0 }
 0x10d   : > { %v882_v13 = vpop.f32.mrb[14].mxu0  ;;  %v1089_v14 = vpop.f32.mrb[16].mxu1 }
 0x10e   : > { %v1913_v15 = vpop.f32.mrb[15].mxu0  ;;  %v958_v16 = vadd.f32 %v952_v4, %v885_v11  ;;  %v1936_v17 = vpop.f32.mrb[17].mxu1 }
 0x10f   : > { %v1092_v18 = vpop.f32.mrb[18].mxu1 }
 0x110   : > { %v1937_v19 = vpop.f32.mrb[19].mxu1 }
 0x113   : > { %v1014_v20 = vpop.f32.mrb[16].mxu0 }
 0x114   : > { %v1020_v21 = vadd.f32 %v1014_v20, %v958_v16  ;;  %v1928_v22 = vpop.f32.mrb[17].mxu0 }
 0x115   : > { %v1017_v23 = vpop.f32.mrb[18].mxu0  ;;  %v1228_v24 = vpop.f32.mrb[20].mxu1 }
 0x116   : > { %v1929_v25 = vpop.f32.mrb[19].mxu0  ;;  %v1095_v26 = vadd.f32 %v1089_v14, %v1020_v21  ;;  %v1952_v27 = vpop.f32.mrb[21].mxu1 }
 0x117   : > { %v1231_v28 = vpop.f32.mrb[22].mxu1 }
 0x118   : > { %v1953_v29 = vpop.f32.mrb[23].mxu1 }
 0x11b   : > { %v1155_v30 = vpop.f32.mrb[20].mxu0 }
 0x11c   : > { %v1161_v31 = vadd.f32 %v1155_v30, %v1095_v26  ;;  %v1944_v32 = vpop.f32.mrb[21].mxu0 }
 0x11d   : > { %v1158_v33 = vpop.f32.mrb[22].mxu0  ;;  %v1365_v34 = vpop.f32.mrb[24].mxu1 }
 0x11e   : > { %v1945_v35 = vpop.f32.mrb[23].mxu0  ;;  %v1234_v36 = vadd.f32 %v1228_v24, %v1161_v31  ;;  %v1968_v37 = vpop.f32.mrb[25].mxu1 }
 0x11f   : > { %v1368_v38 = vpop.f32.mrb[26].mxu1 }
 0x120   : > { %v1969_v39 = vpop.f32.mrb[27].mxu1 }
 0x123   : > { %v1290_v40 = vpop.f32.mrb[24].mxu0 }
 0x124   : > { %v1296_v41 = vadd.f32 %v1290_v40, %v1234_v36  ;;  %v1960_v42 = vpop.f32.mrb[25].mxu0 }
 0x125   : > { %v1293_v43 = vpop.f32.mrb[26].mxu0  ;;  %v1504_v44 = vpop.f32.mrb[28].mxu1 }
 0x126   : > { %v1961_v45 = vpop.f32.mrb[27].mxu0  ;;  %v1371_v46 = vadd.f32 %v1365_v34, %v1296_v41  ;;  %v1984_v47 = vpop.f32.mrb[29].mxu1 }
 0x127   : > { %v1507_v48 = vpop.f32.mrb[30].mxu1 }
 0x128   : > { %v1985_v49 = vpop.f32.mrb[31].mxu1 }
 0x12b   : > { %v1431_v50 = vpop.f32.mrb[28].mxu0 }
 0x12c   : > { %v1437_v51 = vadd.f32 %v1431_v50, %v1371_v46  ;;  %v1976_v52 = vpop.f32.mrb[29].mxu0 }
 0x12d   : > { %v1434_v1 = vpop.f32.mrb[30].mxu0 }
 0x12e   : > { %v1510_v54 = vadd.f32 %v1504_v44, %v1437_v51  ;;  %v1977_v55 = vpop.f32.mrb[31].mxu0 }
 0x130   : > { %v1518_v56 = vadd.f32 %v1807_v53, %v1510_v54 }
 0x132   : > { %1519 = vst [vmem:[%s408_s22] sm:$0xff] %v1518_v56 }
 0x133 PF: > { %s16_s25 = sadd.s32 1, %s2111_s25   ;;  %s2467_s21 = smov %s2103_s23 }
 0x134   : > { %p13_p11 = scmp.ge.s32.totalorder %s16_s25, 6   ;;  %s2468_s22 = smov %s2107_s24 }
 0x135   : > { %s2469_s23 = smov %s2472_s26  ;;  %s2470_s24 = smov %s2476_s27 }
 0x136   :  { %15 = sbr.rel (!%p13_p11) target bundleno = 3 (0x3), region = 98 }

</bundles_post_ra>
